<compile_context>
chip_gen: v7x
topology: tpu7x:2x2x1
jax: 0.10.0
libtpu: 0.0.40
codegen_flags: <defaults>
</compile_context>

<pallas_src>
import math

import jax
import jax.numpy as jnp
from jax.experimental import pallas as pl
from jax.experimental.pallas import tpu as pltpu

_MIB = 1024 * 1024
_BYPASS_X_BYTES = 2 * _MIB   # below this, a fused XLA GEMV beats kernel overhead
_MIN_LANES = 128


def _linreg_kernel(x_ref, w_ref, b_ref, o_ref):
    # x_ref: (TILE_N, d_in) VMEM (streamed), w_ref: (1, d_in) VMEM (resident),
    # b_ref: (1, 1) SMEM scalar, o_ref: (1, TILE_N) VMEM (lane-dense).
    # (1, d_in) . (TILE_N, d_in)^T -> (1, TILE_N), f32 accumulation on the MXU.
    acc = jax.lax.dot_general(
        w_ref[...],
        x_ref[...],
        dimension_numbers=(((1,), (1,)), ((), ())),
        preferred_element_type=jnp.float32,
    )
    o_ref[...] = (acc + b_ref[0, 0]).astype(o_ref.dtype)


def _xla_forward(x, weight, bias):
    return (jnp.dot(x, weight.T) + bias).astype(x.dtype)


def _vmem_capacity_bytes():
    """Physical VMEM of the local chip; conservative (v7x, 64 MiB) fallback."""
    try:
        return int(pltpu.get_tpu_info().vmem_capacity_bytes)
    except Exception:
        return 64 * _MIB


def _choose_tile_n(n, d_in, itemsize, x_buf_budget):
    """Rows per grid step: largest multiple of 128 whose lane-padded VMEM
    buffer fits x_buf_budget (floored at 128 rows)."""
    lane_row_bytes = pl.cdiv(d_in, _MIN_LANES) * _MIN_LANES * itemsize
    rows = max(x_buf_budget // lane_row_bytes, _MIN_LANES)
    rows = max((rows // _MIN_LANES) * _MIN_LANES, _MIN_LANES)
    # No point exceeding the (128-rounded) batch size.
    rows = min(rows, pl.cdiv(n, _MIN_LANES) * _MIN_LANES)
    return rows


def linreg_forward(x, weight, bias):
    """y = x @ weight.T + bias, with x:(N, d_in), weight:(1, d_in), bias:(1,)."""
    n, d_in = x.shape
    assert weight.shape == (1, d_in)

    itemsize = jnp.dtype(x.dtype).itemsize
    x_bytes = n * d_in * itemsize

    # Small-problem / padding-dominated bypass: grid overhead, the 128-row
    # minimum tile, and 128-lane VMEM padding dwarf the work at these sizes.
    if x_bytes <= _BYPASS_X_BYTES or d_in < _MIN_LANES or n < _MIN_LANES:
        return _xla_forward(x, weight, bias)

    # Generation-aware sizing: v5e/v6e have 128 MiB VMEM per core, v7x 64 MiB.
    vmem_cap = _vmem_capacity_bytes()
    x_buf_budget = 14 * _MIB if vmem_cap >= 96 * _MIB else 10 * _MIB
    usable_vmem = (vmem_cap * 3) // 4

    tile_n = _choose_tile_n(n, d_in, itemsize, x_buf_budget)
    lane_row_bytes = pl.cdiv(d_in, _MIN_LANES) * _MIN_LANES * itemsize
    needed_vmem = (
        2 * tile_n * lane_row_bytes                                   # x double-buffer
        + 2 * 8 * tile_n * 4                                          # (1,TILE_N) out buffers
        + 2 * 8 * pl.cdiv(d_in, _MIN_LANES) * _MIN_LANES * itemsize   # resident weight row
        + 4 * _MIB                                                    # compiler scratch slack
    )
    if needed_vmem > usable_vmem:
        # TODO(synk): add a trailing "arbitrary" K-reduction grid axis with a
        # VMEM f32 accumulator (pl.when init/finalize) so huge-d_in cases stay
        # in Pallas instead of falling back to XLA.
        return _xla_forward(x, weight, bias)

    num_tiles = pl.cdiv(n, tile_n)
    b_smem = jnp.asarray(bias, jnp.float32).reshape(1, 1)  # f32 add for accuracy

    out = pl.pallas_call(
        _linreg_kernel,
        out_shape=jax.ShapeDtypeStruct((1, n), x.dtype),
        grid_spec=pltpu.PrefetchScalarGridSpec(
            num_scalar_prefetch=0,
            grid=(num_tiles,),
            in_specs=[
                # Stream x over the batch dimension (pipelined DMA; ragged
                # last block handled by masked boundary reads).
                pl.BlockSpec((tile_n, d_in), lambda i: (i, 0)),
                # Weight row: constant block index -> fetched once, VMEM-resident.
                pl.BlockSpec((1, d_in), lambda i: (0, 0)),
                # Bias scalar in SMEM.
                pl.BlockSpec(memory_space=pltpu.MemorySpace.SMEM),
            ],
            # Lane-dense (1, TILE_N) output blocks; OOB lanes of the ragged
            # last block are masked on store.
            out_specs=pl.BlockSpec((1, tile_n), lambda i: (0, i)),
        ),
        compiler_params=pltpu.CompilerParams(
            # Batch tiles are independent.
            # TODO(synk): switch to pltpu.CORE_PARALLEL on v7x (2 TCs/chip)
            # once verified on hardware; plain "parallel" is a no-op there.
            dimension_semantics=("parallel",),
            vmem_limit_bytes=int(min(usable_vmem, max(needed_vmem, 48 * _MIB))),
        ),
    )(x, weight, b_smem)

    # TODO(synk): optionally stream x/weight as bf16 (keeping the f32 MXU
    # accumulation) for ~2x on this HBM-bound GEMV if the caller tolerates it.
    return out.reshape(n, 1)


if __name__ == "__main__":
    key = jax.random.PRNGKey(0)

    # Mirrors init_torch_weights: xavier_uniform_ on weight, zeros on bias.
    def make_params(k, d_in):
        bound = math.sqrt(6.0 / (d_in + 1))
        w = jax.random.uniform(
            k, (1, d_in), jnp.float32, minval=-bound, maxval=bound
        )
        b = jnp.zeros((1,), jnp.float32)
        return w, b

    cases = [
        (8, 32),        # LinReg demo scale -> XLA bypass path
        (4096, 256),    # single-tile Pallas path
        (20000, 256),   # multi-tile Pallas path with a ragged last block
    ]
    for n, d_in in cases:
        key, k_x, k_w = jax.random.split(key, 3)
        weight, bias = make_params(k_w, d_in)
        x = jax.random.normal(k_x, (n, d_in), jnp.float32)

        y = linreg_forward(x, weight, bias)
        jax.block_until_ready(y)

        y_ref = x @ weight.T + bias
        assert y.shape == (n, 1)
        # Tolerance accounts for TPU default-precision (bf16-pass) matmuls
        # differing slightly between the kernel and the XLA reference.
        assert jnp.allclose(y, y_ref, atol=2e-2, rtol=2e-2), (n, d_in)

    print("KERNEL_OK")
</pallas_src>

<mosaic_0001>
module attributes {stable_mosaic.version = 11 : i64} {
  func.func @_linreg_kernel(%arg0: i32, %arg1: memref<4096x256xf32, #tpu.memory_space<vmem>>, %arg2: memref<1x256xf32, #tpu.memory_space<vmem>>, %arg3: memref<1x1xf32, #tpu.memory_space<smem>>, %arg4: memref<1x4096xf32, #tpu.memory_space<vmem>>) attributes {dimension_semantics = [#tpu.dimension_semantics<parallel>], iteration_bounds = array<i64: 1>, scalar_prefetch = 0 : i64, scratch_operands = 0 : i64, tpu.core_type = #tpu.core_type<tc>, window_params = [{transform_indices = @transform_0, window_bounds = array<i64: 4096, 256>}, {pipeline_mode = #tpu.pipeline_mode<synchronous>, transform_indices = @transform_1, window_bounds = array<i64: 1, 256>}, {transform_indices = @transform_2, window_bounds = array<i64: 1, 1>}, {transform_indices = @transform_3, window_bounds = array<i64: 1, 4096>}]} {
    %c0 = arith.constant 0 : index
    %c0_0 = arith.constant 0 : index
    %0 = vector.load %arg2[%c0, %c0_0] : memref<1x256xf32, #tpu.memory_space<vmem>>, vector<1x256xf32>
    %c0_1 = arith.constant 0 : index
    %c0_2 = arith.constant 0 : index
    %1 = vector.load %arg1[%c0_1, %c0_2] : memref<4096x256xf32, #tpu.memory_space<vmem>>, vector<4096x256xf32>
    %cst = arith.constant dense<0.000000e+00> : vector<1x4096xf32>
    %2 = tpu.matmul %0, %1, %cst {dimension_numbers = #tpu.dot_dimension_numbers<[1], [1], [0], [0], [0, 0, 1, 0], [], []>} : vector<1x256xf32>, vector<4096x256xf32>, vector<1x4096xf32> -> vector<1x4096xf32>
    %c0_3 = arith.constant 0 : index
    %c0_4 = arith.constant 0 : index
    %3 = memref.load %arg3[%c0_3, %c0_4] : memref<1x1xf32, #tpu.memory_space<smem>>
    %4 = vector.broadcast %3 : f32 to vector<1x4096xf32>
    %5 = arith.addf %2, %4 : vector<1x4096xf32>
    %c0_5 = arith.constant 0 : index
    %c0_6 = arith.constant 0 : index
    %6 = vector.load %arg4[%c0_5, %c0_6] : memref<1x4096xf32, #tpu.memory_space<vmem>>, vector<1x4096xf32>
    tpu.vector_store %arg4[%c0_5, %c0_6], %5 {strides = array<i32>} : memref<1x4096xf32, #tpu.memory_space<vmem>>, vector<1x4096xf32>,
    return
  }
  func.func @transform_0(%arg0: i32) -> (i32, i32) {
    %c0_i32 = arith.constant 0 : i32
    %c0_i32_0 = arith.constant 0 : i32
    return %arg0, %c0_i32 : i32, i32
  }
  func.func @transform_1(%arg0: i32) -> (i32, i32) {
    %c0_i32 = arith.constant 0 : i32
    %c0_i32_0 = arith.constant 0 : i32
    %c0_i32_1 = arith.constant 0 : i32
    return %c0_i32, %c0_i32_0 : i32, i32
  }
  func.func @transform_2(%arg0: i32) -> (i32, i32) {
    %c0_i32 = arith.constant 0 : i32
    %c0_i32_0 = arith.constant 0 : i32
    %c0_i32_1 = arith.constant 0 : i32
    return %c0_i32, %c0_i32_0 : i32, i32
  }
  func.func @transform_3(%arg0: i32) -> (i32, i32) {
    %c0_i32 = arith.constant 0 : i32
    %c0_i32_0 = arith.constant 0 : i32
    return %c0_i32, %arg0 : i32, i32
  }
}

</mosaic_0001>

<bundles_post_ra>
// kernel: tpu_custom_call.1
= control target key start
LH: loop header
LB: loop body
LE: loop exit
PB: predicated region body
PF: predicated region fallthrough
CT: control target
= control target key end

     0   :  { %9 = vsyncpa [#allocation4], 0  ;;  %s3763_s0 = inlined_call_operand.hbm [shape: f32[4096,256], index: 0, kind: input, shape index: {}]   ;;  %s3764_s1 = inlined_call_operand.hbm [shape: f32[1,256], index: 1, kind: input, shape index: {}]   ;;  %s3765_s2 = inlined_call_operand.<no memory space> [shape: f32[1,1], index: 2, kind: input, shape index: {}]   ;;  %s3766_s3 = inlined_call_operand.hbm [shape: f32[1,4096], index: 3, kind: output, shape index: {}]  }
   0x1   :  { %10 = vsyncpa [#allocation7], 0 }
   0x2   :  { %11 = vsyncpa [#allocation5], 0  ;;  %s3570_s12 = smov [#allocation3]   ;;  %s3498_s16 = scalar_lea.hbm %s3763_s0, 131072 }
   0x3   :  { %s17_s13 = sshll.u32 %s3570_s12, 4  ;;  %p3499_p0 = scmp.ne.s32.totalorder %s3763_s0, %s3498_s16  ;;  %s18_s13 = int_to_ptr.vmem [resolvable:$true] %s17_s13 }
   0x4   :  { %p3502_p1 = scmp.lt.u32.totalorder %s3498_s16, %s3763_s0 }
   0x6   :  { %p3504_p2 = pnand %p3502_p1, %p3499_p0 }
   0x8   :  { %3507 = shalt.err (!%p3504_p2)
}
   0x9   :  { %s3508_s21 = scalar_lea.vmem %s18_s13, 131072  ;;  %p3513_p4 = scmp.lt.s32.totalorder %s18_s13, %s18_s13 }
   0xa   :  { %p3509_p3 = scmp.ne.s32.totalorder %s18_s13, %s3508_s21  ;;  %p3514_p5 = scmp.lt.s32.totalorder %s3508_s21, %s3508_s21 }
   0xc   :  { %p3515_p6 = por %p3514_p5, %p3513_p4 }
   0xe   :  { %p3516_p7 = pnand %p3515_p6, %p3509_p3 }
  0x10   :  { %3519 = shalt.err (!%p3516_p7)
}
  0x11   :  { %s3571_s22 = smov 256   ;;  %s3572_s23 = smov 16  }
  0x12   :  { %23 = dma.hbm_to_vmem [thread:$0]  %s3763_s0, 131072, %s18_s13, [#allocation4], %s3571_s22, %s3571_s22, %s3572_s23  }
  0x13   :  { %s3573_s26 = smov [#allocation6]   ;;  %s3520_s30 = scalar_lea.hbm %s3764_s1, 32 }
  0x14   :  { %s30_s27 = sshll.u32 %s3573_s26, 4  ;;  %p3521_p8 = scmp.ne.s32.totalorder %s3764_s1, %s3520_s30  ;;  %s31_s27 = int_to_ptr.vmem [resolvable:$true] %s30_s27 }
  0x15   :  { %p3524_p9 = scmp.lt.u32.totalorder %s3520_s30, %s3764_s1 }
  0x17   :  { %p3526_p10 = pnand %p3524_p9, %p3521_p8 }
  0x19   :  { %3529 = shalt.err (!%p3526_p10)
}
  0x1a   :  { %s3530_s8 = scalar_lea.vmem %s31_s27, 32  ;;  %p3535_p12 = scmp.lt.s32.totalorder %s31_s27, %s31_s27 }
  0x1b   :  { %p3531_p11 = scmp.ne.s32.totalorder %s31_s27, %s3530_s8  ;;  %p3536_p13 = scmp.lt.s32.totalorder %s3530_s8, %s3530_s8 }
  0x1d   :  { %p3537_p0 = por %p3536_p13, %p3535_p12 }
  0x1f   :  { %p3538_p1 = pnand %p3537_p0, %p3531_p11 }
  0x21   :  { %3541 = shalt.err (!%p3538_p1)
}
  0x22   :  { %33 = dma.hbm_to_vmem [thread:$0]  %s3764_s1, 32, %s31_s27, [#allocation7]  }
  0x23   :  { %3564 = dma.done.wait [#allocation4], 131072  }
  0x24   :  { %3565 = vsyncadd [#allocation4], 4294836224 }
  0x25   :  { %3566 = dma.done.wait [#allocation7], 32  }
  0x26   :  { %3567 = vsyncadd [#allocation7], 4294967264  ;;  %v44_v0 = vld [vmem:[#allocation3 + $0x8] sm:$0xff]  ;;  %v46_v1 = vld [vmem:[#allocation3 + $0x18] sm:$0xff]  ;;  %v1070_v62 = vlaneseq }
  0x27   :  { %v108_v2 = vld [vmem:[#allocation3 + $0x208] sm:$0xff]  ;;  %v2468_v3 = vpack.c.bf16 %v46_v1, %v44_v0  ;;  %v110_v4 = vld [vmem:[#allocation3 + $0x218] sm:$0xff]  ;;  %v43_v5 = vld [vmem:[#allocation3] sm:$0xff] }
  0x28   :  { %v45_v6 = vld [vmem:[#allocation3 + $0x10] sm:$0xff]  ;;  %v2532_v7 = vpack.c.bf16 %v110_v4, %v108_v2  ;;  %v107_v9 = vld [vmem:[#allocation3 + $0x200] sm:$0xff]  ;;  %v48_v11 = vld [vmem:[#allocation3 + $0x28] sm:$0xff] }
  0x29   :  { %v2470_v8 = vpack.c.bf16 %v45_v6, %v43_v5  ;;  %v109_v10 = vld [vmem:[#allocation3 + $0x210] sm:$0xff]  ;;  %2469 = vmatprep.subr.bf16.mxu0 %v2468_v3  ;;  %v50_v13 = vld [vmem:[#allocation3 + $0x38] sm:$0xff]  ;;  %v112_v14 = vld [vmem:[#allocation3 + $0x228] sm:$0xff]  ;;  %v3620_v3 = vshrl.u32 %v1070_v62, 7 }
  0x2a   :  { %v2534_v12 = vpack.c.bf16 %v109_v10, %v107_v9  ;;  %v114_v15 = vld [vmem:[#allocation3 + $0x238] sm:$0xff]  ;;  %2533 = vmatprep.subr.bf16.mxu1 %v2532_v7  ;;  %v2472_v16 = vpack.c.bf16 %v50_v13, %v48_v11  ;;  %v47_v18 = vld [vmem:[#allocation3 + $0x20] sm:$0xff]  ;;  %v49_v19 = vld [vmem:[#allocation3 + $0x30] sm:$0xff] }
  0x2b   :  { %2471 = vmatpush1.bf16.xpose.msra.mxu0 %v2470_v8  ;;  %v2536_v17 = vpack.c.bf16 %v114_v15, %v112_v14  ;;  %v111_v20 = vld [vmem:[#allocation3 + $0x220] sm:$0xff]  ;;  %v113_v21 = vld [vmem:[#allocation3 + $0x230] sm:$0xff]  ;;  %v52_v22 = vld [vmem:[#allocation3 + $0x48] sm:$0xff]  ;;  %v2474_v26 = vpack.c.bf16 %v49_v19, %v47_v18  ;;  %v1072_v13 = vsub.s32 0, %v3620_v3 }
  0x2c   :  { %2535 = vmatpush1.bf16.xpose.msra.mxu1 %v2534_v12  ;;  %2473 = vmatprep.subr.bf16.mxu0 %v2472_v16  ;;  %v54_v23 = vld [vmem:[#allocation3 + $0x58] sm:$0xff]  ;;  %v116_v24 = vld [vmem:[#allocation3 + $0x248] sm:$0xff]  ;;  %v2538_v27 = vpack.c.bf16 %v113_v21, %v111_v20  ;;  %v51_v30 = vld [vmem:[#allocation3 + $0x40] sm:$0xff]  ;;  %v1076_v12 = vsub.s32 1, %v3620_v3 }
  0x2d   :  { %2537 = vmatprep.subr.bf16.mxu1 %v2536_v17  ;;  %v118_v25 = vld [vmem:[#allocation3 + $0x258] sm:$0xff]  ;;  %v2476_v28 = vpack.c.bf16 %v54_v23, %v52_v22  ;;  %v53_v31 = vld [vmem:[#allocation3 + $0x50] sm:$0xff]  ;;  %v115_v32 = vld [vmem:[#allocation3 + $0x240] sm:$0xff] }
  0x2e   :  { %v2540_v29 = vpack.c.bf16 %v118_v25, %v116_v24  ;;  %v117_v33 = vld [vmem:[#allocation3 + $0x250] sm:$0xff]  ;;  %v56_v34 = vld [vmem:[#allocation3 + $0x68] sm:$0xff]  ;;  %v58_v35 = vld [vmem:[#allocation3 + $0x78] sm:$0xff]  ;;  %v2478_v38 = vpack.c.bf16 %v53_v31, %v51_v30 }
  0x2f   :  { %v120_v36 = vld [vmem:[#allocation3 + $0x268] sm:$0xff]  ;;  %v122_v37 = vld [vmem:[#allocation3 + $0x278] sm:$0xff]  ;;  %v2542_v39 = vpack.c.bf16 %v117_v33, %v115_v32  ;;  %v2480_v40 = vpack.c.bf16 %v58_v35, %v56_v34  ;;  %v55_v42 = vld [vmem:[#allocation3 + $0x60] sm:$0xff] }
  0x30   :  { %v2544_v41 = vpack.c.bf16 %v122_v37, %v120_v36  ;;  %v57_v43 = vld [vmem:[#allocation3 + $0x70] sm:$0xff]  ;;  %v119_v44 = vld [vmem:[#allocation3 + $0x260] sm:$0xff]  ;;  %v60_v46 = vld [vmem:[#allocation3 + $0x88] sm:$0xff] }
  0x31   :  { %v121_v45 = vld [vmem:[#allocation3 + $0x270] sm:$0xff]  ;;  %v62_v47 = vld [vmem:[#allocation3 + $0x98] sm:$0xff]  ;;  %v124_v48 = vld [vmem:[#allocation3 + $0x288] sm:$0xff]  ;;  %v2482_v50 = vpack.c.bf16 %v57_v43, %v55_v42 }
  0x32   :  { %v126_v49 = vld [vmem:[#allocation3 + $0x298] sm:$0xff]  ;;  %v2546_v51 = vpack.c.bf16 %v121_v45, %v119_v44  ;;  %v2484_v52 = vpack.c.bf16 %v62_v47, %v60_v46  ;;  %v59_v54 = vld [vmem:[#allocation3 + $0x80] sm:$0xff]  ;;  %v61_v55 = vld [vmem:[#allocation3 + $0x90] sm:$0xff] }
  0x33   :  { %2475 = vmatpush1.bf16.xpose.msra.mxu0 %v2474_v26  ;;  %v2548_v53 = vpack.c.bf16 %v126_v49, %v124_v48  ;;  %v123_v56 = vld [vmem:[#allocation3 + $0x280] sm:$0xff]  ;;  %v125_v57 = vld [vmem:[#allocation3 + $0x290] sm:$0xff]  ;;  %v64_v58 = vld [vmem:[#allocation3 + $0xa8] sm:$0xff]  ;;  %v2486_v63 = vpack.c.bf16 %v61_v55, %v59_v54 }
  0x34   :  { %2539 = vmatpush1.bf16.xpose.msra.mxu1 %v2538_v27  ;;  %2477 = vmatprep.subr.bf16.mxu0 %v2476_v28  ;;  %v66_v59 = vld [vmem:[#allocation3 + $0xb8] sm:$0xff]  ;;  %v128_v60 = vld [vmem:[#allocation3 + $0x2a8] sm:$0xff]  ;;  %v2550_v0 = vpack.c.bf16 %v125_v57, %v123_v56  ;;  %v63_v4 = vld [vmem:[#allocation3 + $0xa0] sm:$0xff] }
  0x35   :  { %2541 = vmatprep.subr.bf16.mxu1 %v2540_v29  ;;  %v130_v61 = vld [vmem:[#allocation3 + $0x2b8] sm:$0xff]  ;;  %v2488_v1 = vpack.c.bf16 %v66_v59, %v64_v58  ;;  %v65_v5 = vld [vmem:[#allocation3 + $0xb0] sm:$0xff]  ;;  %v127_v6 = vld [vmem:[#allocation3 + $0x2a0] sm:$0xff] }
  0x36   :  { %v2552_v2 = vpack.c.bf16 %v130_v61, %v128_v60  ;;  %v129_v7 = vld [vmem:[#allocation3 + $0x2b0] sm:$0xff]  ;;  %v68_v8 = vld [vmem:[#allocation3 + $0xc8] sm:$0xff]  ;;  %v70_v9 = vld [vmem:[#allocation3 + $0xd8] sm:$0xff]  ;;  %v2490_v14 = vpack.c.bf16 %v65_v5, %v63_v4 }
  0x37   :  { %v132_v10 = vld [vmem:[#allocation3 + $0x2c8] sm:$0xff]  ;;  %v134_v11 = vld [vmem:[#allocation3 + $0x2d8] sm:$0xff]  ;;  %v2554_v15 = vpack.c.bf16 %v129_v7, %v127_v6  ;;  %v2492_v16 = vpack.c.bf16 %v70_v9, %v68_v8  ;;  %v42_v18 = vld [vmem:[#allocation6] sm:$0x3] }
  0x38   :  { %v2556_v17 = vpack.c.bf16 %v134_v11, %v132_v10  ;;  %v3624_v19 = vrot.slane %v42_v18, %v1076_v12  ;;  %v3626_v20 = vrot.slane %v42_v18, %v1072_v13  ;;  %v67_v21 = vld [vmem:[#allocation3 + $0xc0] sm:$0xff]  ;;  %v69_v22 = vld [vmem:[#allocation3 + $0xd0] sm:$0xff]  ;;  %v72_v25 = vld [vmem:[#allocation3 + $0xe8] sm:$0xff] }
  0x39   :  { %v131_v23 = vld [vmem:[#allocation3 + $0x2c0] sm:$0xff]  ;;  %v133_v24 = vld [vmem:[#allocation3 + $0x2d0] sm:$0xff]  ;;  %v74_v26 = vld [vmem:[#allocation3 + $0xf8] sm:$0xff]  ;;  %v2494_v29 = vpack.c.bf16 %v69_v22, %v67_v21 }
  0x3a   :  { %1144 = vmatprep.mubr.f32.mxu0 %v3624_v19  ;;  %v136_v27 = vld [vmem:[#allocation3 + $0x2e8] sm:$0xff]  ;;  %v138_v28 = vld [vmem:[#allocation3 + $0x2f8] sm:$0xff]  ;;  %1215 = vmatprep.mubr.f32.mxu1 %v3624_v19  ;;  %v2558_v30 = vpack.c.bf16 %v133_v24, %v131_v23  ;;  %v2496_v31 = vpack.c.bf16 %v74_v26, %v72_v25  ;;  %v71_v33 = vld [vmem:[#allocation3 + $0xe0] sm:$0xff] }
  0x3b   :  { %2479 = vmatpush1.bf16.xpose.msra.mxu0 %v2478_v38  ;;  %v2560_v32 = vpack.c.bf16 %v138_v28, %v136_v27  ;;  %v73_v34 = vld [vmem:[#allocation3 + $0xf0] sm:$0xff]  ;;  %v135_v35 = vld [vmem:[#allocation3 + $0x2e0] sm:$0xff]  ;;  %v76_v37 = vld [vmem:[#allocation3 + $0x108] sm:$0xff] }
  0x3c   :  { %2543 = vmatpush1.bf16.xpose.msra.mxu1 %v2542_v39  ;;  %2481 = vmatprep.subr.bf16.mxu0 %v2480_v40  ;;  %v137_v36 = vld [vmem:[#allocation3 + $0x2f0] sm:$0xff]  ;;  %v78_v38 = vld [vmem:[#allocation3 + $0x118] sm:$0xff]  ;;  %v140_v39 = vld [vmem:[#allocation3 + $0x308] sm:$0xff] }
  0x3d   :  { %2545 = vmatprep.subr.bf16.mxu1 %v2544_v41  ;;  %v142_v40 = vld [vmem:[#allocation3 + $0x318] sm:$0xff]  ;;  %v2498_v41 = vpack.c.bf16 %v73_v34, %v71_v33  ;;  %v2562_v42 = vpack.c.bf16 %v137_v36, %v135_v35  ;;  %v2500_v43 = vpack.c.bf16 %v78_v38, %v76_v37  ;;  %v75_v45 = vld [vmem:[#allocation3 + $0x100] sm:$0xff]  ;;  %v77_v46 = vld [vmem:[#allocation3 + $0x110] sm:$0xff] }
  0x3e   :  { %v2564_v44 = vpack.c.bf16 %v142_v40, %v140_v39  ;;  %v139_v47 = vld [vmem:[#allocation3 + $0x300] sm:$0xff]  ;;  %v141_v48 = vld [vmem:[#allocation3 + $0x310] sm:$0xff]  ;;  %v80_v49 = vld [vmem:[#allocation3 + $0x128] sm:$0xff] }
  0x3f   :  { %v2566_v54 = vpack.c.bf16 %v141_v48, %v139_v47  ;;  %v79_v57 = vld [vmem:[#allocation3 + $0x120] sm:$0xff]  ;;  %v81_v58 = vld [vmem:[#allocation3 + $0x130] sm:$0xff]  ;;  %v84_v61 = vld [vmem:[#allocation3 + $0x148] sm:$0xff] }
  0x40   :  { %v143_v59 = vld [vmem:[#allocation3 + $0x320] sm:$0xff]  ;;  %v145_v60 = vld [vmem:[#allocation3 + $0x330] sm:$0xff]  ;;  %v86_v62 = vld [vmem:[#allocation3 + $0x158] sm:$0xff] }
  0x41   :  { %v2508_v4 = vpack.c.bf16 %v86_v62, %v84_v61  ;;  %v83_v6 = vld [vmem:[#allocation3 + $0x140] sm:$0xff]  ;;  %v85_v7 = vld [vmem:[#allocation3 + $0x150] sm:$0xff]  ;;  %v88_v10 = vld [vmem:[#allocation3 + $0x168] sm:$0xff] }
  0x42   :  { %v147_v8 = vld [vmem:[#allocation3 + $0x340] sm:$0xff]  ;;  %v149_v9 = vld [vmem:[#allocation3 + $0x350] sm:$0xff]  ;;  %v90_v11 = vld [vmem:[#allocation3 + $0x178] sm:$0xff] }
  0x43   :  { %2483 = vmatpush1.bf16.xpose.msra.mxu0 %v2482_v50  ;;  %v82_v50 = vld [vmem:[#allocation3 + $0x138] sm:$0xff]  ;;  %v152_v12 = vld [vmem:[#allocation3 + $0x368] sm:$0xff]  ;;  %v87_v18 = vld [vmem:[#allocation3 + $0x160] sm:$0xff] }
  0x44   :  { %2547 = vmatpush1.bf16.xpose.msra.mxu1 %v2546_v51  ;;  %2485 = vmatprep.subr.bf16.mxu0 %v2484_v52  ;;  %v144_v51 = vld [vmem:[#allocation3 + $0x328] sm:$0xff]  ;;  %v146_v52 = vld [vmem:[#allocation3 + $0x338] sm:$0xff]  ;;  %v2504_v55 = vpack.c.bf16 %v82_v50, %v80_v49  ;;  %v89_v21 = vld [vmem:[#allocation3 + $0x170] sm:$0xff] }
  0x45   :  { %2549 = vmatprep.subr.bf16.mxu1 %v2548_v53  ;;  %v2502_v53 = vpack.c.bf16 %v77_v46, %v75_v45  ;;  %v2568_v56 = vpack.c.bf16 %v146_v52, %v144_v51  ;;  %v154_v13 = vld [vmem:[#allocation3 + $0x378] sm:$0xff]  ;;  %v151_v22 = vld [vmem:[#allocation3 + $0x360] sm:$0xff]  ;;  %v153_v23 = vld [vmem:[#allocation3 + $0x370] sm:$0xff]  ;;  %v2514_v28 = vpack.c.bf16 %v89_v21, %v87_v18 }
  0x46   :  { %v92_v24 = vld [vmem:[#allocation3 + $0x188] sm:$0xff]  ;;  %v94_v25 = vld [vmem:[#allocation3 + $0x198] sm:$0xff]  ;;  %v93_v33 = vld [vmem:[#allocation3 + $0x190] sm:$0xff] }
  0x47   :  { %v156_v26 = vld [vmem:[#allocation3 + $0x388] sm:$0xff]  ;;  %v158_v27 = vld [vmem:[#allocation3 + $0x398] sm:$0xff]  ;;  %v155_v34 = vld [vmem:[#allocation3 + $0x380] sm:$0xff] }
  0x48   :  { %v157_v35 = vld [vmem:[#allocation3 + $0x390] sm:$0xff]  ;;  %v96_v36 = vld [vmem:[#allocation3 + $0x1a8] sm:$0xff]  ;;  %v98_v37 = vld [vmem:[#allocation3 + $0x1b8] sm:$0xff] }
  0x49   :  { %v160_v38 = vld [vmem:[#allocation3 + $0x3a8] sm:$0xff]  ;;  %v162_v39 = vld [vmem:[#allocation3 + $0x3b8] sm:$0xff]  ;;  %v97_v45 = vld [vmem:[#allocation3 + $0x1b0] sm:$0xff] }
  0x4a   :  { %v159_v46 = vld [vmem:[#allocation3 + $0x3a0] sm:$0xff]  ;;  %v161_v47 = vld [vmem:[#allocation3 + $0x3b0] sm:$0xff]  ;;  %v100_v48 = vld [vmem:[#allocation3 + $0x1c8] sm:$0xff] }
  0x4b   :  { %2487 = vmatpush1.bf16.xpose.msra.mxu0 %v2486_v63  ;;  %v148_v63 = vld [vmem:[#allocation3 + $0x348] sm:$0xff]  ;;  %v102_v49 = vld [vmem:[#allocation3 + $0x1d8] sm:$0xff]  ;;  %v173_v18 = vld [vmem:[#allocation3 + $0x410] sm:$0xff] }
  0x4c   :  { %2551 = vmatpush1.bf16.xpose.msra.mxu1 %v2550_v0  ;;  %2489 = vmatprep.subr.bf16.mxu0 %v2488_v1  ;;  %v150_v0 = vld [vmem:[#allocation3 + $0x358] sm:$0xff]  ;;  %v2506_v1 = vpack.c.bf16 %v81_v58, %v79_v57  ;;  %v164_v50 = vld [vmem:[#allocation3 + $0x3c8] sm:$0xff]  ;;  %v101_v57 = vld [vmem:[#allocation3 + $0x1d0] sm:$0xff] }
  0x4d   :  { %2553 = vmatprep.subr.bf16.mxu1 %v2552_v2  ;;  %v2570_v2 = vpack.c.bf16 %v145_v60, %v143_v59  ;;  %v2572_v5 = vpack.c.bf16 %v150_v0, %v148_v63  ;;  %v166_v51 = vld [vmem:[#allocation3 + $0x3d8] sm:$0xff]  ;;  %v163_v58 = vld [vmem:[#allocation3 + $0x3c0] sm:$0xff]  ;;  %v165_v59 = vld [vmem:[#allocation3 + $0x3d0] sm:$0xff] }
  0x4e   :  { %v104_v60 = vld [vmem:[#allocation3 + $0x1e8] sm:$0xff]  ;;  %v106_v61 = vld [vmem:[#allocation3 + $0x1f8] sm:$0xff]  ;;  %v235_v21 = vld [vmem:[#allocation3 + $0x600] sm:$0xff] }
  0x4f   :  { %v168_v62 = vld [vmem:[#allocation3 + $0x3e8] sm:$0xff]  ;;  %v170_v63 = vld [vmem:[#allocation3 + $0x3f8] sm:$0xff] }
  0x53   :  { %2491 = vmatpush1.bf16.xpose.msra.mxu0 %v2490_v14  ;;  %v2510_v14 = vpack.c.bf16 %v85_v7, %v83_v6  ;;  %v105_v6 = vld [vmem:[#allocation3 + $0x1f0] sm:$0xff]  ;;  %v167_v7 = vld [vmem:[#allocation3 + $0x3e0] sm:$0xff] }
  0x54   :  { %2555 = vmatpush1.bf16.xpose.msra.mxu1 %v2554_v15  ;;  %2493 = vmatprep.subr.bf16.mxu0 %v2492_v16  ;;  %v2574_v15 = vpack.c.bf16 %v149_v9, %v147_v8  ;;  %v2512_v16 = vpack.c.bf16 %v90_v11, %v88_v10  ;;  %v169_v8 = vld [vmem:[#allocation3 + $0x3f0] sm:$0xff]  ;;  %v172_v9 = vld [vmem:[#allocation3 + $0x408] sm:$0xff]  ;;  %v174_v10 = vld [vmem:[#allocation3 + $0x418] sm:$0xff] }
  0x55   :  { %2557 = vmatprep.subr.bf16.mxu1 %v2556_v17  ;;  %v2576_v17 = vpack.c.bf16 %v154_v13, %v152_v12  ;;  %v236_v11 = vld [vmem:[#allocation3 + $0x608] sm:$0xff]  ;;  %v238_v12 = vld [vmem:[#allocation3 + $0x618] sm:$0xff] }
  0x5b   :  { %2495 = vmatpush1.bf16.xpose.msra.mxu0 %v2494_v29  ;;  %v2578_v29 = vpack.c.bf16 %v153_v23, %v151_v22  ;;  %v237_v22 = vld [vmem:[#allocation3 + $0x610] sm:$0xff]  ;;  %v176_v23 = vld [vmem:[#allocation3 + $0x428] sm:$0xff] }
  0x5c   :  { %2559 = vmatpush1.bf16.xpose.msra.mxu1 %v2558_v30  ;;  %2497 = vmatprep.subr.bf16.mxu0 %v2496_v31  ;;  %v2516_v30 = vpack.c.bf16 %v94_v25, %v92_v24  ;;  %v2580_v31 = vpack.c.bf16 %v158_v27, %v156_v26  ;;  %v178_v24 = vld [vmem:[#allocation3 + $0x438] sm:$0xff]  ;;  %v240_v25 = vld [vmem:[#allocation3 + $0x628] sm:$0xff] }
  0x5d   :  { %2561 = vmatprep.subr.bf16.mxu1 %v2560_v32  ;;  %v91_v32 = vld [vmem:[#allocation3 + $0x180] sm:$0xff]  ;;  %v242_v26 = vld [vmem:[#allocation3 + $0x638] sm:$0xff] }
  0x5e   :  { %v2518_v40 = vpack.c.bf16 %v93_v33, %v91_v32  ;;  %v177_v32 = vld [vmem:[#allocation3 + $0x430] sm:$0xff]  ;;  %v239_v33 = vld [vmem:[#allocation3 + $0x620] sm:$0xff] }
  0x63   :  { %2499 = vmatpush1.bf16.xpose.msra.mxu0 %v2498_v41  ;;  %v2582_v41 = vpack.c.bf16 %v157_v35, %v155_v34  ;;  %v241_v34 = vld [vmem:[#allocation3 + $0x630] sm:$0xff]  ;;  %v180_v35 = vld [vmem:[#allocation3 + $0x448] sm:$0xff] }
  0x64   :  { %2563 = vmatpush1.bf16.xpose.msra.mxu1 %v2562_v42  ;;  %2501 = vmatprep.subr.bf16.mxu0 %v2500_v43  ;;  %v2520_v42 = vpack.c.bf16 %v98_v37, %v96_v36  ;;  %v2584_v43 = vpack.c.bf16 %v162_v39, %v160_v38  ;;  %v182_v36 = vld [vmem:[#allocation3 + $0x458] sm:$0xff]  ;;  %v244_v37 = vld [vmem:[#allocation3 + $0x648] sm:$0xff] }
  0x65   :  { %2565 = vmatprep.subr.bf16.mxu1 %v2564_v44  ;;  %v95_v44 = vld [vmem:[#allocation3 + $0x1a0] sm:$0xff]  ;;  %v246_v38 = vld [vmem:[#allocation3 + $0x658] sm:$0xff] }
  0x66   :  { %v2522_v52 = vpack.c.bf16 %v97_v45, %v95_v44  ;;  %v181_v44 = vld [vmem:[#allocation3 + $0x450] sm:$0xff]  ;;  %v243_v45 = vld [vmem:[#allocation3 + $0x640] sm:$0xff] }
  0x6b   :  { %2503 = vmatpush1.bf16.xpose.msra.mxu0 %v2502_v53  ;;  %v2586_v53 = vpack.c.bf16 %v161_v47, %v159_v46  ;;  %v245_v46 = vld [vmem:[#allocation3 + $0x650] sm:$0xff]  ;;  %v184_v47 = vld [vmem:[#allocation3 + $0x468] sm:$0xff] }
  0x6c   :  { %2567 = vmatpush1.bf16.xpose.msra.mxu1 %v2566_v54  ;;  %2505 = vmatprep.subr.bf16.mxu0 %v2504_v55  ;;  %v2524_v54 = vpack.c.bf16 %v102_v49, %v100_v48  ;;  %v2588_v55 = vpack.c.bf16 %v166_v51, %v164_v50  ;;  %v186_v48 = vld [vmem:[#allocation3 + $0x478] sm:$0xff]  ;;  %v248_v49 = vld [vmem:[#allocation3 + $0x668] sm:$0xff] }
  0x6d   :  { %2569 = vmatprep.subr.bf16.mxu1 %v2568_v56  ;;  %v99_v56 = vld [vmem:[#allocation3 + $0x1c0] sm:$0xff]  ;;  %v250_v50 = vld [vmem:[#allocation3 + $0x678] sm:$0xff] }
  0x6e   :  { %v2526_v0 = vpack.c.bf16 %v101_v57, %v99_v56  ;;  %v185_v56 = vld [vmem:[#allocation3 + $0x470] sm:$0xff]  ;;  %v247_v57 = vld [vmem:[#allocation3 + $0x660] sm:$0xff] }
  0x73   :  { %2507 = vmatpush1.bf16.xpose.msra.mxu0 %v2506_v1  ;;  %v2590_v1 = vpack.c.bf16 %v165_v59, %v163_v58  ;;  %v249_v58 = vld [vmem:[#allocation3 + $0x670] sm:$0xff]  ;;  %v188_v59 = vld [vmem:[#allocation3 + $0x488] sm:$0xff] }
  0x74   :  { %2571 = vmatpush1.bf16.xpose.msra.mxu1 %v2570_v2  ;;  %2509 = vmatprep.subr.bf16.mxu0 %v2508_v4  ;;  %v2528_v2 = vpack.c.bf16 %v106_v61, %v104_v60  ;;  %v2592_v4 = vpack.c.bf16 %v170_v63, %v168_v62  ;;  %v190_v60 = vld [vmem:[#allocation3 + $0x498] sm:$0xff]  ;;  %v252_v61 = vld [vmem:[#allocation3 + $0x688] sm:$0xff] }
  0x75   :  { %2573 = vmatprep.subr.bf16.mxu1 %v2572_v5  ;;  %v103_v5 = vld [vmem:[#allocation3 + $0x1e0] sm:$0xff]  ;;  %v254_v62 = vld [vmem:[#allocation3 + $0x698] sm:$0xff] }
  0x76   :  { %v2530_v13 = vpack.c.bf16 %v105_v6, %v103_v5  ;;  %v189_v5 = vld [vmem:[#allocation3 + $0x490] sm:$0xff]  ;;  %v251_v6 = vld [vmem:[#allocation3 + $0x680] sm:$0xff] }
  0x7b   :  { %2511 = vmatpush1.bf16.xpose.msra.mxu0 %v2510_v14  ;;  %v2594_v14 = vpack.c.bf16 %v169_v8, %v167_v7  ;;  %v253_v7 = vld [vmem:[#allocation3 + $0x690] sm:$0xff]  ;;  %v192_v8 = vld [vmem:[#allocation3 + $0x4a8] sm:$0xff] }
  0x7c   :  { %2575 = vmatpush1.bf16.xpose.msra.mxu1 %v2574_v15  ;;  %2513 = vmatprep.subr.bf16.mxu0 %v2512_v16  ;;  %v2596_v15 = vpack.c.bf16 %v174_v10, %v172_v9  ;;  %v2660_v16 = vpack.c.bf16 %v238_v12, %v236_v11  ;;  %v194_v9 = vld [vmem:[#allocation3 + $0x4b8] sm:$0xff]  ;;  %v256_v10 = vld [vmem:[#allocation3 + $0x6a8] sm:$0xff] }
  0x7d   :  { %2577 = vmatprep.subr.bf16.mxu1 %v2576_v17  ;;  %v171_v17 = vld [vmem:[#allocation3 + $0x400] sm:$0xff]  ;;  %v258_v11 = vld [vmem:[#allocation3 + $0x6b8] sm:$0xff] }
  0x7e   :  { %v2598_v27 = vpack.c.bf16 %v173_v18, %v171_v17  ;;  %v193_v17 = vld [vmem:[#allocation3 + $0x4b0] sm:$0xff]  ;;  %v255_v18 = vld [vmem:[#allocation3 + $0x6a0] sm:$0xff] }
  0x83   :  { %2515 = vmatpush1.bf16.xpose.msra.mxu0 %v2514_v28  ;;  %v2662_v28 = vpack.c.bf16 %v237_v22, %v235_v21  ;;  %v257_v21 = vld [vmem:[#allocation3 + $0x6b0] sm:$0xff]  ;;  %v196_v22 = vld [vmem:[#allocation3 + $0x4c8] sm:$0xff] }
  0x84   :  { %2579 = vmatpush1.bf16.xpose.msra.mxu1 %v2578_v29  ;;  %2517 = vmatprep.subr.bf16.mxu0 %v2516_v30  ;;  %v2600_v29 = vpack.c.bf16 %v178_v24, %v176_v23  ;;  %v2664_v30 = vpack.c.bf16 %v242_v26, %v240_v25  ;;  %v198_v23 = vld [vmem:[#allocation3 + $0x4d8] sm:$0xff]  ;;  %v260_v24 = vld [vmem:[#allocation3 + $0x6c8] sm:$0xff] }
  0x85   :  { %2581 = vmatprep.subr.bf16.mxu1 %v2580_v31  ;;  %v175_v31 = vld [vmem:[#allocation3 + $0x420] sm:$0xff]  ;;  %v262_v25 = vld [vmem:[#allocation3 + $0x6d8] sm:$0xff] }
  0x86   :  { %v2602_v39 = vpack.c.bf16 %v177_v32, %v175_v31  ;;  %v197_v31 = vld [vmem:[#allocation3 + $0x4d0] sm:$0xff]  ;;  %v259_v32 = vld [vmem:[#allocation3 + $0x6c0] sm:$0xff] }
  0x8b   :  { %2519 = vmatpush1.bf16.xpose.msra.mxu0 %v2518_v40  ;;  %v2666_v40 = vpack.c.bf16 %v241_v34, %v239_v33  ;;  %v261_v33 = vld [vmem:[#allocation3 + $0x6d0] sm:$0xff]  ;;  %v200_v34 = vld [vmem:[#allocation3 + $0x4e8] sm:$0xff] }
  0x8c   :  { %2583 = vmatpush1.bf16.xpose.msra.mxu1 %v2582_v41  ;;  %2521 = vmatprep.subr.bf16.mxu0 %v2520_v42  ;;  %v2604_v41 = vpack.c.bf16 %v182_v36, %v180_v35  ;;  %v2668_v42 = vpack.c.bf16 %v246_v38, %v244_v37  ;;  %v202_v35 = vld [vmem:[#allocation3 + $0x4f8] sm:$0xff]  ;;  %v264_v36 = vld [vmem:[#allocation3 + $0x6e8] sm:$0xff] }
  0x8d   :  { %2585 = vmatprep.subr.bf16.mxu1 %v2584_v43  ;;  %v179_v43 = vld [vmem:[#allocation3 + $0x440] sm:$0xff]  ;;  %v266_v37 = vld [vmem:[#allocation3 + $0x6f8] sm:$0xff] }
  0x8e   :  { %v2606_v51 = vpack.c.bf16 %v181_v44, %v179_v43  ;;  %v201_v43 = vld [vmem:[#allocation3 + $0x4f0] sm:$0xff]  ;;  %v263_v44 = vld [vmem:[#allocation3 + $0x6e0] sm:$0xff] }
  0x93   :  { %2523 = vmatpush1.bf16.xpose.msra.mxu0 %v2522_v52  ;;  %v2670_v52 = vpack.c.bf16 %v245_v46, %v243_v45  ;;  %v265_v45 = vld [vmem:[#allocation3 + $0x6f0] sm:$0xff]  ;;  %v204_v46 = vld [vmem:[#allocation3 + $0x508] sm:$0xff] }
  0x94   :  { %2587 = vmatpush1.bf16.xpose.msra.mxu1 %v2586_v53  ;;  %2525 = vmatprep.subr.bf16.mxu0 %v2524_v54  ;;  %v2608_v53 = vpack.c.bf16 %v186_v48, %v184_v47  ;;  %v2672_v54 = vpack.c.bf16 %v250_v50, %v248_v49  ;;  %v206_v47 = vld [vmem:[#allocation3 + $0x518] sm:$0xff]  ;;  %v268_v48 = vld [vmem:[#allocation3 + $0x708] sm:$0xff] }
  0x95   :  { %2589 = vmatprep.subr.bf16.mxu1 %v2588_v55  ;;  %v183_v55 = vld [vmem:[#allocation3 + $0x460] sm:$0xff]  ;;  %v270_v49 = vld [vmem:[#allocation3 + $0x718] sm:$0xff] }
  0x96   :  { %v2610_v63 = vpack.c.bf16 %v185_v56, %v183_v55  ;;  %v205_v55 = vld [vmem:[#allocation3 + $0x510] sm:$0xff]  ;;  %v267_v56 = vld [vmem:[#allocation3 + $0x700] sm:$0xff] }
  0x9b   :  { %2527 = vmatpush1.bf16.xpose.msra.mxu0 %v2526_v0  ;;  %v2674_v0 = vpack.c.bf16 %v249_v58, %v247_v57  ;;  %v269_v57 = vld [vmem:[#allocation3 + $0x710] sm:$0xff]  ;;  %v208_v58 = vld [vmem:[#allocation3 + $0x528] sm:$0xff] }
  0x9c   :  { %2591 = vmatpush1.bf16.xpose.msra.mxu1 %v2590_v1  ;;  %2529 = vmatprep.subr.bf16.mxu0 %v2528_v2  ;;  %v2612_v1 = vpack.c.bf16 %v190_v60, %v188_v59  ;;  %v2676_v2 = vpack.c.bf16 %v254_v62, %v252_v61  ;;  %v210_v59 = vld [vmem:[#allocation3 + $0x538] sm:$0xff]  ;;  %v272_v60 = vld [vmem:[#allocation3 + $0x728] sm:$0xff] }
  0x9d   :  { %2593 = vmatprep.subr.bf16.mxu1 %v2592_v4  ;;  %v187_v4 = vld [vmem:[#allocation3 + $0x480] sm:$0xff]  ;;  %v274_v61 = vld [vmem:[#allocation3 + $0x738] sm:$0xff] }
  0x9e   :  { %v2614_v12 = vpack.c.bf16 %v189_v5, %v187_v4  ;;  %v209_v4 = vld [vmem:[#allocation3 + $0x530] sm:$0xff]  ;;  %v271_v5 = vld [vmem:[#allocation3 + $0x720] sm:$0xff] }
  0xa3   :  { %2531 = vmatpush1.bf16.xpose.msra.mxu0 %v2530_v13  ;;  %v2678_v13 = vpack.c.bf16 %v253_v7, %v251_v6  ;;  %v273_v6 = vld [vmem:[#allocation3 + $0x730] sm:$0xff]  ;;  %v212_v7 = vld [vmem:[#allocation3 + $0x548] sm:$0xff] }
  0xa4   :  { %2595 = vmatpush1.bf16.xpose.msra.mxu1 %v2594_v14  ;;  %2597 = vmatprep.subr.bf16.mxu0 %v2596_v15  ;;  %v2616_v14 = vpack.c.bf16 %v194_v9, %v192_v8  ;;  %v2680_v15 = vpack.c.bf16 %v258_v11, %v256_v10  ;;  %v214_v8 = vld [vmem:[#allocation3 + $0x558] sm:$0xff]  ;;  %v276_v9 = vld [vmem:[#allocation3 + $0x748] sm:$0xff] }
  0xa5   :  { %2661 = vmatprep.subr.bf16.mxu1 %v2660_v16  ;;  %v191_v16 = vld [vmem:[#allocation3 + $0x4a0] sm:$0xff]  ;;  %v278_v10 = vld [vmem:[#allocation3 + $0x758] sm:$0xff] }
  0xa6   :  { %v2618_v26 = vpack.c.bf16 %v193_v17, %v191_v16  ;;  %v213_v16 = vld [vmem:[#allocation3 + $0x550] sm:$0xff]  ;;  %v275_v17 = vld [vmem:[#allocation3 + $0x740] sm:$0xff] }
  0xaa   :  { %1145 = vmatmul.mubr.f32.vlgmr.msra.gmra.mrb[0].mxu0 %v3626_v20 }
  0xab   :  { %1216 = vmatmul.mubr.f32.vlgmr.msra.gmra.mrb[0].mxu1 %v3626_v20  ;;  %2599 = vmatpush1.bf16.xpose.msra.mxu0 %v2598_v27  ;;  %v2682_v27 = vpack.c.bf16 %v257_v21, %v255_v18  ;;  %v277_v18 = vld [vmem:[#allocation3 + $0x750] sm:$0xff]  ;;  %v216_v21 = vld [vmem:[#allocation3 + $0x568] sm:$0xff] }
  0xac   :  { %2663 = vmatpush1.bf16.xpose.msra.mxu1 %v2662_v28  ;;  %2601 = vmatprep.subr.bf16.mxu0 %v2600_v29  ;;  %v2620_v28 = vpack.c.bf16 %v198_v23, %v196_v22  ;;  %v2684_v29 = vpack.c.bf16 %v262_v25, %v260_v24  ;;  %v218_v22 = vld [vmem:[#allocation3 + $0x578] sm:$0xff]  ;;  %v280_v23 = vld [vmem:[#allocation3 + $0x768] sm:$0xff] }
  0xad   :  { %2665 = vmatprep.subr.bf16.mxu1 %v2664_v30  ;;  %1286 = vmatprep.mubr.f32.mxu0 %v3624_v19  ;;  %v195_v30 = vld [vmem:[#allocation3 + $0x4c0] sm:$0xff]  ;;  %v282_v24 = vld [vmem:[#allocation3 + $0x778] sm:$0xff] }
  0xae   :  { %1357 = vmatprep.mubr.f32.mxu1 %v3624_v19  ;;  %v2622_v38 = vpack.c.bf16 %v197_v31, %v195_v30  ;;  %v217_v30 = vld [vmem:[#allocation3 + $0x570] sm:$0xff]  ;;  %v279_v31 = vld [vmem:[#allocation3 + $0x760] sm:$0xff] }
  0xb3   :  { %2603 = vmatpush1.bf16.xpose.msra.mxu0 %v2602_v39  ;;  %v2686_v39 = vpack.c.bf16 %v261_v33, %v259_v32  ;;  %v281_v32 = vld [vmem:[#allocation3 + $0x770] sm:$0xff]  ;;  %v220_v33 = vld [vmem:[#allocation3 + $0x588] sm:$0xff] }
  0xb4   :  { %2667 = vmatpush1.bf16.xpose.msra.mxu1 %v2666_v40  ;;  %2605 = vmatprep.subr.bf16.mxu0 %v2604_v41  ;;  %v2624_v40 = vpack.c.bf16 %v202_v35, %v200_v34  ;;  %v2688_v41 = vpack.c.bf16 %v266_v37, %v264_v36  ;;  %v222_v34 = vld [vmem:[#allocation3 + $0x598] sm:$0xff]  ;;  %v284_v35 = vld [vmem:[#allocation3 + $0x788] sm:$0xff] }
  0xb5   :  { %2669 = vmatprep.subr.bf16.mxu1 %v2668_v42  ;;  %v199_v42 = vld [vmem:[#allocation3 + $0x4e0] sm:$0xff]  ;;  %v286_v36 = vld [vmem:[#allocation3 + $0x798] sm:$0xff] }
  0xb6   :  { %v2626_v50 = vpack.c.bf16 %v201_v43, %v199_v42  ;;  %v221_v42 = vld [vmem:[#allocation3 + $0x590] sm:$0xff]  ;;  %v283_v43 = vld [vmem:[#allocation3 + $0x780] sm:$0xff] }
  0xbb   :  { %2607 = vmatpush1.bf16.xpose.msra.mxu0 %v2606_v51  ;;  %v2690_v51 = vpack.c.bf16 %v265_v45, %v263_v44  ;;  %v285_v44 = vld [vmem:[#allocation3 + $0x790] sm:$0xff]  ;;  %v224_v45 = vld [vmem:[#allocation3 + $0x5a8] sm:$0xff] }
  0xbc   :  { %2671 = vmatpush1.bf16.xpose.msra.mxu1 %v2670_v52  ;;  %2609 = vmatprep.subr.bf16.mxu0 %v2608_v53  ;;  %v2628_v52 = vpack.c.bf16 %v206_v47, %v204_v46  ;;  %v2692_v53 = vpack.c.bf16 %v270_v49, %v268_v48  ;;  %v226_v46 = vld [vmem:[#allocation3 + $0x5b8] sm:$0xff]  ;;  %v288_v47 = vld [vmem:[#allocation3 + $0x7a8] sm:$0xff] }
  0xbd   :  { %2673 = vmatprep.subr.bf16.mxu1 %v2672_v54  ;;  %v203_v54 = vld [vmem:[#allocation3 + $0x500] sm:$0xff]  ;;  %v290_v48 = vld [vmem:[#allocation3 + $0x7b8] sm:$0xff] }
  0xbe   :  { %v2630_v62 = vpack.c.bf16 %v205_v55, %v203_v54  ;;  %v225_v54 = vld [vmem:[#allocation3 + $0x5b0] sm:$0xff]  ;;  %v287_v55 = vld [vmem:[#allocation3 + $0x7a0] sm:$0xff] }
  0xc3   :  { %2611 = vmatpush1.bf16.xpose.msra.mxu0 %v2610_v63  ;;  %v2694_v63 = vpack.c.bf16 %v269_v57, %v267_v56  ;;  %v289_v56 = vld [vmem:[#allocation3 + $0x7b0] sm:$0xff]  ;;  %v228_v57 = vld [vmem:[#allocation3 + $0x5c8] sm:$0xff] }
  0xc4   :  { %2675 = vmatpush1.bf16.xpose.msra.mxu1 %v2674_v0  ;;  %2613 = vmatprep.subr.bf16.mxu0 %v2612_v1  ;;  %v2632_v0 = vpack.c.bf16 %v210_v59, %v208_v58  ;;  %v2696_v1 = vpack.c.bf16 %v274_v61, %v272_v60  ;;  %v230_v58 = vld [vmem:[#allocation3 + $0x5d8] sm:$0xff]  ;;  %v292_v59 = vld [vmem:[#allocation3 + $0x7c8] sm:$0xff] }
  0xc5   :  { %2677 = vmatprep.subr.bf16.mxu1 %v2676_v2  ;;  %v207_v2 = vld [vmem:[#allocation3 + $0x520] sm:$0xff]  ;;  %v294_v60 = vld [vmem:[#allocation3 + $0x7d8] sm:$0xff] }
  0xc6   :  { %v2634_v11 = vpack.c.bf16 %v209_v4, %v207_v2  ;;  %v229_v2 = vld [vmem:[#allocation3 + $0x5d0] sm:$0xff]  ;;  %v291_v4 = vld [vmem:[#allocation3 + $0x7c0] sm:$0xff] }
  0xcb   :  { %2615 = vmatpush1.bf16.xpose.msra.mxu0 %v2614_v12  ;;  %v2698_v12 = vpack.c.bf16 %v273_v6, %v271_v5  ;;  %v293_v5 = vld [vmem:[#allocation3 + $0x7d0] sm:$0xff]  ;;  %v232_v6 = vld [vmem:[#allocation3 + $0x5e8] sm:$0xff] }
  0xcc   :  { %2679 = vmatpush1.bf16.xpose.msra.mxu1 %v2678_v13  ;;  %2617 = vmatprep.subr.bf16.mxu0 %v2616_v14  ;;  %v2636_v13 = vpack.c.bf16 %v214_v8, %v212_v7  ;;  %v2700_v14 = vpack.c.bf16 %v278_v10, %v276_v9  ;;  %v234_v7 = vld [vmem:[#allocation3 + $0x5f8] sm:$0xff]  ;;  %v296_v8 = vld [vmem:[#allocation3 + $0x7e8] sm:$0xff] }
  0xcd   :  { %2681 = vmatprep.subr.bf16.mxu1 %v2680_v15  ;;  %v211_v15 = vld [vmem:[#allocation3 + $0x540] sm:$0xff]  ;;  %v298_v9 = vld [vmem:[#allocation3 + $0x7f8] sm:$0xff] }
  0xce   :  { %v2638_v25 = vpack.c.bf16 %v213_v16, %v211_v15  ;;  %v233_v15 = vld [vmem:[#allocation3 + $0x5f0] sm:$0xff]  ;;  %v295_v16 = vld [vmem:[#allocation3 + $0x7e0] sm:$0xff] }
  0xd3   :  { %2619 = vmatpush1.bf16.xpose.msra.mxu0 %v2618_v26  ;;  %v2702_v26 = vpack.c.bf16 %v277_v18, %v275_v17  ;;  %v297_v17 = vld [vmem:[#allocation3 + $0x7f0] sm:$0xff]  ;;  %v300_v18 = vld [vmem:[#allocation3 + $0x808] sm:$0xff] }
  0xd4   :  { %2683 = vmatpush1.bf16.xpose.msra.mxu1 %v2682_v27  ;;  %2621 = vmatprep.subr.bf16.mxu0 %v2620_v28  ;;  %v2640_v27 = vpack.c.bf16 %v218_v22, %v216_v21  ;;  %v2704_v28 = vpack.c.bf16 %v282_v24, %v280_v23  ;;  %v302_v21 = vld [vmem:[#allocation3 + $0x818] sm:$0xff]  ;;  %v364_v22 = vld [vmem:[#allocation3 + $0xa08] sm:$0xff] }
  0xd5   :  { %2685 = vmatprep.subr.bf16.mxu1 %v2684_v29  ;;  %v215_v29 = vld [vmem:[#allocation3 + $0x560] sm:$0xff]  ;;  %v366_v23 = vld [vmem:[#allocation3 + $0xa18] sm:$0xff] }
  0xd6   :  { %v2642_v37 = vpack.c.bf16 %v217_v30, %v215_v29  ;;  %v301_v29 = vld [vmem:[#allocation3 + $0x810] sm:$0xff]  ;;  %v363_v30 = vld [vmem:[#allocation3 + $0xa00] sm:$0xff] }
  0xdb   :  { %2623 = vmatpush1.bf16.xpose.msra.mxu0 %v2622_v38  ;;  %v2706_v38 = vpack.c.bf16 %v281_v32, %v279_v31  ;;  %v365_v31 = vld [vmem:[#allocation3 + $0xa10] sm:$0xff]  ;;  %v304_v32 = vld [vmem:[#allocation3 + $0x828] sm:$0xff] }
  0xdc   :  { %2687 = vmatpush1.bf16.xpose.msra.mxu1 %v2686_v39  ;;  %2625 = vmatprep.subr.bf16.mxu0 %v2624_v40  ;;  %v2644_v39 = vpack.c.bf16 %v222_v34, %v220_v33  ;;  %v2708_v40 = vpack.c.bf16 %v286_v36, %v284_v35  ;;  %v306_v33 = vld [vmem:[#allocation3 + $0x838] sm:$0xff]  ;;  %v368_v34 = vld [vmem:[#allocation3 + $0xa28] sm:$0xff] }
  0xdd   :  { %2689 = vmatprep.subr.bf16.mxu1 %v2688_v41  ;;  %v219_v41 = vld [vmem:[#allocation3 + $0x580] sm:$0xff]  ;;  %v370_v35 = vld [vmem:[#allocation3 + $0xa38] sm:$0xff] }
  0xde   :  { %v2646_v49 = vpack.c.bf16 %v221_v42, %v219_v41  ;;  %v305_v41 = vld [vmem:[#allocation3 + $0x830] sm:$0xff]  ;;  %v367_v42 = vld [vmem:[#allocation3 + $0xa20] sm:$0xff] }
  0xe3   :  { %2627 = vmatpush1.bf16.xpose.msra.mxu0 %v2626_v50  ;;  %v2710_v50 = vpack.c.bf16 %v285_v44, %v283_v43  ;;  %v369_v43 = vld [vmem:[#allocation3 + $0xa30] sm:$0xff]  ;;  %v308_v44 = vld [vmem:[#allocation3 + $0x848] sm:$0xff] }
  0xe4   :  { %2691 = vmatpush1.bf16.xpose.msra.mxu1 %v2690_v51  ;;  %2629 = vmatprep.subr.bf16.mxu0 %v2628_v52  ;;  %v2648_v51 = vpack.c.bf16 %v226_v46, %v224_v45  ;;  %v2712_v52 = vpack.c.bf16 %v290_v48, %v288_v47  ;;  %v310_v45 = vld [vmem:[#allocation3 + $0x858] sm:$0xff]  ;;  %v372_v46 = vld [vmem:[#allocation3 + $0xa48] sm:$0xff] }
  0xe5   :  { %2693 = vmatprep.subr.bf16.mxu1 %v2692_v53  ;;  %v223_v53 = vld [vmem:[#allocation3 + $0x5a0] sm:$0xff]  ;;  %v374_v47 = vld [vmem:[#allocation3 + $0xa58] sm:$0xff] }
  0xe6   :  { %v2650_v61 = vpack.c.bf16 %v225_v54, %v223_v53  ;;  %v309_v53 = vld [vmem:[#allocation3 + $0x850] sm:$0xff]  ;;  %v371_v54 = vld [vmem:[#allocation3 + $0xa40] sm:$0xff] }
  0xeb   :  { %2631 = vmatpush1.bf16.xpose.msra.mxu0 %v2630_v62  ;;  %v2714_v62 = vpack.c.bf16 %v289_v56, %v287_v55  ;;  %v373_v55 = vld [vmem:[#allocation3 + $0xa50] sm:$0xff]  ;;  %v312_v56 = vld [vmem:[#allocation3 + $0x868] sm:$0xff] }
  0xec   :  { %2695 = vmatpush1.bf16.xpose.msra.mxu1 %v2694_v63  ;;  %2633 = vmatprep.subr.bf16.mxu0 %v2632_v0  ;;  %v2652_v63 = vpack.c.bf16 %v230_v58, %v228_v57  ;;  %v2716_v0 = vpack.c.bf16 %v294_v60, %v292_v59  ;;  %v314_v57 = vld [vmem:[#allocation3 + $0x878] sm:$0xff]  ;;  %v376_v58 = vld [vmem:[#allocation3 + $0xa68] sm:$0xff] }
  0xed   :  { %2697 = vmatprep.subr.bf16.mxu1 %v2696_v1  ;;  %v227_v1 = vld [vmem:[#allocation3 + $0x5c0] sm:$0xff]  ;;  %v378_v59 = vld [vmem:[#allocation3 + $0xa78] sm:$0xff] }
  0xee   :  { %v2654_v10 = vpack.c.bf16 %v229_v2, %v227_v1  ;;  %v313_v1 = vld [vmem:[#allocation3 + $0x870] sm:$0xff]  ;;  %v375_v2 = vld [vmem:[#allocation3 + $0xa60] sm:$0xff] }
  0xf3   :  { %2635 = vmatpush1.bf16.xpose.msra.mxu0 %v2634_v11  ;;  %v2718_v11 = vpack.c.bf16 %v293_v5, %v291_v4  ;;  %v377_v4 = vld [vmem:[#allocation3 + $0xa70] sm:$0xff]  ;;  %v316_v5 = vld [vmem:[#allocation3 + $0x888] sm:$0xff] }
  0xf4   :  { %2699 = vmatpush1.bf16.xpose.msra.mxu1 %v2698_v12  ;;  %2637 = vmatprep.subr.bf16.mxu0 %v2636_v13  ;;  %v2656_v12 = vpack.c.bf16 %v234_v7, %v232_v6  ;;  %v2720_v13 = vpack.c.bf16 %v298_v9, %v296_v8  ;;  %v318_v6 = vld [vmem:[#allocation3 + $0x898] sm:$0xff]  ;;  %v380_v7 = vld [vmem:[#allocation3 + $0xa88] sm:$0xff] }
  0xf5   :  { %2701 = vmatprep.subr.bf16.mxu1 %v2700_v14  ;;  %v231_v14 = vld [vmem:[#allocation3 + $0x5e0] sm:$0xff]  ;;  %v382_v8 = vld [vmem:[#allocation3 + $0xa98] sm:$0xff] }
  0xf6   :  { %v2658_v24 = vpack.c.bf16 %v233_v15, %v231_v14  ;;  %v317_v14 = vld [vmem:[#allocation3 + $0x890] sm:$0xff]  ;;  %v379_v15 = vld [vmem:[#allocation3 + $0xa80] sm:$0xff] }
  0xfb   :  { %2639 = vmatpush1.bf16.xpose.msra.mxu0 %v2638_v25  ;;  %v2722_v25 = vpack.c.bf16 %v297_v17, %v295_v16  ;;  %v381_v16 = vld [vmem:[#allocation3 + $0xa90] sm:$0xff]  ;;  %v320_v17 = vld [vmem:[#allocation3 + $0x8a8] sm:$0xff] }
  0xfc   :  { %2703 = vmatpush1.bf16.xpose.msra.mxu1 %v2702_v26  ;;  %2641 = vmatprep.subr.bf16.mxu0 %v2640_v27  ;;  %v2724_v26 = vpack.c.bf16 %v302_v21, %v300_v18  ;;  %v2788_v27 = vpack.c.bf16 %v366_v23, %v364_v22  ;;  %v322_v18 = vld [vmem:[#allocation3 + $0x8b8] sm:$0xff]  ;;  %v384_v21 = vld [vmem:[#allocation3 + $0xaa8] sm:$0xff] }
  0xfd   :  { %2705 = vmatprep.subr.bf16.mxu1 %v2704_v28  ;;  %v299_v28 = vld [vmem:[#allocation3 + $0x800] sm:$0xff]  ;;  %v386_v22 = vld [vmem:[#allocation3 + $0xab8] sm:$0xff] }
  0xfe   :  { %v2726_v36 = vpack.c.bf16 %v301_v29, %v299_v28  ;;  %v321_v28 = vld [vmem:[#allocation3 + $0x8b0] sm:$0xff]  ;;  %v383_v29 = vld [vmem:[#allocation3 + $0xaa0] sm:$0xff] }
 0x103   :  { %2643 = vmatpush1.bf16.xpose.msra.mxu0 %v2642_v37  ;;  %v2790_v37 = vpack.c.bf16 %v365_v31, %v363_v30  ;;  %v385_v30 = vld [vmem:[#allocation3 + $0xab0] sm:$0xff]  ;;  %v324_v31 = vld [vmem:[#allocation3 + $0x8c8] sm:$0xff] }
 0x104   :  { %2707 = vmatpush1.bf16.xpose.msra.mxu1 %v2706_v38  ;;  %2645 = vmatprep.subr.bf16.mxu0 %v2644_v39  ;;  %v2728_v38 = vpack.c.bf16 %v306_v33, %v304_v32  ;;  %v2792_v39 = vpack.c.bf16 %v370_v35, %v368_v34  ;;  %v326_v32 = vld [vmem:[#allocation3 + $0x8d8] sm:$0xff]  ;;  %v388_v33 = vld [vmem:[#allocation3 + $0xac8] sm:$0xff] }
 0x105   :  { %2709 = vmatprep.subr.bf16.mxu1 %v2708_v40  ;;  %v303_v40 = vld [vmem:[#allocation3 + $0x820] sm:$0xff]  ;;  %v390_v34 = vld [vmem:[#allocation3 + $0xad8] sm:$0xff] }
 0x106   :  { %v2730_v48 = vpack.c.bf16 %v305_v41, %v303_v40  ;;  %v325_v40 = vld [vmem:[#allocation3 + $0x8d0] sm:$0xff]  ;;  %v387_v41 = vld [vmem:[#allocation3 + $0xac0] sm:$0xff] }
 0x10b   :  { %2647 = vmatpush1.bf16.xpose.msra.mxu0 %v2646_v49  ;;  %v2794_v49 = vpack.c.bf16 %v369_v43, %v367_v42  ;;  %v389_v42 = vld [vmem:[#allocation3 + $0xad0] sm:$0xff]  ;;  %v328_v43 = vld [vmem:[#allocation3 + $0x8e8] sm:$0xff] }
 0x10c   :  { %2711 = vmatpush1.bf16.xpose.msra.mxu1 %v2710_v50  ;;  %2649 = vmatprep.subr.bf16.mxu0 %v2648_v51  ;;  %v2732_v50 = vpack.c.bf16 %v310_v45, %v308_v44  ;;  %v2796_v51 = vpack.c.bf16 %v374_v47, %v372_v46  ;;  %v330_v44 = vld [vmem:[#allocation3 + $0x8f8] sm:$0xff]  ;;  %v392_v45 = vld [vmem:[#allocation3 + $0xae8] sm:$0xff] }
 0x10d   :  { %2713 = vmatprep.subr.bf16.mxu1 %v2712_v52  ;;  %v307_v52 = vld [vmem:[#allocation3 + $0x840] sm:$0xff]  ;;  %v394_v46 = vld [vmem:[#allocation3 + $0xaf8] sm:$0xff] }
 0x10e   :  { %v2734_v60 = vpack.c.bf16 %v309_v53, %v307_v52  ;;  %v329_v52 = vld [vmem:[#allocation3 + $0x8f0] sm:$0xff]  ;;  %v391_v53 = vld [vmem:[#allocation3 + $0xae0] sm:$0xff] }
 0x113   :  { %2651 = vmatpush1.bf16.xpose.msra.mxu0 %v2650_v61  ;;  %v2798_v61 = vpack.c.bf16 %v373_v55, %v371_v54  ;;  %v393_v54 = vld [vmem:[#allocation3 + $0xaf0] sm:$0xff]  ;;  %v332_v55 = vld [vmem:[#allocation3 + $0x908] sm:$0xff] }
 0x114   :  { %2715 = vmatpush1.bf16.xpose.msra.mxu1 %v2714_v62  ;;  %2653 = vmatprep.subr.bf16.mxu0 %v2652_v63  ;;  %v2736_v62 = vpack.c.bf16 %v314_v57, %v312_v56  ;;  %v2800_v63 = vpack.c.bf16 %v378_v59, %v376_v58  ;;  %v334_v56 = vld [vmem:[#allocation3 + $0x918] sm:$0xff]  ;;  %v396_v57 = vld [vmem:[#allocation3 + $0xb08] sm:$0xff] }
 0x115   :  { %2717 = vmatprep.subr.bf16.mxu1 %v2716_v0  ;;  %v311_v0 = vld [vmem:[#allocation3 + $0x860] sm:$0xff]  ;;  %v398_v58 = vld [vmem:[#allocation3 + $0xb18] sm:$0xff] }
 0x116   :  { %v2738_v9 = vpack.c.bf16 %v313_v1, %v311_v0  ;;  %v333_v0 = vld [vmem:[#allocation3 + $0x910] sm:$0xff]  ;;  %v395_v1 = vld [vmem:[#allocation3 + $0xb00] sm:$0xff] }
 0x11b   :  { %2655 = vmatpush1.bf16.xpose.msra.mxu0 %v2654_v10  ;;  %v2802_v10 = vpack.c.bf16 %v377_v4, %v375_v2  ;;  %v397_v2 = vld [vmem:[#allocation3 + $0xb10] sm:$0xff]  ;;  %v336_v4 = vld [vmem:[#allocation3 + $0x928] sm:$0xff] }
 0x11c   :  { %2719 = vmatpush1.bf16.xpose.msra.mxu1 %v2718_v11  ;;  %2657 = vmatprep.subr.bf16.mxu0 %v2656_v12  ;;  %v2740_v11 = vpack.c.bf16 %v318_v6, %v316_v5  ;;  %v2804_v12 = vpack.c.bf16 %v382_v8, %v380_v7  ;;  %v338_v5 = vld [vmem:[#allocation3 + $0x938] sm:$0xff]  ;;  %v400_v6 = vld [vmem:[#allocation3 + $0xb28] sm:$0xff] }
 0x11d   :  { %2721 = vmatprep.subr.bf16.mxu1 %v2720_v13  ;;  %v315_v13 = vld [vmem:[#allocation3 + $0x880] sm:$0xff]  ;;  %v402_v7 = vld [vmem:[#allocation3 + $0xb38] sm:$0xff] }
 0x11e   :  { %v2742_v23 = vpack.c.bf16 %v317_v14, %v315_v13  ;;  %v337_v13 = vld [vmem:[#allocation3 + $0x930] sm:$0xff]  ;;  %v399_v14 = vld [vmem:[#allocation3 + $0xb20] sm:$0xff] }
 0x123   :  { %2659 = vmatpush1.bf16.xpose.msra.mxu0 %v2658_v24  ;;  %v2806_v24 = vpack.c.bf16 %v381_v16, %v379_v15  ;;  %v401_v15 = vld [vmem:[#allocation3 + $0xb30] sm:$0xff]  ;;  %v340_v16 = vld [vmem:[#allocation3 + $0x948] sm:$0xff] }
 0x124   :  { %2723 = vmatpush1.bf16.xpose.msra.mxu1 %v2722_v25  ;;  %2725 = vmatprep.subr.bf16.mxu0 %v2724_v26  ;;  %v2744_v25 = vpack.c.bf16 %v322_v18, %v320_v17  ;;  %v2808_v26 = vpack.c.bf16 %v386_v22, %v384_v21  ;;  %v342_v17 = vld [vmem:[#allocation3 + $0x958] sm:$0xff]  ;;  %v404_v18 = vld [vmem:[#allocation3 + $0xb48] sm:$0xff] }
 0x125   :  { %2789 = vmatprep.subr.bf16.mxu1 %v2788_v27  ;;  %v319_v27 = vld [vmem:[#allocation3 + $0x8a0] sm:$0xff]  ;;  %v406_v21 = vld [vmem:[#allocation3 + $0xb58] sm:$0xff] }
 0x126   :  { %v2746_v35 = vpack.c.bf16 %v321_v28, %v319_v27  ;;  %v341_v27 = vld [vmem:[#allocation3 + $0x950] sm:$0xff]  ;;  %v403_v28 = vld [vmem:[#allocation3 + $0xb40] sm:$0xff] }
 0x12a   :  { %1287 = vmatmul.mubr.f32.vlgmr.msra.gmra.mrb[2].mxu0 %v3626_v20 }
 0x12b   :  { %1358 = vmatmul.mubr.f32.vlgmr.msra.gmra.mrb[2].mxu1 %v3626_v20  ;;  %2727 = vmatpush1.bf16.xpose.msra.mxu0 %v2726_v36  ;;  %v2810_v36 = vpack.c.bf16 %v385_v30, %v383_v29  ;;  %v405_v29 = vld [vmem:[#allocation3 + $0xb50] sm:$0xff]  ;;  %v344_v30 = vld [vmem:[#allocation3 + $0x968] sm:$0xff] }
 0x12c   :  { %2791 = vmatpush1.bf16.xpose.msra.mxu1 %v2790_v37  ;;  %2729 = vmatprep.subr.bf16.mxu0 %v2728_v38  ;;  %v2748_v37 = vpack.c.bf16 %v326_v32, %v324_v31  ;;  %v2812_v38 = vpack.c.bf16 %v390_v34, %v388_v33  ;;  %v346_v31 = vld [vmem:[#allocation3 + $0x978] sm:$0xff]  ;;  %v408_v32 = vld [vmem:[#allocation3 + $0xb68] sm:$0xff]  ;;  %v3574_v34 = vmov 1966171168  }
 0x12d   :  { %2793 = vmatprep.subr.bf16.mxu1 %v2792_v39  ;;  %1428 = vmatprep.mubr.f32.mxu0 %v3624_v19  ;;  %v323_v39 = vld [vmem:[#allocation3 + $0x8c0] sm:$0xff]  ;;  %v410_v33 = vld [vmem:[#allocation3 + $0xb78] sm:$0xff] }
 0x12e   :  { %1499 = vmatprep.mubr.f32.mxu1 %v3624_v19  ;;  %v2750_v47 = vpack.c.bf16 %v325_v40, %v323_v39  ;;  %v2832_v39 = vpack.c.bf16 %v410_v33, %v408_v32  ;;  %v419_v32 = vld [vmem:[#allocation3 + $0xbc0] sm:$0xff]  ;;  %v421_v33 = vld [vmem:[#allocation3 + $0xbd0] sm:$0xff] }
 0x133   :  { %2731 = vmatpush1.bf16.xpose.msra.mxu0 %v2730_v48  ;;  %v2814_v48 = vpack.c.bf16 %v389_v42, %v387_v41  ;;  %v3641_v41 = vstv %s3765_s2  ;;  %v343_v42 = vld [vmem:[#allocation3 + $0x960] sm:$0xff]  ;;  %s3575_s2 = smov [#allocation8]  }
 0x134   :  { %2795 = vmatpush1.bf16.xpose.msra.mxu1 %v2794_v49  ;;  %2733 = vmatprep.subr.bf16.mxu0 %v2732_v50  ;;  %v2752_v49 = vpack.c.bf16 %v330_v44, %v328_v43  ;;  %v2816_v50 = vpack.c.bf16 %v394_v46, %v392_v45  ;;  %v345_v43 = vld [vmem:[#allocation3 + $0x970] sm:$0xff]  ;;  %v407_v44 = vld [vmem:[#allocation3 + $0xb60] sm:$0xff]  ;;  %s2458_s11 = sshll.u32 %s3575_s2, 4  ;;  %s2459_s11 = int_to_ptr.vmem [resolvable:$true] %s2458_s11 }
 0x135   :  { %2797 = vmatprep.subr.bf16.mxu1 %v2796_v51  ;;  %v327_v51 = vld [vmem:[#allocation3 + $0x8e0] sm:$0xff]  ;;  %v409_v46 = vld [vmem:[#allocation3 + $0xb70] sm:$0xff]  ;;  %s3542_s12 = scalar_lea.vmem %s2459_s11, 512  ;;  %p3547_p3 = scmp.lt.s32.totalorder %s2459_s11, %s2459_s11 }
 0x136   :  { %v2754_v59 = vpack.c.bf16 %v329_v52, %v327_v51  ;;  %v412_v52 = vld [vmem:[#allocation3 + $0xb88] sm:$0xff]  ;;  %p3543_p2 = scmp.ne.s32.totalorder %s2459_s11, %s3542_s12  ;;  %p3548_p4 = scmp.lt.s32.totalorder %s3542_s12, %s3542_s12 }
 0x138   :  { %p3549_p5 = por %p3548_p4, %p3547_p3 }
 0x13a   :  { %p3550_p6 = pnand %p3549_p5, %p3543_p2 }
 0x13b   :  { %2735 = vmatpush1.bf16.xpose.msra.mxu0 %v2734_v60  ;;  %v2818_v60 = vpack.c.bf16 %v393_v54, %v391_v53  ;;  %v414_v53 = vld [vmem:[#allocation3 + $0xb98] sm:$0xff] }
 0x13c   :  { %2799 = vmatpush1.bf16.xpose.msra.mxu1 %v2798_v61  ;;  %2737 = vmatprep.subr.bf16.mxu0 %v2736_v62  ;;  %v2756_v61 = vpack.c.bf16 %v334_v56, %v332_v55  ;;  %v2820_v62 = vpack.c.bf16 %v398_v58, %v396_v57  ;;  %v2770_v58 = vpack.c.bf16 %v345_v43, %v343_v42  ;;  %v359_v43 = vld [vmem:[#allocation3 + $0x9e0] sm:$0xff] }
 0x13d   :  { %2801 = vmatprep.subr.bf16.mxu1 %v2800_v63  ;;  %v331_v63 = vld [vmem:[#allocation3 + $0x900] sm:$0xff] }
 0x13e   :  { %v2758_v8 = vpack.c.bf16 %v333_v0, %v331_v63  ;;  %v2836_v63 = vpack.c.bf16 %v414_v53, %v412_v52 }
 0x143   :  { %2739 = vmatpush1.bf16.xpose.msra.mxu0 %v2738_v9  ;;  %v2822_v9 = vpack.c.bf16 %v397_v2, %v395_v1  ;;  %v347_v2 = vld [vmem:[#allocation3 + $0x980] sm:$0xff] }
 0x144   :  { %2803 = vmatpush1.bf16.xpose.msra.mxu1 %v2802_v10  ;;  %2741 = vmatprep.subr.bf16.mxu0 %v2740_v11  ;;  %v2760_v10 = vpack.c.bf16 %v338_v5, %v336_v4  ;;  %v2824_v11 = vpack.c.bf16 %v402_v7, %v400_v6  ;;  %v349_v4 = vld [vmem:[#allocation3 + $0x990] sm:$0xff]  ;;  %v411_v5 = vld [vmem:[#allocation3 + $0xb80] sm:$0xff]  ;;  %v352_v7 = vld [vmem:[#allocation3 + $0x9a8] sm:$0xff] }
 0x145   :  { %2805 = vmatprep.subr.bf16.mxu1 %v2804_v12  ;;  %v335_v12 = vld [vmem:[#allocation3 + $0x920] sm:$0xff]  ;;  %v413_v6 = vld [vmem:[#allocation3 + $0xb90] sm:$0xff] }
 0x146   :  { %v2762_v22 = vpack.c.bf16 %v337_v13, %v335_v12  ;;  %v2774_v12 = vpack.c.bf16 %v349_v4, %v347_v2  ;;  %v2838_v13 = vpack.c.bf16 %v413_v6, %v411_v5  ;;  %v431_v6 = vld [vmem:[#allocation3 + $0xc20] sm:$0xff] }
 0x14b   :  { %2743 = vmatpush1.bf16.xpose.msra.mxu0 %v2742_v23  ;;  %v2826_v23 = vpack.c.bf16 %v401_v15, %v399_v14 }
 0x14c   :  { %2807 = vmatpush1.bf16.xpose.msra.mxu1 %v2806_v24  ;;  %2745 = vmatprep.subr.bf16.mxu0 %v2744_v25  ;;  %v2764_v24 = vpack.c.bf16 %v342_v17, %v340_v16  ;;  %v2828_v25 = vpack.c.bf16 %v406_v21, %v404_v18  ;;  %v351_v16 = vld [vmem:[#allocation3 + $0x9a0] sm:$0xff]  ;;  %v353_v17 = vld [vmem:[#allocation3 + $0x9b0] sm:$0xff] }
 0x14d   :  { %2809 = vmatprep.subr.bf16.mxu1 %v2808_v26  ;;  %v339_v26 = vld [vmem:[#allocation3 + $0x940] sm:$0xff]  ;;  %v417_v21 = vld [vmem:[#allocation3 + $0xbb0] sm:$0xff] }
 0x14e   :  { %v415_v18 = vld [vmem:[#allocation3 + $0xba0] sm:$0xff] }
 0x153   :  { %2747 = vmatpush1.bf16.xpose.msra.mxu0 %v2746_v35  ;;  %v2253_v35 = vunpack.c.l.s4 %v3574_v34  ;;  %v360_v34 = vld [vmem:[#allocation3 + $0x9e8] sm:$0xff] }
 0x154   :  { %2811 = vmatpush1.bf16.xpose.msra.mxu1 %v2810_v36  ;;  %2749 = vmatprep.subr.bf16.mxu0 %v2748_v37  ;;  %v2766_v36 = vpack.c.bf16 %v341_v27, %v339_v26  ;;  %v2830_v37 = vpack.c.bf16 %v405_v29, %v403_v28  ;;  %v2778_v26 = vpack.c.bf16 %v353_v17, %v351_v16 }
 0x155   :  { %2813 = vmatprep.subr.bf16.mxu1 %v2812_v38  ;;  %v2768_v38 = vpack.c.bf16 %v346_v31, %v344_v30  ;;  %v2254_v40 = vunpack.c.0.s8 %v2253_v35  ;;  %v2842_v27 = vpack.c.bf16 %v417_v21, %v415_v18  ;;  %v355_v30 = vld [vmem:[#allocation3 + $0x9c0] sm:$0xff]  ;;  %v357_v31 = vld [vmem:[#allocation3 + $0x9d0] sm:$0xff]  ;;  %v362_v35 = vld [vmem:[#allocation3 + $0x9f8] sm:$0xff] }
 0x156   :  { %v435_v21 = vld [vmem:[#allocation3 + $0xc40] sm:$0xff] }
 0x157   :  { %v3645_v54 = vsub.s32 %v2254_v40, %v3620_v3  ;;  %v2784_v40 = vpack.c.bf16 %v362_v35, %v360_v34  ;;  %v441_v34 = vld [vmem:[#allocation3 + $0xc70] sm:$0xff]  ;;  %v503_v35 = vld [vmem:[#allocation3 + $0xe60] sm:$0xff] }
 0x15b   :  { %2751 = vmatpush1.bf16.xpose.msra.mxu0 %v2750_v47  ;;  %v348_v47 = vld [vmem:[#allocation3 + $0x988] sm:$0xff] }
 0x15c   :  { %2815 = vmatpush1.bf16.xpose.msra.mxu1 %v2814_v48  ;;  %2753 = vmatprep.subr.bf16.mxu0 %v2752_v49  ;;  %v350_v48 = vld [vmem:[#allocation3 + $0x998] sm:$0xff] }
 0x15d   :  { %2817 = vmatprep.subr.bf16.mxu1 %v2816_v50 }
 0x163   :  { %2755 = vmatpush1.bf16.xpose.msra.mxu0 %v2754_v59 }
 0x164   :  { %2819 = vmatpush1.bf16.xpose.msra.mxu1 %v2818_v60  ;;  %2757 = vmatprep.subr.bf16.mxu0 %v2756_v61  ;;  %v2834_v60 = vpack.c.bf16 %v409_v46, %v407_v44  ;;  %v2772_v61 = vpack.c.bf16 %v350_v48, %v348_v47  ;;  %v361_v44 = vld [vmem:[#allocation3 + $0x9f0] sm:$0xff]  ;;  %v428_v47 = vld [vmem:[#allocation3 + $0xc08] sm:$0xff]  ;;  %v430_v48 = vld [vmem:[#allocation3 + $0xc18] sm:$0xff] }
 0x165   :  { %2821 = vmatprep.subr.bf16.mxu1 %v2820_v62  ;;  %v425_v46 = vld [vmem:[#allocation3 + $0xbf0] sm:$0xff]  ;;  %v2852_v53 = vpack.c.bf16 %v430_v48, %v428_v47  ;;  %v507_v48 = vld [vmem:[#allocation3 + $0xe80] sm:$0xff] }
 0x166   :  { %v445_v47 = vld [vmem:[#allocation3 + $0xc90] sm:$0xff] }
 0x16b   :  { %2759 = vmatpush1.bf16.xpose.msra.mxu0 %v2758_v8  ;;  %v354_v8 = vld [vmem:[#allocation3 + $0x9b8] sm:$0xff] }
 0x16c   :  { %2823 = vmatpush1.bf16.xpose.msra.mxu1 %v2822_v9  ;;  %2761 = vmatprep.subr.bf16.mxu0 %v2760_v10  ;;  %v416_v10 = vld [vmem:[#allocation3 + $0xba8] sm:$0xff]  ;;  %v2776_v14 = vpack.c.bf16 %v354_v8, %v352_v7  ;;  %v433_v7 = vld [vmem:[#allocation3 + $0xc30] sm:$0xff]  ;;  %v495_v8 = vld [vmem:[#allocation3 + $0xe20] sm:$0xff] }
 0x16d   :  { %2825 = vmatprep.subr.bf16.mxu1 %v2824_v11  ;;  %v418_v11 = vld [vmem:[#allocation3 + $0xbb8] sm:$0xff] }
 0x16e   :  { %v2840_v15 = vpack.c.bf16 %v418_v11, %v416_v10  ;;  %v497_v10 = vld [vmem:[#allocation3 + $0xe30] sm:$0xff]  ;;  %v436_v11 = vld [vmem:[#allocation3 + $0xc48] sm:$0xff] }
 0x16f   :  { %v2922_v16 = vpack.c.bf16 %v497_v10, %v495_v8  ;;  %v451_v10 = vld [vmem:[#allocation3 + $0xcc0] sm:$0xff] }
 0x173   :  { %2763 = vmatpush1.bf16.xpose.msra.mxu0 %v2762_v22  ;;  %v356_v22 = vld [vmem:[#allocation3 + $0x9c8] sm:$0xff] }
 0x174   :  { %2827 = vmatpush1.bf16.xpose.msra.mxu1 %v2826_v23  ;;  %2765 = vmatprep.subr.bf16.mxu0 %v2764_v24  ;;  %v358_v23 = vld [vmem:[#allocation3 + $0x9d8] sm:$0xff]  ;;  %v420_v24 = vld [vmem:[#allocation3 + $0xbc8] sm:$0xff] }
 0x175   :  { %2829 = vmatprep.subr.bf16.mxu1 %v2828_v25  ;;  %v422_v25 = vld [vmem:[#allocation3 + $0xbd8] sm:$0xff]  ;;  %v2780_v28 = vpack.c.bf16 %v358_v23, %v356_v22  ;;  %v437_v22 = vld [vmem:[#allocation3 + $0xc50] sm:$0xff]  ;;  %v499_v23 = vld [vmem:[#allocation3 + $0xe40] sm:$0xff] }
 0x176   :  { %v2844_v29 = vpack.c.bf16 %v422_v25, %v420_v24  ;;  %v501_v24 = vld [vmem:[#allocation3 + $0xe50] sm:$0xff]  ;;  %v440_v25 = vld [vmem:[#allocation3 + $0xc68] sm:$0xff] }
 0x17b   :  { %2767 = vmatpush1.bf16.xpose.msra.mxu0 %v2766_v36  ;;  %v424_v36 = vld [vmem:[#allocation3 + $0xbe8] sm:$0xff] }
 0x17c   :  { %2831 = vmatpush1.bf16.xpose.msra.mxu1 %v2830_v37  ;;  %2769 = vmatprep.subr.bf16.mxu0 %v2768_v38  ;;  %v426_v37 = vld [vmem:[#allocation3 + $0xbf8] sm:$0xff]  ;;  %v2782_v38 = vpack.c.bf16 %v357_v31, %v355_v30  ;;  %v2926_v30 = vpack.c.bf16 %v501_v24, %v499_v23  ;;  %v455_v24 = vld [vmem:[#allocation3 + $0xce0] sm:$0xff] }
 0x17d   :  { %v1146_v45 = vpop.f32.mrb[0].mxu0  ;;  %2833 = vmatprep.subr.bf16.mxu1 %v2832_v39  ;;  %v2846_v39 = vpack.c.bf16 %v421_v33, %v419_v32  ;;  %v2848_v42 = vpack.c.bf16 %v426_v37, %v424_v36  ;;  %v439_v33 = vld [vmem:[#allocation3 + $0xc60] sm:$0xff]  ;;  %v505_v36 = vld [vmem:[#allocation3 + $0xe70] sm:$0xff]  ;;  %v444_v37 = vld [vmem:[#allocation3 + $0xc88] sm:$0xff] }
 0x17e   :  { %v1147_v49 = vadd.f32 %v1146_v45, %v3641_v41  ;;  %v1217_v50 = vpop.f32.mrb[0].mxu1  ;;  %v1148_v51 = vpop.f32.mrb[1].mxu0  ;;  %v423_v45 = vld [vmem:[#allocation3 + $0xbe0] sm:$0xff] }
 0x17f   :  { %v1218_v55 = vadd.f32 %v1217_v50, %v3641_v41  ;;  %v1149_v56 = vadd.f32 %v1148_v51, %v3641_v41  ;;  %v1219_v57 = vpop.f32.mrb[1].mxu1  ;;  %v494_v50 = vld [vmem:[#allocation3 + $0xe18] sm:$0xff]  ;;  %v2786_v51 = vpack.c.bf16 %v361_v44, %v359_v43  ;;  %v2850_v52 = vpack.c.bf16 %v425_v46, %v423_v45  ;;  %v443_v46 = vld [vmem:[#allocation3 + $0xc80] sm:$0xff] }
 0x180   :  { %v1220_v59 = vadd.f32 %v1219_v57, %v3641_v41  ;;  %v429_v57 = vld [vmem:[#allocation3 + $0xc10] sm:$0xff]  ;;  %v2930_v43 = vpack.c.bf16 %v505_v36, %v503_v35  ;;  %v459_v36 = vld [vmem:[#allocation3 + $0xd00] sm:$0xff] }
 0x181   :  { %v2248_v62 = vcombine.low %v1147_v49, %v1149_v56  ;;  %v492_v49 = vld [vmem:[#allocation3 + $0xe08] sm:$0xff]  ;;  %v427_v56 = vld [vmem:[#allocation3 + $0xc00] sm:$0xff] }
 0x182   :  { %v2249_v0 = vcombine.low %v1218_v55, %v1220_v59  ;;  %v2916_v55 = vpack.c.bf16 %v494_v50, %v492_v49  ;;  %v493_v59 = vld [vmem:[#allocation3 + $0xe10] sm:$0xff]  ;;  %v448_v50 = vld [vmem:[#allocation3 + $0xca8] sm:$0xff] }
 0x183   :  { %v3651_v1 = vrot.slane %v2248_v62, %v3645_v54  ;;  %2771 = vmatpush1.bf16.xpose.msra.mxu0 %v2770_v58  ;;  %v491_v58 = vld [vmem:[#allocation3 + $0xe00] sm:$0xff]  ;;  %v496_v62 = vld [vmem:[#allocation3 + $0xe28] sm:$0xff]  ;;  %v509_v49 = vld [vmem:[#allocation3 + $0xe90] sm:$0xff] }
 0x184   :  { %v3654_v3 = vrot.slane %v2249_v0, %v3645_v54  ;;  %2835 = vmatpush1.bf16.xpose.msra.mxu1 %v2834_v60  ;;  %2773 = vmatprep.subr.bf16.mxu0 %v2772_v61  ;;  %v432_v60 = vld [vmem:[#allocation3 + $0xc28] sm:$0xff]  ;;  %v434_v61 = vld [vmem:[#allocation3 + $0xc38] sm:$0xff]  ;;  %v2854_v0 = vpack.c.bf16 %v429_v57, %v427_v56  ;;  %v2918_v2 = vpack.c.bf16 %v493_v59, %v491_v58  ;;  %v447_v59 = vld [vmem:[#allocation3 + $0xca0] sm:$0xff] }
 0x185   :  { %2837 = vmatprep.subr.bf16.mxu1 %v2836_v63  ;;  %v498_v63 = vld [vmem:[#allocation3 + $0xe38] sm:$0xff]  ;;  %v2856_v4 = vpack.c.bf16 %v434_v61, %v432_v60  ;;  %v2934_v56 = vpack.c.bf16 %v509_v49, %v507_v48  ;;  %v449_v60 = vld [vmem:[#allocation3 + $0xcb0] sm:$0xff]  ;;  %v511_v61 = vld [vmem:[#allocation3 + $0xea0] sm:$0xff] }
 0x186   :  { %v2280_v9 = vcombine.low %v3651_v1, %v3654_v3  ;;  %v2920_v5 = vpack.c.bf16 %v498_v63, %v496_v62  ;;  %v513_v62 = vld [vmem:[#allocation3 + $0xeb0] sm:$0xff]  ;;  %v452_v63 = vld [vmem:[#allocation3 + $0xcc8] sm:$0xff]  ;;  %v463_v49 = vld [vmem:[#allocation3 + $0xd20] sm:$0xff] }
 0x187   :  { %v550_v1 = vld [vmem:[#allocation3 + $0xfd8] sm:$0xff] }
 0x18b   :  { %2775 = vmatpush1.bf16.xpose.msra.mxu0 %v2774_v12  ;;  %v438_v12 = vld [vmem:[#allocation3 + $0xc58] sm:$0xff] }
 0x18c   :  { %2839 = vmatpush1.bf16.xpose.msra.mxu1 %v2838_v13  ;;  %2777 = vmatprep.subr.bf16.mxu0 %v2776_v14  ;;  %v500_v13 = vld [vmem:[#allocation3 + $0xe48] sm:$0xff]  ;;  %v502_v14 = vld [vmem:[#allocation3 + $0xe58] sm:$0xff]  ;;  %v2860_v17 = vpack.c.bf16 %v438_v12, %v436_v11  ;;  %v453_v11 = vld [vmem:[#allocation3 + $0xcd0] sm:$0xff] }
 0x18d   :  { %2841 = vmatprep.subr.bf16.mxu1 %v2840_v15  ;;  %v2858_v15 = vpack.c.bf16 %v433_v7, %v431_v6  ;;  %v2924_v18 = vpack.c.bf16 %v502_v14, %v500_v13  ;;  %v2938_v6 = vpack.c.bf16 %v513_v62, %v511_v61  ;;  %v515_v12 = vld [vmem:[#allocation3 + $0xec0] sm:$0xff]  ;;  %v517_v13 = vld [vmem:[#allocation3 + $0xed0] sm:$0xff]  ;;  %v456_v14 = vld [vmem:[#allocation3 + $0xce8] sm:$0xff] }
 0x18e   :  { %v467_v62 = vld [vmem:[#allocation3 + $0xd40] sm:$0xff] }
 0x193   :  { %2779 = vmatpush1.bf16.xpose.msra.mxu0 %v2778_v26  ;;  %v442_v26 = vld [vmem:[#allocation3 + $0xc78] sm:$0xff] }
 0x194   :  { %2843 = vmatpush1.bf16.xpose.msra.mxu1 %v2842_v27  ;;  %2781 = vmatprep.subr.bf16.mxu0 %v2780_v28  ;;  %v504_v27 = vld [vmem:[#allocation3 + $0xe68] sm:$0xff]  ;;  %v506_v28 = vld [vmem:[#allocation3 + $0xe78] sm:$0xff]  ;;  %v2864_v31 = vpack.c.bf16 %v442_v26, %v440_v25  ;;  %v457_v25 = vld [vmem:[#allocation3 + $0xcf0] sm:$0xff] }
 0x195   :  { %2845 = vmatprep.subr.bf16.mxu1 %v2844_v29  ;;  %v2862_v29 = vpack.c.bf16 %v437_v22, %v435_v21  ;;  %v2928_v32 = vpack.c.bf16 %v506_v28, %v504_v27  ;;  %v2942_v21 = vpack.c.bf16 %v517_v13, %v515_v12  ;;  %v519_v26 = vld [vmem:[#allocation3 + $0xee0] sm:$0xff]  ;;  %v521_v27 = vld [vmem:[#allocation3 + $0xef0] sm:$0xff]  ;;  %v460_v28 = vld [vmem:[#allocation3 + $0xd08] sm:$0xff] }
 0x196   :  { %v471_v13 = vld [vmem:[#allocation3 + $0xd60] sm:$0xff] }
 0x19b   :  { %2783 = vmatpush1.bf16.xpose.msra.mxu0 %v2782_v38  ;;  %v446_v38 = vld [vmem:[#allocation3 + $0xc98] sm:$0xff] }
 0x19c   :  { %2847 = vmatpush1.bf16.xpose.msra.mxu1 %v2846_v39  ;;  %2785 = vmatprep.subr.bf16.mxu0 %v2784_v40  ;;  %v508_v39 = vld [vmem:[#allocation3 + $0xe88] sm:$0xff]  ;;  %v510_v40 = vld [vmem:[#allocation3 + $0xe98] sm:$0xff]  ;;  %v2868_v44 = vpack.c.bf16 %v446_v38, %v444_v37  ;;  %v461_v37 = vld [vmem:[#allocation3 + $0xd10] sm:$0xff] }
 0x19d   :  { %2849 = vmatprep.subr.bf16.mxu1 %v2848_v42  ;;  %v2866_v42 = vpack.c.bf16 %v441_v34, %v439_v33  ;;  %v2932_v45 = vpack.c.bf16 %v510_v40, %v508_v39  ;;  %v2946_v33 = vpack.c.bf16 %v521_v27, %v519_v26  ;;  %v523_v38 = vld [vmem:[#allocation3 + $0xf00] sm:$0xff]  ;;  %v525_v39 = vld [vmem:[#allocation3 + $0xf10] sm:$0xff]  ;;  %v464_v40 = vld [vmem:[#allocation3 + $0xd28] sm:$0xff] }
 0x19e   :  { %v542_v26 = vld [vmem:[#allocation3 + $0xf98] sm:$0xff] }
 0x1a3   :  { %2787 = vmatpush1.bf16.xpose.msra.mxu0 %v2786_v51  ;;  %v450_v51 = vld [vmem:[#allocation3 + $0xcb8] sm:$0xff] }
 0x1a4   :  { %2851 = vmatpush1.bf16.xpose.msra.mxu1 %v2850_v52  ;;  %2853 = vmatprep.subr.bf16.mxu0 %v2852_v53  ;;  %v512_v52 = vld [vmem:[#allocation3 + $0xea8] sm:$0xff]  ;;  %v514_v53 = vld [vmem:[#allocation3 + $0xeb8] sm:$0xff]  ;;  %v2872_v57 = vpack.c.bf16 %v450_v51, %v448_v50  ;;  %v465_v50 = vld [vmem:[#allocation3 + $0xd30] sm:$0xff] }
 0x1a5   :  { %2917 = vmatprep.subr.bf16.mxu1 %v2916_v55  ;;  %v2870_v55 = vpack.c.bf16 %v445_v47, %v443_v46  ;;  %v2936_v58 = vpack.c.bf16 %v514_v53, %v512_v52  ;;  %v2950_v46 = vpack.c.bf16 %v525_v39, %v523_v38  ;;  %v527_v51 = vld [vmem:[#allocation3 + $0xf20] sm:$0xff]  ;;  %v529_v52 = vld [vmem:[#allocation3 + $0xf30] sm:$0xff]  ;;  %v468_v53 = vld [vmem:[#allocation3 + $0xd48] sm:$0xff] }
 0x1a6   :  { %v475_v39 = vld [vmem:[#allocation3 + $0xd80] sm:$0xff] }
 0x1aa   :  { %1429 = vmatmul.mubr.f32.vlgmr.msra.gmra.mrb[4].mxu0 %v3626_v20 }
 0x1ab   :  { %1500 = vmatmul.mubr.f32.vlgmr.msra.gmra.mrb[4].mxu1 %v3626_v20  ;;  %2855 = vmatpush1.bf16.xpose.msra.mxu0 %v2854_v0  ;;  %v454_v0 = vld [vmem:[#allocation3 + $0xcd8] sm:$0xff] }
 0x1ac   :  { %2919 = vmatpush1.bf16.xpose.msra.mxu1 %v2918_v2  ;;  %2857 = vmatprep.subr.bf16.mxu0 %v2856_v4  ;;  %v516_v2 = vld [vmem:[#allocation3 + $0xec8] sm:$0xff]  ;;  %v518_v4 = vld [vmem:[#allocation3 + $0xed8] sm:$0xff]  ;;  %v2876_v7 = vpack.c.bf16 %v454_v0, %v452_v63  ;;  %v469_v63 = vld [vmem:[#allocation3 + $0xd50] sm:$0xff] }
 0x1ad   :  { %2921 = vmatprep.subr.bf16.mxu1 %v2920_v5  ;;  %1570 = vmatprep.mubr.f32.mxu0 %v3624_v19  ;;  %v2874_v5 = vpack.c.bf16 %v449_v60, %v447_v59  ;;  %v2940_v8 = vpack.c.bf16 %v518_v4, %v516_v2  ;;  %v2954_v59 = vpack.c.bf16 %v529_v52, %v527_v51  ;;  %v531_v0 = vld [vmem:[#allocation3 + $0xf40] sm:$0xff]  ;;  %v533_v2 = vld [vmem:[#allocation3 + $0xf50] sm:$0xff]  ;;  %v472_v4 = vld [vmem:[#allocation3 + $0xd68] sm:$0xff] }
 0x1ae   :  { %1641 = vmatprep.mubr.f32.mxu1 %v3624_v19 }
 0x1b3   :  { %2859 = vmatpush1.bf16.xpose.msra.mxu0 %v2858_v15  ;;  %v458_v15 = vld [vmem:[#allocation3 + $0xcf8] sm:$0xff] }
 0x1b4   :  { %2923 = vmatpush1.bf16.xpose.msra.mxu1 %v2922_v16  ;;  %2861 = vmatprep.subr.bf16.mxu0 %v2860_v17  ;;  %v520_v16 = vld [vmem:[#allocation3 + $0xee8] sm:$0xff]  ;;  %v522_v17 = vld [vmem:[#allocation3 + $0xef8] sm:$0xff]  ;;  %v2880_v22 = vpack.c.bf16 %v458_v15, %v456_v14  ;;  %v473_v14 = vld [vmem:[#allocation3 + $0xd70] sm:$0xff] }
 0x1b5   :  { %2925 = vmatprep.subr.bf16.mxu1 %v2924_v18  ;;  %v2878_v18 = vpack.c.bf16 %v453_v11, %v451_v10  ;;  %v2944_v23 = vpack.c.bf16 %v522_v17, %v520_v16  ;;  %v2958_v10 = vpack.c.bf16 %v533_v2, %v531_v0  ;;  %v535_v15 = vld [vmem:[#allocation3 + $0xf60] sm:$0xff]  ;;  %v537_v17 = vld [vmem:[#allocation3 + $0xf70] sm:$0xff] }
 0x1bb   :  { %2863 = vmatpush1.bf16.xpose.msra.mxu0 %v2862_v29  ;;  %v462_v29 = vld [vmem:[#allocation3 + $0xd18] sm:$0xff] }
 0x1bc   :  { %2927 = vmatpush1.bf16.xpose.msra.mxu1 %v2926_v30  ;;  %2865 = vmatprep.subr.bf16.mxu0 %v2864_v31  ;;  %v524_v30 = vld [vmem:[#allocation3 + $0xf08] sm:$0xff]  ;;  %v526_v31 = vld [vmem:[#allocation3 + $0xf18] sm:$0xff]  ;;  %v2884_v34 = vpack.c.bf16 %v462_v29, %v460_v28 }
 0x1bd   :  { %2929 = vmatprep.subr.bf16.mxu1 %v2928_v32  ;;  %v2882_v32 = vpack.c.bf16 %v457_v25, %v455_v24  ;;  %v2948_v35 = vpack.c.bf16 %v526_v31, %v524_v30  ;;  %v540_v25 = vld [vmem:[#allocation3 + $0xf88] sm:$0xff]  ;;  %v2898_v30 = vpack.c.bf16 %v473_v14, %v471_v13 }
 0x1c3   :  { %2867 = vmatpush1.bf16.xpose.msra.mxu0 %v2866_v42  ;;  %v466_v42 = vld [vmem:[#allocation3 + $0xd38] sm:$0xff] }
 0x1c4   :  { %2931 = vmatpush1.bf16.xpose.msra.mxu1 %v2930_v43  ;;  %2869 = vmatprep.subr.bf16.mxu0 %v2868_v44  ;;  %v528_v43 = vld [vmem:[#allocation3 + $0xf28] sm:$0xff]  ;;  %v530_v44 = vld [vmem:[#allocation3 + $0xf38] sm:$0xff]  ;;  %v2888_v47 = vpack.c.bf16 %v466_v42, %v464_v40  ;;  %v477_v40 = vld [vmem:[#allocation3 + $0xd90] sm:$0xff] }
 0x1c5   :  { %2933 = vmatprep.subr.bf16.mxu1 %v2932_v45  ;;  %v2886_v45 = vpack.c.bf16 %v461_v37, %v459_v36  ;;  %v2952_v48 = vpack.c.bf16 %v530_v44, %v528_v43  ;;  %v539_v42 = vld [vmem:[#allocation3 + $0xf80] sm:$0xff]  ;;  %v541_v43 = vld [vmem:[#allocation3 + $0xf90] sm:$0xff]  ;;  %v480_v44 = vld [vmem:[#allocation3 + $0xda8] sm:$0xff] }
 0x1c6   :  { %v2966_v52 = vpack.c.bf16 %v541_v43, %v539_v42 }
 0x1cb   :  { %2871 = vmatpush1.bf16.xpose.msra.mxu0 %v2870_v55  ;;  %v470_v55 = vld [vmem:[#allocation3 + $0xd58] sm:$0xff] }
 0x1cc   :  { %2935 = vmatpush1.bf16.xpose.msra.mxu1 %v2934_v56  ;;  %2873 = vmatprep.subr.bf16.mxu0 %v2872_v57  ;;  %v532_v56 = vld [vmem:[#allocation3 + $0xf48] sm:$0xff]  ;;  %v534_v57 = vld [vmem:[#allocation3 + $0xf58] sm:$0xff]  ;;  %v2892_v60 = vpack.c.bf16 %v470_v55, %v468_v53 }
 0x1cd   :  { %2937 = vmatprep.subr.bf16.mxu1 %v2936_v58  ;;  %v2890_v58 = vpack.c.bf16 %v465_v50, %v463_v49  ;;  %v2956_v61 = vpack.c.bf16 %v534_v57, %v532_v56  ;;  %v2902_v49 = vpack.c.bf16 %v477_v40, %v475_v39  ;;  %v2288_v50 = vrot.slane %v2280_v9, %v3645_v54  ;;  %v479_v57 = vld [vmem:[#allocation3 + $0xda0] sm:$0xff] }
 0x1d3   :  { %2875 = vmatpush1.bf16.xpose.msra.mxu0 %v2874_v5  ;;  %v474_v5 = vld [vmem:[#allocation3 + $0xd78] sm:$0xff] }
 0x1d4   :  { %2939 = vmatpush1.bf16.xpose.msra.mxu1 %v2938_v6  ;;  %2877 = vmatprep.subr.bf16.mxu0 %v2876_v7  ;;  %v536_v6 = vld [vmem:[#allocation3 + $0xf68] sm:$0xff]  ;;  %v538_v7 = vld [vmem:[#allocation3 + $0xf78] sm:$0xff]  ;;  %v2896_v11 = vpack.c.bf16 %v474_v5, %v472_v4  ;;  %v483_v4 = vld [vmem:[#allocation3 + $0xdc0] sm:$0xff] }
 0x1d5   :  { %2941 = vmatprep.subr.bf16.mxu1 %v2940_v8  ;;  %v2894_v8 = vpack.c.bf16 %v469_v63, %v467_v62  ;;  %v2960_v12 = vpack.c.bf16 %v538_v7, %v536_v6  ;;  %v486_v62 = vld [vmem:[#allocation3 + $0xdd8] sm:$0xff]  ;;  %v548_v63 = vld [vmem:[#allocation3 + $0xfc8] sm:$0xff]  ;;  %v485_v5 = vld [vmem:[#allocation3 + $0xdd0] sm:$0xff] }
 0x1d6   :  { %v2972_v2 = vpack.c.bf16 %v550_v1, %v548_v63  ;;  %v547_v6 = vld [vmem:[#allocation3 + $0xfc0] sm:$0xff]  ;;  %v549_v7 = vld [vmem:[#allocation3 + $0xfd0] sm:$0xff]  ;;  %v2910_v13 = vpack.c.bf16 %v485_v5, %v483_v4  ;;  %v632_v63 = vld [vmem:[#allocation3 + $0x1268] sm:$0xff] }
 0x1d7   :  { %v2974_v14 = vpack.c.bf16 %v549_v7, %v547_v6  ;;  %v634_v1 = vld [vmem:[#allocation3 + $0x1278] sm:$0xff]  ;;  %v567_v4 = vld [vmem:[#allocation3 + $0x1060] sm:$0xff]  ;;  %v569_v5 = vld [vmem:[#allocation3 + $0x1070] sm:$0xff] }
 0x1d8   :  { %v631_v6 = vld [vmem:[#allocation3 + $0x1260] sm:$0xff]  ;;  %v633_v7 = vld [vmem:[#allocation3 + $0x1270] sm:$0xff] }
 0x1db   :  { %2879 = vmatpush1.bf16.xpose.msra.mxu0 %v2878_v18  ;;  %v476_v18 = vld [vmem:[#allocation3 + $0xd88] sm:$0xff] }
 0x1dc   :  { %2943 = vmatpush1.bf16.xpose.msra.mxu1 %v2942_v21  ;;  %2881 = vmatprep.subr.bf16.mxu0 %v2880_v22  ;;  %v478_v21 = vld [vmem:[#allocation3 + $0xd98] sm:$0xff] }
 0x1dd   :  { %2945 = vmatprep.subr.bf16.mxu1 %v2944_v23 }
 0x1e3   :  { %2883 = vmatpush1.bf16.xpose.msra.mxu0 %v2882_v32  ;;  %v2962_v32 = vpack.c.bf16 %v537_v17, %v535_v15  ;;  %v487_v17 = vld [vmem:[#allocation3 + $0xde0] sm:$0xff] }
 0x1e4   :  { %2947 = vmatpush1.bf16.xpose.msra.mxu1 %v2946_v33  ;;  %2885 = vmatprep.subr.bf16.mxu0 %v2884_v34  ;;  %v2900_v33 = vpack.c.bf16 %v478_v21, %v476_v18  ;;  %v489_v18 = vld [vmem:[#allocation3 + $0xdf0] sm:$0xff]  ;;  %v551_v21 = vld [vmem:[#allocation3 + $0xfe0] sm:$0xff] }
 0x1e5   :  { %2949 = vmatprep.subr.bf16.mxu1 %v2948_v35  ;;  %v2964_v35 = vpack.c.bf16 %v542_v26, %v540_v25  ;;  %v620_v25 = vld [vmem:[#allocation3 + $0x1208] sm:$0xff]  ;;  %v622_v26 = vld [vmem:[#allocation3 + $0x1218] sm:$0xff] }
 0x1eb   :  { %2887 = vmatpush1.bf16.xpose.msra.mxu0 %v2886_v45  ;;  %v482_v45 = vld [vmem:[#allocation3 + $0xdb8] sm:$0xff] }
 0x1ec   :  { %2951 = vmatpush1.bf16.xpose.msra.mxu1 %v2950_v46  ;;  %2889 = vmatprep.subr.bf16.mxu0 %v2888_v47  ;;  %v544_v47 = vld [vmem:[#allocation3 + $0xfa8] sm:$0xff]  ;;  %v2904_v53 = vpack.c.bf16 %v482_v45, %v480_v44  ;;  %v559_v44 = vld [vmem:[#allocation3 + $0x1020] sm:$0xff]  ;;  %v561_v45 = vld [vmem:[#allocation3 + $0x1030] sm:$0xff] }
 0x1ed   :  { %2953 = vmatprep.subr.bf16.mxu1 %v2952_v48  ;;  %v546_v48 = vld [vmem:[#allocation3 + $0xfb8] sm:$0xff] }
 0x1ee   :  { %v2968_v55 = vpack.c.bf16 %v546_v48, %v544_v47  ;;  %v625_v47 = vld [vmem:[#allocation3 + $0x1230] sm:$0xff]  ;;  %v564_v48 = vld [vmem:[#allocation3 + $0x1048] sm:$0xff] }
 0x1f3   :  { %2891 = vmatpush1.bf16.xpose.msra.mxu0 %v2890_v58  ;;  %v481_v58 = vld [vmem:[#allocation3 + $0xdb0] sm:$0xff] }
 0x1f4   :  { %2955 = vmatpush1.bf16.xpose.msra.mxu1 %v2954_v59  ;;  %2893 = vmatprep.subr.bf16.mxu0 %v2892_v60  ;;  %v543_v59 = vld [vmem:[#allocation3 + $0xfa0] sm:$0xff]  ;;  %v545_v60 = vld [vmem:[#allocation3 + $0xfb0] sm:$0xff]  ;;  %v2906_v3 = vpack.c.bf16 %v481_v58, %v479_v57 }
 0x1f5   :  { %2957 = vmatprep.subr.bf16.mxu1 %v2956_v61  ;;  %v484_v61 = vld [vmem:[#allocation3 + $0xdc8] sm:$0xff]  ;;  %v2970_v9 = vpack.c.bf16 %v545_v60, %v543_v59  ;;  %v563_v57 = vld [vmem:[#allocation3 + $0x1040] sm:$0xff]  ;;  %v565_v58 = vld [vmem:[#allocation3 + $0x1050] sm:$0xff] }
 0x1f6   :  { %v2908_v0 = vpack.c.bf16 %v486_v62, %v484_v61  ;;  %v627_v59 = vld [vmem:[#allocation3 + $0x1240] sm:$0xff]  ;;  %v629_v60 = vld [vmem:[#allocation3 + $0x1250] sm:$0xff]  ;;  %v568_v61 = vld [vmem:[#allocation3 + $0x1068] sm:$0xff] }
 0x1f7   :  { %v570_v62 = vld [vmem:[#allocation3 + $0x1078] sm:$0xff] }
 0x1fb   :  { %2895 = vmatpush1.bf16.xpose.msra.mxu0 %v2894_v8  ;;  %v488_v8 = vld [vmem:[#allocation3 + $0xde8] sm:$0xff] }
 0x1fc   :  { %2959 = vmatpush1.bf16.xpose.msra.mxu1 %v2958_v10  ;;  %2897 = vmatprep.subr.bf16.mxu0 %v2896_v11  ;;  %v490_v10 = vld [vmem:[#allocation3 + $0xdf8] sm:$0xff]  ;;  %v552_v11 = vld [vmem:[#allocation3 + $0xfe8] sm:$0xff] }
 0x1fd   :  { %v1288_v16 = vpop.f32.mrb[2].mxu0  ;;  %2961 = vmatprep.subr.bf16.mxu1 %v2960_v12  ;;  %v554_v12 = vld [vmem:[#allocation3 + $0xff8] sm:$0xff]  ;;  %v2912_v15 = vpack.c.bf16 %v490_v10, %v488_v8  ;;  %v572_v8 = vld [vmem:[#allocation3 + $0x1088] sm:$0xff] }
 0x1fe   :  { %v1289_v22 = vadd.f32 %v1288_v16, %v3641_v41  ;;  %v1359_v23 = vpop.f32.mrb[2].mxu1  ;;  %v1290_v24 = vpop.f32.mrb[3].mxu0  ;;  %v2976_v16 = vpack.c.bf16 %v554_v12, %v552_v11  ;;  %v574_v10 = vld [vmem:[#allocation3 + $0x1098] sm:$0xff]  ;;  %v636_v11 = vld [vmem:[#allocation3 + $0x1288] sm:$0xff] }
 0x1ff   :  { %v1360_v27 = vadd.f32 %v1359_v23, %v3641_v41  ;;  %v1291_v28 = vadd.f32 %v1290_v24, %v3641_v41  ;;  %v1361_v29 = vpop.f32.mrb[3].mxu1  ;;  %v556_v23 = vld [vmem:[#allocation3 + $0x1008] sm:$0xff]  ;;  %v558_v24 = vld [vmem:[#allocation3 + $0x1018] sm:$0xff] }
 0x200   :  { %v1362_v31 = vadd.f32 %v1361_v29, %v3641_v41  ;;  %v2980_v29 = vpack.c.bf16 %v558_v24, %v556_v23  ;;  %v638_v12 = vld [vmem:[#allocation3 + $0x1298] sm:$0xff]  ;;  %v576_v23 = vld [vmem:[#allocation3 + $0x10a8] sm:$0xff] }
 0x201   :  { %v2250_v34 = vcombine.low %v1289_v22, %v1291_v28  ;;  %v553_v22 = vld [vmem:[#allocation3 + $0xff0] sm:$0xff]  ;;  %v578_v24 = vld [vmem:[#allocation3 + $0x10b8] sm:$0xff] }
 0x202   :  { %v2251_v36 = vcombine.low %v1360_v27, %v1362_v31  ;;  %v2914_v27 = vpack.c.bf16 %v489_v18, %v487_v17  ;;  %v2978_v28 = vpack.c.bf16 %v553_v22, %v551_v21  ;;  %v555_v31 = vld [vmem:[#allocation3 + $0x1000] sm:$0xff]  ;;  %v573_v18 = vld [vmem:[#allocation3 + $0x1090] sm:$0xff] }
 0x203   :  { %v2272_v37 = vrot.slane %v2250_v34, %v3645_v54  ;;  %2899 = vmatpush1.bf16.xpose.msra.mxu0 %v2898_v30  ;;  %v3044_v30 = vpack.c.bf16 %v622_v26, %v620_v25  ;;  %v621_v34 = vld [vmem:[#allocation3 + $0x1210] sm:$0xff]  ;;  %v571_v17 = vld [vmem:[#allocation3 + $0x1080] sm:$0xff]  ;;  %v640_v25 = vld [vmem:[#allocation3 + $0x12a8] sm:$0xff] }
 0x204   :  { %v2279_v38 = vrot.slane %v2251_v36, %v3645_v54  ;;  %2963 = vmatpush1.bf16.xpose.msra.mxu1 %v2962_v32  ;;  %2901 = vmatprep.subr.bf16.mxu0 %v2900_v33  ;;  %v557_v32 = vld [vmem:[#allocation3 + $0x1010] sm:$0xff]  ;;  %v619_v33 = vld [vmem:[#allocation3 + $0x1200] sm:$0xff]  ;;  %v562_v36 = vld [vmem:[#allocation3 + $0x1038] sm:$0xff] }
 0x205   :  { %2965 = vmatprep.subr.bf16.mxu1 %v2964_v35  ;;  %v560_v35 = vld [vmem:[#allocation3 + $0x1028] sm:$0xff]  ;;  %v2982_v39 = vpack.c.bf16 %v557_v32, %v555_v31  ;;  %v3046_v40 = vpack.c.bf16 %v621_v34, %v619_v33  ;;  %v635_v21 = vld [vmem:[#allocation3 + $0x1280] sm:$0xff]  ;;  %v637_v22 = vld [vmem:[#allocation3 + $0x1290] sm:$0xff] }
 0x206   :  { %v2281_v46 = vcombine.low %v2272_v37, %v2279_v38  ;;  %v624_v37 = vld [vmem:[#allocation3 + $0x1228] sm:$0xff]  ;;  %v626_v38 = vld [vmem:[#allocation3 + $0x1238] sm:$0xff]  ;;  %v2984_v42 = vpack.c.bf16 %v562_v36, %v560_v35  ;;  %v575_v31 = vld [vmem:[#allocation3 + $0x10a0] sm:$0xff] }
 0x207   :  { %v3048_v43 = vpack.c.bf16 %v626_v38, %v624_v37  ;;  %v642_v26 = vld [vmem:[#allocation3 + $0x12b8] sm:$0xff]  ;;  %v577_v32 = vld [vmem:[#allocation3 + $0x10b0] sm:$0xff]  ;;  %v639_v33 = vld [vmem:[#allocation3 + $0x12a0] sm:$0xff] }
 0x208   :  { %v2295_v51 = vrot.slane %v2281_v46, %v3645_v54  ;;  %v623_v46 = vld [vmem:[#allocation3 + $0x1220] sm:$0xff]  ;;  %v641_v34 = vld [vmem:[#allocation3 + $0x12b0] sm:$0xff]  ;;  %v580_v35 = vld [vmem:[#allocation3 + $0x10c8] sm:$0xff] }
 0x209   :  { %v582_v36 = vld [vmem:[#allocation3 + $0x10d8] sm:$0xff]  ;;  %v644_v37 = vld [vmem:[#allocation3 + $0x12c8] sm:$0xff] }
 0x20a   :  { %v2296_v56 = vcombine.low %v2288_v50, %v2295_v51  ;;  %v628_v50 = vld [vmem:[#allocation3 + $0x1248] sm:$0xff]  ;;  %v630_v51 = vld [vmem:[#allocation3 + $0x1258] sm:$0xff] }
 0x20b   :  { %2903 = vmatpush1.bf16.xpose.msra.mxu0 %v2902_v49  ;;  %v566_v49 = vld [vmem:[#allocation3 + $0x1058] sm:$0xff] }
 0x20c   :  { %2967 = vmatpush1.bf16.xpose.msra.mxu1 %v2966_v52  ;;  %2905 = vmatprep.subr.bf16.mxu0 %v2904_v53  ;;  %2448 = vst [vmem:[#allocation8] sm:$0xff] %v2296_v56  ;;  %v2986_v52 = vpack.c.bf16 %v561_v45, %v559_v44  ;;  %v3050_v53 = vpack.c.bf16 %v625_v47, %v623_v46  ;;  %v646_v38 = vld [vmem:[#allocation3 + $0x12d8] sm:$0xff]  ;;  %v579_v44 = vld [vmem:[#allocation3 + $0x10c0] sm:$0xff]  ;;  %v581_v45 = vld [vmem:[#allocation3 + $0x10d0] sm:$0xff] }
 0x20d   :  { %2969 = vmatprep.subr.bf16.mxu1 %v2968_v55  ;;  %v2988_v55 = vpack.c.bf16 %v566_v49, %v564_v48  ;;  %v3052_v56 = vpack.c.bf16 %v630_v51, %v628_v50  ;;  %v643_v46 = vld [vmem:[#allocation3 + $0x12c0] sm:$0xff]  ;;  %v645_v47 = vld [vmem:[#allocation3 + $0x12d0] sm:$0xff]  ;;  %v584_v48 = vld [vmem:[#allocation3 + $0x10e8] sm:$0xff] }
 0x20e   :  { %v586_v49 = vld [vmem:[#allocation3 + $0x10f8] sm:$0xff]  ;;  %v648_v50 = vld [vmem:[#allocation3 + $0x12e8] sm:$0xff] }
 0x20f   :  { %v650_v51 = vld [vmem:[#allocation3 + $0x12f8] sm:$0xff] }
 0x213   :  { %2907 = vmatpush1.bf16.xpose.msra.mxu0 %v2906_v3  ;;  %v2990_v3 = vpack.c.bf16 %v565_v58, %v563_v57  ;;  %v583_v57 = vld [vmem:[#allocation3 + $0x10e0] sm:$0xff]  ;;  %v585_v58 = vld [vmem:[#allocation3 + $0x10f0] sm:$0xff] }
 0x214   :  { %2971 = vmatpush1.bf16.xpose.msra.mxu1 %v2970_v9  ;;  %2909 = vmatprep.subr.bf16.mxu0 %v2908_v0  ;;  %v3054_v9 = vpack.c.bf16 %v629_v60, %v627_v59  ;;  %v2992_v0 = vpack.c.bf16 %v570_v62, %v568_v61  ;;  %v647_v59 = vld [vmem:[#allocation3 + $0x12e0] sm:$0xff]  ;;  %v649_v60 = vld [vmem:[#allocation3 + $0x12f0] sm:$0xff]  ;;  %v588_v61 = vld [vmem:[#allocation3 + $0x1108] sm:$0xff] }
 0x215   :  { %2973 = vmatprep.subr.bf16.mxu1 %v2972_v2  ;;  %v3056_v2 = vpack.c.bf16 %v634_v1, %v632_v63  ;;  %v590_v62 = vld [vmem:[#allocation3 + $0x1118] sm:$0xff]  ;;  %v652_v63 = vld [vmem:[#allocation3 + $0x1308] sm:$0xff] }
 0x216   :  { %v654_v1 = vld [vmem:[#allocation3 + $0x1318] sm:$0xff] }
 0x21b   :  { %2911 = vmatpush1.bf16.xpose.msra.mxu0 %v2910_v13  ;;  %v2994_v13 = vpack.c.bf16 %v569_v5, %v567_v4  ;;  %v587_v4 = vld [vmem:[#allocation3 + $0x1100] sm:$0xff]  ;;  %v589_v5 = vld [vmem:[#allocation3 + $0x1110] sm:$0xff] }
 0x21c   :  { %2975 = vmatpush1.bf16.xpose.msra.mxu1 %v2974_v14  ;;  %2913 = vmatprep.subr.bf16.mxu0 %v2912_v15  ;;  %v3058_v14 = vpack.c.bf16 %v633_v7, %v631_v6  ;;  %v2996_v15 = vpack.c.bf16 %v574_v10, %v572_v8  ;;  %v651_v6 = vld [vmem:[#allocation3 + $0x1300] sm:$0xff]  ;;  %v653_v7 = vld [vmem:[#allocation3 + $0x1310] sm:$0xff]  ;;  %v592_v8 = vld [vmem:[#allocation3 + $0x1128] sm:$0xff] }
 0x21d   :  { %2977 = vmatprep.subr.bf16.mxu1 %v2976_v16  ;;  %v3060_v16 = vpack.c.bf16 %v638_v12, %v636_v11  ;;  %v594_v10 = vld [vmem:[#allocation3 + $0x1138] sm:$0xff]  ;;  %v656_v11 = vld [vmem:[#allocation3 + $0x1328] sm:$0xff] }
 0x21e   :  { %v658_v12 = vld [vmem:[#allocation3 + $0x1338] sm:$0xff] }
 0x223   :  { %2915 = vmatpush1.bf16.xpose.msra.mxu0 %v2914_v27  ;;  %v2998_v27 = vpack.c.bf16 %v573_v18, %v571_v17  ;;  %v591_v17 = vld [vmem:[#allocation3 + $0x1120] sm:$0xff]  ;;  %v593_v18 = vld [vmem:[#allocation3 + $0x1130] sm:$0xff] }
 0x224   :  { %2979 = vmatpush1.bf16.xpose.msra.mxu1 %v2978_v28  ;;  %2981 = vmatprep.subr.bf16.mxu0 %v2980_v29  ;;  %v3062_v28 = vpack.c.bf16 %v637_v22, %v635_v21  ;;  %v3000_v29 = vpack.c.bf16 %v578_v24, %v576_v23  ;;  %v655_v21 = vld [vmem:[#allocation3 + $0x1320] sm:$0xff]  ;;  %v657_v22 = vld [vmem:[#allocation3 + $0x1330] sm:$0xff]  ;;  %v596_v23 = vld [vmem:[#allocation3 + $0x1148] sm:$0xff] }
 0x225   :  { %3045 = vmatprep.subr.bf16.mxu1 %v3044_v30  ;;  %v3064_v30 = vpack.c.bf16 %v642_v26, %v640_v25  ;;  %v598_v24 = vld [vmem:[#allocation3 + $0x1158] sm:$0xff]  ;;  %v660_v25 = vld [vmem:[#allocation3 + $0x1348] sm:$0xff] }
 0x226   :  { %v662_v26 = vld [vmem:[#allocation3 + $0x1358] sm:$0xff] }
 0x22a   :  { %1571 = vmatmul.mubr.f32.vlgmr.msra.gmra.mrb[6].mxu0 %v3626_v20 }
 0x22b   :  { %1642 = vmatmul.mubr.f32.vlgmr.msra.gmra.mrb[6].mxu1 %v3626_v20  ;;  %2983 = vmatpush1.bf16.xpose.msra.mxu0 %v2982_v39  ;;  %v3002_v39 = vpack.c.bf16 %v577_v32, %v575_v31  ;;  %v595_v31 = vld [vmem:[#allocation3 + $0x1140] sm:$0xff]  ;;  %v597_v32 = vld [vmem:[#allocation3 + $0x1150] sm:$0xff] }
 0x22c   :  { %3047 = vmatpush1.bf16.xpose.msra.mxu1 %v3046_v40  ;;  %2985 = vmatprep.subr.bf16.mxu0 %v2984_v42  ;;  %v3066_v40 = vpack.c.bf16 %v641_v34, %v639_v33  ;;  %v3004_v42 = vpack.c.bf16 %v582_v36, %v580_v35  ;;  %v659_v33 = vld [vmem:[#allocation3 + $0x1340] sm:$0xff]  ;;  %v661_v34 = vld [vmem:[#allocation3 + $0x1350] sm:$0xff]  ;;  %v600_v35 = vld [vmem:[#allocation3 + $0x1168] sm:$0xff] }
 0x22d   :  { %3049 = vmatprep.subr.bf16.mxu1 %v3048_v43  ;;  %1712 = vmatprep.mubr.f32.mxu0 %v3624_v19  ;;  %v3068_v43 = vpack.c.bf16 %v646_v38, %v644_v37  ;;  %v602_v36 = vld [vmem:[#allocation3 + $0x1178] sm:$0xff]  ;;  %v664_v37 = vld [vmem:[#allocation3 + $0x1368] sm:$0xff] }
 0x22e   :  { %1783 = vmatprep.mubr.f32.mxu1 %v3624_v19  ;;  %v666_v38 = vld [vmem:[#allocation3 + $0x1378] sm:$0xff] }
 0x233   :  { %2987 = vmatpush1.bf16.xpose.msra.mxu0 %v2986_v52  ;;  %v3006_v52 = vpack.c.bf16 %v581_v45, %v579_v44  ;;  %v599_v44 = vld [vmem:[#allocation3 + $0x1160] sm:$0xff]  ;;  %v601_v45 = vld [vmem:[#allocation3 + $0x1170] sm:$0xff] }
 0x234   :  { %3051 = vmatpush1.bf16.xpose.msra.mxu1 %v3050_v53  ;;  %2989 = vmatprep.subr.bf16.mxu0 %v2988_v55  ;;  %v3070_v53 = vpack.c.bf16 %v645_v47, %v643_v46  ;;  %v3008_v55 = vpack.c.bf16 %v586_v49, %v584_v48  ;;  %v663_v46 = vld [vmem:[#allocation3 + $0x1360] sm:$0xff]  ;;  %v665_v48 = vld [vmem:[#allocation3 + $0x1370] sm:$0xff]  ;;  %v604_v49 = vld [vmem:[#allocation3 + $0x1188] sm:$0xff] }
 0x235   :  { %3053 = vmatprep.subr.bf16.mxu1 %v3052_v56  ;;  %v3072_v56 = vpack.c.bf16 %v650_v51, %v648_v50  ;;  %v606_v50 = vld [vmem:[#allocation3 + $0x1198] sm:$0xff] }
 0x23b   :  { %2991 = vmatpush1.bf16.xpose.msra.mxu0 %v2990_v3  ;;  %v3010_v3 = vpack.c.bf16 %v585_v58, %v583_v57 }
 0x23c   :  { %3055 = vmatpush1.bf16.xpose.msra.mxu1 %v3054_v9  ;;  %2993 = vmatprep.subr.bf16.mxu0 %v2992_v0  ;;  %v3074_v9 = vpack.c.bf16 %v649_v60, %v647_v59  ;;  %v3012_v0 = vpack.c.bf16 %v590_v62, %v588_v61  ;;  %v3026_v60 = vpack.c.bf16 %v601_v45, %v599_v44  ;;  %v615_v45 = vld [vmem:[#allocation3 + $0x11e0] sm:$0xff] }
 0x23d   :  { %3057 = vmatprep.subr.bf16.mxu1 %v3056_v2  ;;  %v3076_v2 = vpack.c.bf16 %v654_v1, %v652_v63  ;;  %v3090_v62 = vpack.c.bf16 %v665_v48, %v663_v46  ;;  %v3028_v63 = vpack.c.bf16 %v606_v50, %v604_v49  ;;  %v617_v46 = vld [vmem:[#allocation3 + $0x11f0] sm:$0xff]  ;;  %v684_v49 = vld [vmem:[#allocation3 + $0x1408] sm:$0xff]  ;;  %v686_v50 = vld [vmem:[#allocation3 + $0x1418] sm:$0xff] }
 0x23e   :  { %v681_v48 = vld [vmem:[#allocation3 + $0x13f0] sm:$0xff] }
 0x243   :  { %2995 = vmatpush1.bf16.xpose.msra.mxu0 %v2994_v13  ;;  %v3014_v13 = vpack.c.bf16 %v589_v5, %v587_v4  ;;  %v603_v4 = vld [vmem:[#allocation3 + $0x1180] sm:$0xff]  ;;  %v605_v5 = vld [vmem:[#allocation3 + $0x1190] sm:$0xff] }
 0x244   :  { %3059 = vmatpush1.bf16.xpose.msra.mxu1 %v3058_v14  ;;  %2997 = vmatprep.subr.bf16.mxu0 %v2996_v15  ;;  %v3078_v14 = vpack.c.bf16 %v653_v7, %v651_v6  ;;  %v3016_v15 = vpack.c.bf16 %v594_v10, %v592_v8  ;;  %v667_v6 = vld [vmem:[#allocation3 + $0x1380] sm:$0xff]  ;;  %v669_v7 = vld [vmem:[#allocation3 + $0x1390] sm:$0xff]  ;;  %v608_v8 = vld [vmem:[#allocation3 + $0x11a8] sm:$0xff] }
 0x245   :  { %3061 = vmatprep.subr.bf16.mxu1 %v3060_v16  ;;  %v3080_v16 = vpack.c.bf16 %v658_v12, %v656_v11  ;;  %v610_v10 = vld [vmem:[#allocation3 + $0x11b8] sm:$0xff]  ;;  %v672_v12 = vld [vmem:[#allocation3 + $0x13a8] sm:$0xff] }
 0x24b   :  { %2999 = vmatpush1.bf16.xpose.msra.mxu0 %v2998_v27  ;;  %v3018_v27 = vpack.c.bf16 %v593_v18, %v591_v17  ;;  %v607_v18 = vld [vmem:[#allocation3 + $0x11a0] sm:$0xff] }
 0x24c   :  { %3063 = vmatpush1.bf16.xpose.msra.mxu1 %v3062_v28  ;;  %3001 = vmatprep.subr.bf16.mxu0 %v3000_v29  ;;  %v3082_v28 = vpack.c.bf16 %v657_v22, %v655_v21  ;;  %v3020_v29 = vpack.c.bf16 %v598_v24, %v596_v23  ;;  %v609_v21 = vld [vmem:[#allocation3 + $0x11b0] sm:$0xff]  ;;  %v671_v22 = vld [vmem:[#allocation3 + $0x13a0] sm:$0xff]  ;;  %v612_v24 = vld [vmem:[#allocation3 + $0x11c8] sm:$0xff] }
 0x24d   :  { %3065 = vmatprep.subr.bf16.mxu1 %v3064_v30  ;;  %v3084_v30 = vpack.c.bf16 %v662_v26, %v660_v25  ;;  %v673_v23 = vld [vmem:[#allocation3 + $0x13b0] sm:$0xff]  ;;  %v614_v25 = vld [vmem:[#allocation3 + $0x11d8] sm:$0xff]  ;;  %v676_v26 = vld [vmem:[#allocation3 + $0x13c8] sm:$0xff] }
 0x253   :  { %3003 = vmatpush1.bf16.xpose.msra.mxu0 %v3002_v39  ;;  %v3022_v39 = vpack.c.bf16 %v597_v32, %v595_v31  ;;  %v611_v32 = vld [vmem:[#allocation3 + $0x11c0] sm:$0xff] }
 0x254   :  { %3067 = vmatpush1.bf16.xpose.msra.mxu1 %v3066_v40  ;;  %3005 = vmatprep.subr.bf16.mxu0 %v3004_v42  ;;  %v3086_v40 = vpack.c.bf16 %v661_v34, %v659_v33  ;;  %v3024_v42 = vpack.c.bf16 %v602_v36, %v600_v35  ;;  %v613_v33 = vld [vmem:[#allocation3 + $0x11d0] sm:$0xff]  ;;  %v675_v34 = vld [vmem:[#allocation3 + $0x13c0] sm:$0xff]  ;;  %v616_v36 = vld [vmem:[#allocation3 + $0x11e8] sm:$0xff] }
 0x255   :  { %3069 = vmatprep.subr.bf16.mxu1 %v3068_v43  ;;  %v3088_v43 = vpack.c.bf16 %v666_v38, %v664_v37  ;;  %v677_v35 = vld [vmem:[#allocation3 + $0x13d0] sm:$0xff]  ;;  %v618_v37 = vld [vmem:[#allocation3 + $0x11f8] sm:$0xff]  ;;  %v680_v38 = vld [vmem:[#allocation3 + $0x13e8] sm:$0xff] }
 0x25b   :  { %3007 = vmatpush1.bf16.xpose.msra.mxu0 %v3006_v52 }
 0x25c   :  { %3071 = vmatpush1.bf16.xpose.msra.mxu1 %v3070_v53  ;;  %3009 = vmatprep.subr.bf16.mxu0 %v3008_v55  ;;  %v668_v55 = vld [vmem:[#allocation3 + $0x1388] sm:$0xff] }
 0x25d   :  { %3073 = vmatprep.subr.bf16.mxu1 %v3072_v56  ;;  %v670_v56 = vld [vmem:[#allocation3 + $0x1398] sm:$0xff] }
 0x263   :  { %3011 = vmatpush1.bf16.xpose.msra.mxu0 %v3010_v3  ;;  %v3092_v3 = vpack.c.bf16 %v670_v56, %v668_v55  ;;  %v3108_v56 = vpack.c.bf16 %v686_v50, %v684_v49  ;;  %v701_v49 = vld [vmem:[#allocation3 + $0x1490] sm:$0xff]  ;;  %v763_v50 = vld [vmem:[#allocation3 + $0x1680] sm:$0xff] }
 0x264   :  { %3075 = vmatpush1.bf16.xpose.msra.mxu1 %v3074_v9  ;;  %3013 = vmatprep.subr.bf16.mxu0 %v3012_v0 }
 0x265   :  { %3077 = vmatprep.subr.bf16.mxu1 %v3076_v2 }
 0x26b   :  { %3015 = vmatpush1.bf16.xpose.msra.mxu0 %v3014_v13  ;;  %v674_v13 = vld [vmem:[#allocation3 + $0x13b8] sm:$0xff] }
 0x26c   :  { %3079 = vmatpush1.bf16.xpose.msra.mxu1 %v3078_v14  ;;  %3017 = vmatprep.subr.bf16.mxu0 %v3016_v15  ;;  %v3030_v14 = vpack.c.bf16 %v605_v5, %v603_v4  ;;  %v3094_v15 = vpack.c.bf16 %v669_v7, %v667_v6  ;;  %v3096_v17 = vpack.c.bf16 %v674_v13, %v672_v12  ;;  %v687_v7 = vld [vmem:[#allocation3 + $0x1420] sm:$0xff]  ;;  %v753_v12 = vld [vmem:[#allocation3 + $0x1630] sm:$0xff]  ;;  %v692_v13 = vld [vmem:[#allocation3 + $0x1448] sm:$0xff] }
 0x26d   :  { %3081 = vmatprep.subr.bf16.mxu1 %v3080_v16  ;;  %v3032_v16 = vpack.c.bf16 %v610_v10, %v608_v8  ;;  %v689_v8 = vld [vmem:[#allocation3 + $0x1430] sm:$0xff]  ;;  %v751_v10 = vld [vmem:[#allocation3 + $0x1620] sm:$0xff] }
 0x273   :  { %3019 = vmatpush1.bf16.xpose.msra.mxu0 %v3018_v27  ;;  %v678_v27 = vld [vmem:[#allocation3 + $0x13d8] sm:$0xff] }
 0x274   :  { %3083 = vmatpush1.bf16.xpose.msra.mxu1 %v3082_v28  ;;  %3021 = vmatprep.subr.bf16.mxu0 %v3020_v29  ;;  %v3034_v28 = vpack.c.bf16 %v609_v21, %v607_v18  ;;  %v3098_v29 = vpack.c.bf16 %v673_v23, %v671_v22  ;;  %v3100_v31 = vpack.c.bf16 %v678_v27, %v676_v26  ;;  %v691_v23 = vld [vmem:[#allocation3 + $0x1440] sm:$0xff]  ;;  %v757_v26 = vld [vmem:[#allocation3 + $0x1650] sm:$0xff]  ;;  %v696_v27 = vld [vmem:[#allocation3 + $0x1468] sm:$0xff] }
 0x275   :  { %3085 = vmatprep.subr.bf16.mxu1 %v3084_v30  ;;  %v3036_v30 = vpack.c.bf16 %v614_v25, %v612_v24  ;;  %v3178_v18 = vpack.c.bf16 %v753_v12, %v751_v10  ;;  %v693_v24 = vld [vmem:[#allocation3 + $0x1450] sm:$0xff]  ;;  %v755_v25 = vld [vmem:[#allocation3 + $0x1640] sm:$0xff] }
 0x276   :  { %v707_v12 = vld [vmem:[#allocation3 + $0x14c0] sm:$0xff] }
 0x27b   :  { %3023 = vmatpush1.bf16.xpose.msra.mxu0 %v3022_v39  ;;  %v682_v39 = vld [vmem:[#allocation3 + $0x13f8] sm:$0xff] }
 0x27c   :  { %3087 = vmatpush1.bf16.xpose.msra.mxu1 %v3086_v40  ;;  %3025 = vmatprep.subr.bf16.mxu0 %v3024_v42  ;;  %v3038_v40 = vpack.c.bf16 %v613_v33, %v611_v32  ;;  %v3102_v42 = vpack.c.bf16 %v677_v35, %v675_v34  ;;  %v3104_v44 = vpack.c.bf16 %v682_v39, %v680_v38  ;;  %v695_v35 = vld [vmem:[#allocation3 + $0x1460] sm:$0xff]  ;;  %v761_v38 = vld [vmem:[#allocation3 + $0x1670] sm:$0xff]  ;;  %v700_v39 = vld [vmem:[#allocation3 + $0x1488] sm:$0xff] }
 0x27d   :  { %v1430_v47 = vpop.f32.mrb[4].mxu0  ;;  %3089 = vmatprep.subr.bf16.mxu1 %v3088_v43  ;;  %v3040_v43 = vpack.c.bf16 %v618_v37, %v616_v36  ;;  %v3182_v32 = vpack.c.bf16 %v757_v26, %v755_v25  ;;  %v697_v36 = vld [vmem:[#allocation3 + $0x1470] sm:$0xff]  ;;  %v759_v37 = vld [vmem:[#allocation3 + $0x1660] sm:$0xff] }
 0x27e   :  { %v1431_v51 = vadd.f32 %v1430_v47, %v3641_v41  ;;  %v1501_v52 = vpop.f32.mrb[4].mxu1  ;;  %v1432_v53 = vpop.f32.mrb[5].mxu0  ;;  %v679_v47 = vld [vmem:[#allocation3 + $0x13e0] sm:$0xff] }
 0x27f   :  { %v1502_v57 = vadd.f32 %v1501_v52, %v3641_v41  ;;  %v1433_v58 = vadd.f32 %v1432_v53, %v3641_v41  ;;  %v1503_v59 = vpop.f32.mrb[5].mxu1  ;;  %v750_v52 = vld [vmem:[#allocation3 + $0x1618] sm:$0xff]  ;;  %v3042_v53 = vpack.c.bf16 %v617_v46, %v615_v45  ;;  %v3106_v55 = vpack.c.bf16 %v681_v48, %v679_v47  ;;  %v699_v48 = vld [vmem:[#allocation3 + $0x1480] sm:$0xff] }
 0x280   :  { %v1504_v61 = vadd.f32 %v1503_v59, %v3641_v41  ;;  %v685_v59 = vld [vmem:[#allocation3 + $0x1410] sm:$0xff]  ;;  %v3186_v45 = vpack.c.bf16 %v761_v38, %v759_v37  ;;  %v711_v26 = vld [vmem:[#allocation3 + $0x14e0] sm:$0xff] }
 0x281   :  { %v2297_v1 = vcombine.low %v1431_v51, %v1433_v58  ;;  %v748_v51 = vld [vmem:[#allocation3 + $0x1608] sm:$0xff]  ;;  %v683_v58 = vld [vmem:[#allocation3 + $0x1400] sm:$0xff] }
 0x282   :  { %v2298_v9 = vcombine.low %v1502_v57, %v1504_v61  ;;  %v3172_v57 = vpack.c.bf16 %v750_v52, %v748_v51  ;;  %v749_v61 = vld [vmem:[#allocation3 + $0x1610] sm:$0xff]  ;;  %v704_v52 = vld [vmem:[#allocation3 + $0x14a8] sm:$0xff]  ;;  %v715_v38 = vld [vmem:[#allocation3 + $0x1500] sm:$0xff] }
 0x283   :  { %v3682_v0 = vrot.slane %v2297_v1, %v3645_v54  ;;  %3027 = vmatpush1.bf16.xpose.msra.mxu0 %v3026_v60  ;;  %v747_v60 = vld [vmem:[#allocation3 + $0x1600] sm:$0xff]  ;;  %v752_v1 = vld [vmem:[#allocation3 + $0x1628] sm:$0xff]  ;;  %v765_v51 = vld [vmem:[#allocation3 + $0x1690] sm:$0xff] }
 0x284   :  { %v3685_v2 = vrot.slane %v2298_v9, %v3645_v54  ;;  %3091 = vmatpush1.bf16.xpose.msra.mxu1 %v3090_v62  ;;  %3029 = vmatprep.subr.bf16.mxu0 %v3028_v63  ;;  %v688_v62 = vld [vmem:[#allocation3 + $0x1428] sm:$0xff]  ;;  %v690_v63 = vld [vmem:[#allocation3 + $0x1438] sm:$0xff]  ;;  %v3110_v9 = vpack.c.bf16 %v685_v59, %v683_v58  ;;  %v3174_v4 = vpack.c.bf16 %v749_v61, %v747_v60  ;;  %v703_v61 = vld [vmem:[#allocation3 + $0x14a0] sm:$0xff] }
 0x285   :  { %3093 = vmatprep.subr.bf16.mxu1 %v3092_v3  ;;  %v754_v3 = vld [vmem:[#allocation3 + $0x1638] sm:$0xff]  ;;  %v3112_v5 = vpack.c.bf16 %v690_v63, %v688_v62  ;;  %v3190_v58 = vpack.c.bf16 %v765_v51, %v763_v50  ;;  %v705_v62 = vld [vmem:[#allocation3 + $0x14b0] sm:$0xff]  ;;  %v767_v63 = vld [vmem:[#allocation3 + $0x16a0] sm:$0xff] }
 0x286   :  { %v2329_v11 = vcombine.low %v3682_v0, %v3685_v2  ;;  %v3176_v6 = vpack.c.bf16 %v754_v3, %v752_v1  ;;  %v769_v1 = vld [vmem:[#allocation3 + $0x16b0] sm:$0xff]  ;;  %v708_v3 = vld [vmem:[#allocation3 + $0x14c8] sm:$0xff]  ;;  %v719_v51 = vld [vmem:[#allocation3 + $0x1520] sm:$0xff] }
 0x287   :  { %v806_v0 = vld [vmem:[#allocation3 + $0x17d8] sm:$0xff] }
 0x28b   :  { %3031 = vmatpush1.bf16.xpose.msra.mxu0 %v3030_v14  ;;  %v694_v14 = vld [vmem:[#allocation3 + $0x1458] sm:$0xff] }
 0x28c   :  { %3095 = vmatpush1.bf16.xpose.msra.mxu1 %v3094_v15  ;;  %3033 = vmatprep.subr.bf16.mxu0 %v3032_v16  ;;  %v756_v15 = vld [vmem:[#allocation3 + $0x1648] sm:$0xff]  ;;  %v758_v16 = vld [vmem:[#allocation3 + $0x1658] sm:$0xff]  ;;  %v3116_v21 = vpack.c.bf16 %v694_v14, %v692_v13  ;;  %v709_v13 = vld [vmem:[#allocation3 + $0x14d0] sm:$0xff] }
 0x28d   :  { %3097 = vmatprep.subr.bf16.mxu1 %v3096_v17  ;;  %v3114_v17 = vpack.c.bf16 %v689_v8, %v687_v7  ;;  %v3180_v22 = vpack.c.bf16 %v758_v16, %v756_v15  ;;  %v3194_v7 = vpack.c.bf16 %v769_v1, %v767_v63  ;;  %v771_v14 = vld [vmem:[#allocation3 + $0x16c0] sm:$0xff]  ;;  %v773_v15 = vld [vmem:[#allocation3 + $0x16d0] sm:$0xff]  ;;  %v712_v16 = vld [vmem:[#allocation3 + $0x14e8] sm:$0xff] }
 0x28e   :  { %v723_v1 = vld [vmem:[#allocation3 + $0x1540] sm:$0xff] }
 0x293   :  { %3035 = vmatpush1.bf16.xpose.msra.mxu0 %v3034_v28  ;;  %v698_v28 = vld [vmem:[#allocation3 + $0x1478] sm:$0xff] }
 0x294   :  { %3099 = vmatpush1.bf16.xpose.msra.mxu1 %v3098_v29  ;;  %3037 = vmatprep.subr.bf16.mxu0 %v3036_v30  ;;  %v760_v29 = vld [vmem:[#allocation3 + $0x1668] sm:$0xff]  ;;  %v762_v30 = vld [vmem:[#allocation3 + $0x1678] sm:$0xff]  ;;  %v3120_v33 = vpack.c.bf16 %v698_v28, %v696_v27  ;;  %v713_v27 = vld [vmem:[#allocation3 + $0x14f0] sm:$0xff] }
 0x295   :  { %3101 = vmatprep.subr.bf16.mxu1 %v3100_v31  ;;  %v3118_v31 = vpack.c.bf16 %v693_v24, %v691_v23  ;;  %v3184_v34 = vpack.c.bf16 %v762_v30, %v760_v29  ;;  %v3198_v23 = vpack.c.bf16 %v773_v15, %v771_v14  ;;  %v775_v28 = vld [vmem:[#allocation3 + $0x16e0] sm:$0xff]  ;;  %v777_v29 = vld [vmem:[#allocation3 + $0x16f0] sm:$0xff]  ;;  %v716_v30 = vld [vmem:[#allocation3 + $0x1508] sm:$0xff] }
 0x296   :  { %v727_v15 = vld [vmem:[#allocation3 + $0x1560] sm:$0xff] }
 0x29b   :  { %3039 = vmatpush1.bf16.xpose.msra.mxu0 %v3038_v40  ;;  %v702_v40 = vld [vmem:[#allocation3 + $0x1498] sm:$0xff] }
 0x29c   :  { %3103 = vmatpush1.bf16.xpose.msra.mxu1 %v3102_v42  ;;  %3041 = vmatprep.subr.bf16.mxu0 %v3040_v43  ;;  %v764_v42 = vld [vmem:[#allocation3 + $0x1688] sm:$0xff]  ;;  %v766_v43 = vld [vmem:[#allocation3 + $0x1698] sm:$0xff]  ;;  %v3124_v46 = vpack.c.bf16 %v702_v40, %v700_v39  ;;  %v717_v39 = vld [vmem:[#allocation3 + $0x1510] sm:$0xff] }
 0x29d   :  { %3105 = vmatprep.subr.bf16.mxu1 %v3104_v44  ;;  %v3122_v44 = vpack.c.bf16 %v697_v36, %v695_v35  ;;  %v3188_v47 = vpack.c.bf16 %v766_v43, %v764_v42  ;;  %v3202_v35 = vpack.c.bf16 %v777_v29, %v775_v28  ;;  %v779_v40 = vld [vmem:[#allocation3 + $0x1700] sm:$0xff]  ;;  %v781_v42 = vld [vmem:[#allocation3 + $0x1710] sm:$0xff]  ;;  %v720_v43 = vld [vmem:[#allocation3 + $0x1528] sm:$0xff] }
 0x29e   :  { %v798_v28 = vld [vmem:[#allocation3 + $0x1798] sm:$0xff] }
 0x2a3   :  { %3043 = vmatpush1.bf16.xpose.msra.mxu0 %v3042_v53  ;;  %v706_v53 = vld [vmem:[#allocation3 + $0x14b8] sm:$0xff] }
 0x2a4   :  { %3107 = vmatpush1.bf16.xpose.msra.mxu1 %v3106_v55  ;;  %3109 = vmatprep.subr.bf16.mxu0 %v3108_v56  ;;  %v768_v55 = vld [vmem:[#allocation3 + $0x16a8] sm:$0xff]  ;;  %v770_v56 = vld [vmem:[#allocation3 + $0x16b8] sm:$0xff]  ;;  %v3128_v59 = vpack.c.bf16 %v706_v53, %v704_v52  ;;  %v721_v52 = vld [vmem:[#allocation3 + $0x1530] sm:$0xff] }
 0x2a5   :  { %3173 = vmatprep.subr.bf16.mxu1 %v3172_v57  ;;  %v3126_v57 = vpack.c.bf16 %v701_v49, %v699_v48  ;;  %v3192_v60 = vpack.c.bf16 %v770_v56, %v768_v55  ;;  %v3206_v48 = vpack.c.bf16 %v781_v42, %v779_v40  ;;  %v783_v53 = vld [vmem:[#allocation3 + $0x1720] sm:$0xff]  ;;  %v785_v55 = vld [vmem:[#allocation3 + $0x1730] sm:$0xff]  ;;  %v724_v56 = vld [vmem:[#allocation3 + $0x1548] sm:$0xff] }
 0x2a6   :  { %v731_v42 = vld [vmem:[#allocation3 + $0x1580] sm:$0xff] }
 0x2aa   :  { %1713 = vmatmul.mubr.f32.vlgmr.msra.gmra.mrb[8].mxu0 %v3626_v20 }
 0x2ab   :  { %1784 = vmatmul.mubr.f32.vlgmr.msra.gmra.mrb[8].mxu1 %v3626_v20  ;;  %3111 = vmatpush1.bf16.xpose.msra.mxu0 %v3110_v9  ;;  %v710_v9 = vld [vmem:[#allocation3 + $0x14d8] sm:$0xff] }
 0x2ac   :  { %3175 = vmatpush1.bf16.xpose.msra.mxu1 %v3174_v4  ;;  %3113 = vmatprep.subr.bf16.mxu0 %v3112_v5  ;;  %v772_v4 = vld [vmem:[#allocation3 + $0x16c8] sm:$0xff]  ;;  %v774_v5 = vld [vmem:[#allocation3 + $0x16d8] sm:$0xff]  ;;  %v3132_v8 = vpack.c.bf16 %v710_v9, %v708_v3  ;;  %v725_v3 = vld [vmem:[#allocation3 + $0x1550] sm:$0xff] }
 0x2ad   :  { %3177 = vmatprep.subr.bf16.mxu1 %v3176_v6  ;;  %1854 = vmatprep.mubr.f32.mxu0 %v3624_v19  ;;  %v3130_v6 = vpack.c.bf16 %v705_v62, %v703_v61  ;;  %v3196_v10 = vpack.c.bf16 %v774_v5, %v772_v4  ;;  %v3210_v61 = vpack.c.bf16 %v785_v55, %v783_v53  ;;  %v787_v9 = vld [vmem:[#allocation3 + $0x1740] sm:$0xff]  ;;  %v789_v4 = vld [vmem:[#allocation3 + $0x1750] sm:$0xff]  ;;  %v728_v5 = vld [vmem:[#allocation3 + $0x1568] sm:$0xff] }
 0x2ae   :  { %1925 = vmatprep.mubr.f32.mxu1 %v3624_v19 }
 0x2b3   :  { %3115 = vmatpush1.bf16.xpose.msra.mxu0 %v3114_v17  ;;  %v714_v17 = vld [vmem:[#allocation3 + $0x14f8] sm:$0xff] }
 0x2b4   :  { %3179 = vmatpush1.bf16.xpose.msra.mxu1 %v3178_v18  ;;  %3117 = vmatprep.subr.bf16.mxu0 %v3116_v21  ;;  %v776_v18 = vld [vmem:[#allocation3 + $0x16e8] sm:$0xff]  ;;  %v778_v21 = vld [vmem:[#allocation3 + $0x16f8] sm:$0xff]  ;;  %v3136_v24 = vpack.c.bf16 %v714_v17, %v712_v16  ;;  %v729_v16 = vld [vmem:[#allocation3 + $0x1570] sm:$0xff] }
 0x2b5   :  { %3181 = vmatprep.subr.bf16.mxu1 %v3180_v22  ;;  %v3134_v22 = vpack.c.bf16 %v709_v13, %v707_v12  ;;  %v3200_v25 = vpack.c.bf16 %v778_v21, %v776_v18  ;;  %v3214_v12 = vpack.c.bf16 %v789_v4, %v787_v9  ;;  %v791_v17 = vld [vmem:[#allocation3 + $0x1760] sm:$0xff]  ;;  %v793_v21 = vld [vmem:[#allocation3 + $0x1770] sm:$0xff] }
 0x2bb   :  { %3119 = vmatpush1.bf16.xpose.msra.mxu0 %v3118_v31  ;;  %v718_v31 = vld [vmem:[#allocation3 + $0x1518] sm:$0xff] }
 0x2bc   :  { %3183 = vmatpush1.bf16.xpose.msra.mxu1 %v3182_v32  ;;  %3121 = vmatprep.subr.bf16.mxu0 %v3120_v33  ;;  %v780_v32 = vld [vmem:[#allocation3 + $0x1708] sm:$0xff]  ;;  %v782_v33 = vld [vmem:[#allocation3 + $0x1718] sm:$0xff]  ;;  %v3140_v36 = vpack.c.bf16 %v718_v31, %v716_v30 }
 0x2bd   :  { %3185 = vmatprep.subr.bf16.mxu1 %v3184_v34  ;;  %v3138_v34 = vpack.c.bf16 %v713_v27, %v711_v26  ;;  %v3204_v37 = vpack.c.bf16 %v782_v33, %v780_v32  ;;  %v796_v27 = vld [vmem:[#allocation3 + $0x1788] sm:$0xff]  ;;  %v3154_v32 = vpack.c.bf16 %v729_v16, %v727_v15 }
 0x2c3   :  { %3123 = vmatpush1.bf16.xpose.msra.mxu0 %v3122_v44  ;;  %v722_v44 = vld [vmem:[#allocation3 + $0x1538] sm:$0xff] }
 0x2c4   :  { %3187 = vmatpush1.bf16.xpose.msra.mxu1 %v3186_v45  ;;  %3125 = vmatprep.subr.bf16.mxu0 %v3124_v46  ;;  %v784_v45 = vld [vmem:[#allocation3 + $0x1728] sm:$0xff]  ;;  %v786_v46 = vld [vmem:[#allocation3 + $0x1738] sm:$0xff]  ;;  %v3144_v49 = vpack.c.bf16 %v722_v44, %v720_v43  ;;  %v733_v43 = vld [vmem:[#allocation3 + $0x1590] sm:$0xff] }
 0x2c5   :  { %3189 = vmatprep.subr.bf16.mxu1 %v3188_v47  ;;  %v3142_v47 = vpack.c.bf16 %v717_v39, %v715_v38  ;;  %v3208_v50 = vpack.c.bf16 %v786_v46, %v784_v45  ;;  %v795_v44 = vld [vmem:[#allocation3 + $0x1780] sm:$0xff]  ;;  %v797_v45 = vld [vmem:[#allocation3 + $0x1790] sm:$0xff]  ;;  %v736_v46 = vld [vmem:[#allocation3 + $0x15a8] sm:$0xff] }
 0x2c6   :  { %v3222_v55 = vpack.c.bf16 %v797_v45, %v795_v44 }
 0x2cb   :  { %3127 = vmatpush1.bf16.xpose.msra.mxu0 %v3126_v57  ;;  %v726_v57 = vld [vmem:[#allocation3 + $0x1558] sm:$0xff] }
 0x2cc   :  { %3191 = vmatpush1.bf16.xpose.msra.mxu1 %v3190_v58  ;;  %3129 = vmatprep.subr.bf16.mxu0 %v3128_v59  ;;  %v788_v58 = vld [vmem:[#allocation3 + $0x1748] sm:$0xff]  ;;  %v790_v59 = vld [vmem:[#allocation3 + $0x1758] sm:$0xff]  ;;  %v3148_v62 = vpack.c.bf16 %v726_v57, %v724_v56 }
 0x2cd   :  { %3193 = vmatprep.subr.bf16.mxu1 %v3192_v60  ;;  %v3146_v60 = vpack.c.bf16 %v721_v52, %v719_v51  ;;  %v3212_v63 = vpack.c.bf16 %v790_v59, %v788_v58  ;;  %v3158_v51 = vpack.c.bf16 %v733_v43, %v731_v42  ;;  %v2337_v52 = vrot.slane %v2329_v11, %v3645_v54  ;;  %v735_v59 = vld [vmem:[#allocation3 + $0x15a0] sm:$0xff] }
 0x2d3   :  { %3131 = vmatpush1.bf16.xpose.msra.mxu0 %v3130_v6  ;;  %v730_v6 = vld [vmem:[#allocation3 + $0x1578] sm:$0xff] }
 0x2d4   :  { %3195 = vmatpush1.bf16.xpose.msra.mxu1 %v3194_v7  ;;  %3133 = vmatprep.subr.bf16.mxu0 %v3132_v8  ;;  %v792_v7 = vld [vmem:[#allocation3 + $0x1768] sm:$0xff]  ;;  %v794_v8 = vld [vmem:[#allocation3 + $0x1778] sm:$0xff]  ;;  %v3152_v13 = vpack.c.bf16 %v730_v6, %v728_v5  ;;  %v739_v5 = vld [vmem:[#allocation3 + $0x15c0] sm:$0xff] }
 0x2d5   :  { %3197 = vmatprep.subr.bf16.mxu1 %v3196_v10  ;;  %v3150_v10 = vpack.c.bf16 %v725_v3, %v723_v1  ;;  %v3216_v14 = vpack.c.bf16 %v794_v8, %v792_v7  ;;  %v742_v1 = vld [vmem:[#allocation3 + $0x15d8] sm:$0xff]  ;;  %v804_v3 = vld [vmem:[#allocation3 + $0x17c8] sm:$0xff]  ;;  %v741_v6 = vld [vmem:[#allocation3 + $0x15d0] sm:$0xff] }
 0x2d6   :  { %v3228_v4 = vpack.c.bf16 %v806_v0, %v804_v3  ;;  %v803_v7 = vld [vmem:[#allocation3 + $0x17c0] sm:$0xff]  ;;  %v805_v8 = vld [vmem:[#allocation3 + $0x17d0] sm:$0xff]  ;;  %v3166_v15 = vpack.c.bf16 %v741_v6, %v739_v5  ;;  %v888_v3 = vld [vmem:[#allocation3 + $0x1a68] sm:$0xff] }
 0x2d7   :  { %v3230_v16 = vpack.c.bf16 %v805_v8, %v803_v7  ;;  %v890_v0 = vld [vmem:[#allocation3 + $0x1a78] sm:$0xff]  ;;  %v823_v5 = vld [vmem:[#allocation3 + $0x1860] sm:$0xff]  ;;  %v825_v6 = vld [vmem:[#allocation3 + $0x1870] sm:$0xff] }
 0x2d8   :  { %v887_v7 = vld [vmem:[#allocation3 + $0x1a60] sm:$0xff]  ;;  %v889_v8 = vld [vmem:[#allocation3 + $0x1a70] sm:$0xff] }
 0x2db   :  { %3135 = vmatpush1.bf16.xpose.msra.mxu0 %v3134_v22  ;;  %v732_v22 = vld [vmem:[#allocation3 + $0x1588] sm:$0xff] }
 0x2dc   :  { %3199 = vmatpush1.bf16.xpose.msra.mxu1 %v3198_v23  ;;  %3137 = vmatprep.subr.bf16.mxu0 %v3136_v24  ;;  %v734_v23 = vld [vmem:[#allocation3 + $0x1598] sm:$0xff] }
 0x2dd   :  { %3201 = vmatprep.subr.bf16.mxu1 %v3200_v25 }
 0x2e3   :  { %3139 = vmatpush1.bf16.xpose.msra.mxu0 %v3138_v34  ;;  %v3218_v34 = vpack.c.bf16 %v793_v21, %v791_v17  ;;  %v743_v21 = vld [vmem:[#allocation3 + $0x15e0] sm:$0xff] }
 0x2e4   :  { %3203 = vmatpush1.bf16.xpose.msra.mxu1 %v3202_v35  ;;  %3141 = vmatprep.subr.bf16.mxu0 %v3140_v36  ;;  %v3156_v35 = vpack.c.bf16 %v734_v23, %v732_v22  ;;  %v745_v22 = vld [vmem:[#allocation3 + $0x15f0] sm:$0xff]  ;;  %v807_v23 = vld [vmem:[#allocation3 + $0x17e0] sm:$0xff] }
 0x2e5   :  { %3205 = vmatprep.subr.bf16.mxu1 %v3204_v37  ;;  %v3220_v37 = vpack.c.bf16 %v798_v28, %v796_v27  ;;  %v876_v27 = vld [vmem:[#allocation3 + $0x1a08] sm:$0xff]  ;;  %v878_v28 = vld [vmem:[#allocation3 + $0x1a18] sm:$0xff] }
 0x2eb   :  { %3143 = vmatpush1.bf16.xpose.msra.mxu0 %v3142_v47  ;;  %v738_v47 = vld [vmem:[#allocation3 + $0x15b8] sm:$0xff] }
 0x2ec   :  { %3207 = vmatpush1.bf16.xpose.msra.mxu1 %v3206_v48  ;;  %3145 = vmatprep.subr.bf16.mxu0 %v3144_v49  ;;  %v800_v49 = vld [vmem:[#allocation3 + $0x17a8] sm:$0xff]  ;;  %v3160_v56 = vpack.c.bf16 %v738_v47, %v736_v46  ;;  %v815_v46 = vld [vmem:[#allocation3 + $0x1820] sm:$0xff]  ;;  %v817_v47 = vld [vmem:[#allocation3 + $0x1830] sm:$0xff] }
 0x2ed   :  { %3209 = vmatprep.subr.bf16.mxu1 %v3208_v50  ;;  %v802_v50 = vld [vmem:[#allocation3 + $0x17b8] sm:$0xff] }
 0x2ee   :  { %v3224_v57 = vpack.c.bf16 %v802_v50, %v800_v49  ;;  %v881_v49 = vld [vmem:[#allocation3 + $0x1a30] sm:$0xff]  ;;  %v820_v50 = vld [vmem:[#allocation3 + $0x1848] sm:$0xff] }
 0x2f3   :  { %3147 = vmatpush1.bf16.xpose.msra.mxu0 %v3146_v60  ;;  %v737_v60 = vld [vmem:[#allocation3 + $0x15b0] sm:$0xff] }
 0x2f4   :  { %3211 = vmatpush1.bf16.xpose.msra.mxu1 %v3210_v61  ;;  %3149 = vmatprep.subr.bf16.mxu0 %v3148_v62  ;;  %v799_v61 = vld [vmem:[#allocation3 + $0x17a0] sm:$0xff]  ;;  %v801_v62 = vld [vmem:[#allocation3 + $0x17b0] sm:$0xff]  ;;  %v3162_v2 = vpack.c.bf16 %v737_v60, %v735_v59 }
 0x2f5   :  { %3213 = vmatprep.subr.bf16.mxu1 %v3212_v63  ;;  %v740_v63 = vld [vmem:[#allocation3 + $0x15c8] sm:$0xff]  ;;  %v3226_v11 = vpack.c.bf16 %v801_v62, %v799_v61  ;;  %v819_v59 = vld [vmem:[#allocation3 + $0x1840] sm:$0xff]  ;;  %v821_v60 = vld [vmem:[#allocation3 + $0x1850] sm:$0xff] }
 0x2f6   :  { %v3164_v9 = vpack.c.bf16 %v742_v1, %v740_v63  ;;  %v883_v61 = vld [vmem:[#allocation3 + $0x1a40] sm:$0xff]  ;;  %v885_v62 = vld [vmem:[#allocation3 + $0x1a50] sm:$0xff]  ;;  %v824_v63 = vld [vmem:[#allocation3 + $0x1868] sm:$0xff] }
 0x2f7   :  { %v826_v1 = vld [vmem:[#allocation3 + $0x1878] sm:$0xff] }
 0x2fb   :  { %3151 = vmatpush1.bf16.xpose.msra.mxu0 %v3150_v10  ;;  %v744_v10 = vld [vmem:[#allocation3 + $0x15e8] sm:$0xff] }
 0x2fc   :  { %3215 = vmatpush1.bf16.xpose.msra.mxu1 %v3214_v12  ;;  %3153 = vmatprep.subr.bf16.mxu0 %v3152_v13  ;;  %v746_v12 = vld [vmem:[#allocation3 + $0x15f8] sm:$0xff]  ;;  %v808_v13 = vld [vmem:[#allocation3 + $0x17e8] sm:$0xff] }
 0x2fd   :  { %v1572_v18 = vpop.f32.mrb[6].mxu0  ;;  %3217 = vmatprep.subr.bf16.mxu1 %v3216_v14  ;;  %v810_v14 = vld [vmem:[#allocation3 + $0x17f8] sm:$0xff]  ;;  %v3168_v17 = vpack.c.bf16 %v746_v12, %v744_v10  ;;  %v828_v10 = vld [vmem:[#allocation3 + $0x1888] sm:$0xff] }
 0x2fe   :  { %v1573_v24 = vadd.f32 %v1572_v18, %v3641_v41  ;;  %v1643_v25 = vpop.f32.mrb[6].mxu1  ;;  %v1574_v26 = vpop.f32.mrb[7].mxu0  ;;  %v3232_v18 = vpack.c.bf16 %v810_v14, %v808_v13  ;;  %v830_v12 = vld [vmem:[#allocation3 + $0x1898] sm:$0xff]  ;;  %v892_v13 = vld [vmem:[#allocation3 + $0x1a88] sm:$0xff] }
 0x2ff   :  { %v1644_v29 = vadd.f32 %v1643_v25, %v3641_v41  ;;  %v1575_v30 = vadd.f32 %v1574_v26, %v3641_v41  ;;  %v1645_v31 = vpop.f32.mrb[7].mxu1  ;;  %v812_v25 = vld [vmem:[#allocation3 + $0x1808] sm:$0xff]  ;;  %v814_v26 = vld [vmem:[#allocation3 + $0x1818] sm:$0xff] }
 0x300   :  { %v1646_v33 = vadd.f32 %v1645_v31, %v3641_v41  ;;  %v3236_v31 = vpack.c.bf16 %v814_v26, %v812_v25  ;;  %v894_v14 = vld [vmem:[#allocation3 + $0x1a98] sm:$0xff]  ;;  %v832_v25 = vld [vmem:[#allocation3 + $0x18a8] sm:$0xff] }
 0x301   :  { %v2299_v36 = vcombine.low %v1573_v24, %v1575_v30  ;;  %v809_v24 = vld [vmem:[#allocation3 + $0x17f0] sm:$0xff]  ;;  %v834_v26 = vld [vmem:[#allocation3 + $0x18b8] sm:$0xff] }
 0x302   :  { %v2300_v38 = vcombine.low %v1644_v29, %v1646_v33  ;;  %v3170_v29 = vpack.c.bf16 %v745_v22, %v743_v21  ;;  %v3234_v30 = vpack.c.bf16 %v809_v24, %v807_v23  ;;  %v811_v33 = vld [vmem:[#allocation3 + $0x1800] sm:$0xff]  ;;  %v829_v22 = vld [vmem:[#allocation3 + $0x1890] sm:$0xff] }
 0x303   :  { %v2321_v39 = vrot.slane %v2299_v36, %v3645_v54  ;;  %3155 = vmatpush1.bf16.xpose.msra.mxu0 %v3154_v32  ;;  %v3300_v32 = vpack.c.bf16 %v878_v28, %v876_v27  ;;  %v877_v36 = vld [vmem:[#allocation3 + $0x1a10] sm:$0xff]  ;;  %v827_v21 = vld [vmem:[#allocation3 + $0x1880] sm:$0xff]  ;;  %v896_v27 = vld [vmem:[#allocation3 + $0x1aa8] sm:$0xff] }
 0x304   :  { %v2328_v40 = vrot.slane %v2300_v38, %v3645_v54  ;;  %3219 = vmatpush1.bf16.xpose.msra.mxu1 %v3218_v34  ;;  %3157 = vmatprep.subr.bf16.mxu0 %v3156_v35  ;;  %v813_v34 = vld [vmem:[#allocation3 + $0x1810] sm:$0xff]  ;;  %v875_v35 = vld [vmem:[#allocation3 + $0x1a00] sm:$0xff]  ;;  %v818_v38 = vld [vmem:[#allocation3 + $0x1838] sm:$0xff] }
 0x305   :  { %3221 = vmatprep.subr.bf16.mxu1 %v3220_v37  ;;  %v816_v37 = vld [vmem:[#allocation3 + $0x1828] sm:$0xff]  ;;  %v3238_v42 = vpack.c.bf16 %v813_v34, %v811_v33  ;;  %v3302_v43 = vpack.c.bf16 %v877_v36, %v875_v35  ;;  %v891_v23 = vld [vmem:[#allocation3 + $0x1a80] sm:$0xff]  ;;  %v893_v24 = vld [vmem:[#allocation3 + $0x1a90] sm:$0xff] }
 0x306   :  { %v2330_v48 = vcombine.low %v2321_v39, %v2328_v40  ;;  %v880_v39 = vld [vmem:[#allocation3 + $0x1a28] sm:$0xff]  ;;  %v882_v40 = vld [vmem:[#allocation3 + $0x1a38] sm:$0xff]  ;;  %v3240_v44 = vpack.c.bf16 %v818_v38, %v816_v37  ;;  %v831_v33 = vld [vmem:[#allocation3 + $0x18a0] sm:$0xff] }
 0x307   :  { %v3304_v45 = vpack.c.bf16 %v882_v40, %v880_v39  ;;  %v898_v28 = vld [vmem:[#allocation3 + $0x1ab8] sm:$0xff]  ;;  %v833_v34 = vld [vmem:[#allocation3 + $0x18b0] sm:$0xff]  ;;  %v895_v35 = vld [vmem:[#allocation3 + $0x1aa0] sm:$0xff] }
 0x308   :  { %v2344_v53 = vrot.slane %v2330_v48, %v3645_v54  ;;  %v879_v48 = vld [vmem:[#allocation3 + $0x1a20] sm:$0xff]  ;;  %v897_v36 = vld [vmem:[#allocation3 + $0x1ab0] sm:$0xff]  ;;  %v836_v37 = vld [vmem:[#allocation3 + $0x18c8] sm:$0xff] }
 0x309   :  { %v838_v38 = vld [vmem:[#allocation3 + $0x18d8] sm:$0xff]  ;;  %v900_v39 = vld [vmem:[#allocation3 + $0x1ac8] sm:$0xff] }
 0x30a   :  { %v2345_v58 = vcombine.low %v2337_v52, %v2344_v53  ;;  %v884_v52 = vld [vmem:[#allocation3 + $0x1a48] sm:$0xff]  ;;  %v886_v53 = vld [vmem:[#allocation3 + $0x1a58] sm:$0xff] }
 0x30b   :  { %3159 = vmatpush1.bf16.xpose.msra.mxu0 %v3158_v51  ;;  %v822_v51 = vld [vmem:[#allocation3 + $0x1858] sm:$0xff] }
 0x30c   :  { %3223 = vmatpush1.bf16.xpose.msra.mxu1 %v3222_v55  ;;  %3161 = vmatprep.subr.bf16.mxu0 %v3160_v56  ;;  %2449 = vst [vmem:[#allocation8 + $0x8] sm:$0xff] %v2345_v58  ;;  %v3242_v55 = vpack.c.bf16 %v817_v47, %v815_v46  ;;  %v3306_v56 = vpack.c.bf16 %v881_v49, %v879_v48  ;;  %v902_v40 = vld [vmem:[#allocation3 + $0x1ad8] sm:$0xff]  ;;  %v835_v46 = vld [vmem:[#allocation3 + $0x18c0] sm:$0xff]  ;;  %v837_v47 = vld [vmem:[#allocation3 + $0x18d0] sm:$0xff] }
 0x30d   :  { %3225 = vmatprep.subr.bf16.mxu1 %v3224_v57  ;;  %v3244_v57 = vpack.c.bf16 %v822_v51, %v820_v50  ;;  %v3308_v58 = vpack.c.bf16 %v886_v53, %v884_v52  ;;  %v899_v48 = vld [vmem:[#allocation3 + $0x1ac0] sm:$0xff]  ;;  %v901_v49 = vld [vmem:[#allocation3 + $0x1ad0] sm:$0xff]  ;;  %v840_v50 = vld [vmem:[#allocation3 + $0x18e8] sm:$0xff] }
 0x30e   :  { %v842_v51 = vld [vmem:[#allocation3 + $0x18f8] sm:$0xff]  ;;  %v904_v52 = vld [vmem:[#allocation3 + $0x1ae8] sm:$0xff] }
 0x30f   :  { %v906_v53 = vld [vmem:[#allocation3 + $0x1af8] sm:$0xff] }
 0x313   :  { %3163 = vmatpush1.bf16.xpose.msra.mxu0 %v3162_v2  ;;  %v3246_v2 = vpack.c.bf16 %v821_v60, %v819_v59  ;;  %v839_v59 = vld [vmem:[#allocation3 + $0x18e0] sm:$0xff]  ;;  %v841_v60 = vld [vmem:[#allocation3 + $0x18f0] sm:$0xff] }
 0x314   :  { %3227 = vmatpush1.bf16.xpose.msra.mxu1 %v3226_v11  ;;  %3165 = vmatprep.subr.bf16.mxu0 %v3164_v9  ;;  %v3310_v11 = vpack.c.bf16 %v885_v62, %v883_v61  ;;  %v3248_v9 = vpack.c.bf16 %v826_v1, %v824_v63  ;;  %v903_v61 = vld [vmem:[#allocation3 + $0x1ae0] sm:$0xff]  ;;  %v905_v62 = vld [vmem:[#allocation3 + $0x1af0] sm:$0xff]  ;;  %v844_v63 = vld [vmem:[#allocation3 + $0x1908] sm:$0xff] }
 0x315   :  { %3229 = vmatprep.subr.bf16.mxu1 %v3228_v4  ;;  %v3312_v4 = vpack.c.bf16 %v890_v0, %v888_v3  ;;  %v846_v1 = vld [vmem:[#allocation3 + $0x1918] sm:$0xff]  ;;  %v908_v3 = vld [vmem:[#allocation3 + $0x1b08] sm:$0xff] }
 0x316   :  { %v910_v0 = vld [vmem:[#allocation3 + $0x1b18] sm:$0xff] }
 0x31b   :  { %3167 = vmatpush1.bf16.xpose.msra.mxu0 %v3166_v15  ;;  %v3250_v15 = vpack.c.bf16 %v825_v6, %v823_v5  ;;  %v843_v5 = vld [vmem:[#allocation3 + $0x1900] sm:$0xff]  ;;  %v845_v6 = vld [vmem:[#allocation3 + $0x1910] sm:$0xff] }
 0x31c   :  { %3231 = vmatpush1.bf16.xpose.msra.mxu1 %v3230_v16  ;;  %3169 = vmatprep.subr.bf16.mxu0 %v3168_v17  ;;  %v3314_v16 = vpack.c.bf16 %v889_v8, %v887_v7  ;;  %v3252_v17 = vpack.c.bf16 %v830_v12, %v828_v10  ;;  %v907_v7 = vld [vmem:[#allocation3 + $0x1b00] sm:$0xff]  ;;  %v909_v8 = vld [vmem:[#allocation3 + $0x1b10] sm:$0xff]  ;;  %v848_v10 = vld [vmem:[#allocation3 + $0x1928] sm:$0xff] }
 0x31d   :  { %3233 = vmatprep.subr.bf16.mxu1 %v3232_v18  ;;  %v3316_v18 = vpack.c.bf16 %v894_v14, %v892_v13  ;;  %v850_v12 = vld [vmem:[#allocation3 + $0x1938] sm:$0xff]  ;;  %v912_v13 = vld [vmem:[#allocation3 + $0x1b28] sm:$0xff] }
 0x31e   :  { %v914_v14 = vld [vmem:[#allocation3 + $0x1b38] sm:$0xff] }
 0x323   :  { %3171 = vmatpush1.bf16.xpose.msra.mxu0 %v3170_v29  ;;  %v3254_v29 = vpack.c.bf16 %v829_v22, %v827_v21  ;;  %v847_v21 = vld [vmem:[#allocation3 + $0x1920] sm:$0xff]  ;;  %v849_v22 = vld [vmem:[#allocation3 + $0x1930] sm:$0xff] }
 0x324   :  { %3235 = vmatpush1.bf16.xpose.msra.mxu1 %v3234_v30  ;;  %3237 = vmatprep.subr.bf16.mxu0 %v3236_v31  ;;  %v3318_v30 = vpack.c.bf16 %v893_v24, %v891_v23  ;;  %v3256_v31 = vpack.c.bf16 %v834_v26, %v832_v25  ;;  %v911_v23 = vld [vmem:[#allocation3 + $0x1b20] sm:$0xff]  ;;  %v913_v24 = vld [vmem:[#allocation3 + $0x1b30] sm:$0xff]  ;;  %v852_v25 = vld [vmem:[#allocation3 + $0x1948] sm:$0xff] }
 0x325   :  { %3301 = vmatprep.subr.bf16.mxu1 %v3300_v32  ;;  %v3320_v32 = vpack.c.bf16 %v898_v28, %v896_v27  ;;  %v854_v26 = vld [vmem:[#allocation3 + $0x1958] sm:$0xff]  ;;  %v916_v27 = vld [vmem:[#allocation3 + $0x1b48] sm:$0xff] }
 0x326   :  { %v918_v28 = vld [vmem:[#allocation3 + $0x1b58] sm:$0xff] }
 0x32a   :  { %1855 = vmatmul.mubr.f32.vlgmr.msra.gmra.mrb[10].mxu0 %v3626_v20 }
 0x32b   :  { %1926 = vmatmul.mubr.f32.vlgmr.msra.gmra.mrb[10].mxu1 %v3626_v20  ;;  %3239 = vmatpush1.bf16.xpose.msra.mxu0 %v3238_v42  ;;  %v3258_v42 = vpack.c.bf16 %v833_v34, %v831_v33  ;;  %v851_v33 = vld [vmem:[#allocation3 + $0x1940] sm:$0xff]  ;;  %v853_v34 = vld [vmem:[#allocation3 + $0x1950] sm:$0xff] }
 0x32c   :  { %3303 = vmatpush1.bf16.xpose.msra.mxu1 %v3302_v43  ;;  %3241 = vmatprep.subr.bf16.mxu0 %v3240_v44  ;;  %v3322_v43 = vpack.c.bf16 %v897_v36, %v895_v35  ;;  %v3260_v44 = vpack.c.bf16 %v838_v38, %v836_v37  ;;  %v915_v35 = vld [vmem:[#allocation3 + $0x1b40] sm:$0xff]  ;;  %v917_v36 = vld [vmem:[#allocation3 + $0x1b50] sm:$0xff]  ;;  %v856_v37 = vld [vmem:[#allocation3 + $0x1968] sm:$0xff] }
 0x32d   :  { %3305 = vmatprep.subr.bf16.mxu1 %v3304_v45  ;;  %1996 = vmatprep.mubr.f32.mxu0 %v3624_v19  ;;  %v3324_v45 = vpack.c.bf16 %v902_v40, %v900_v39  ;;  %v858_v38 = vld [vmem:[#allocation3 + $0x1978] sm:$0xff]  ;;  %v920_v39 = vld [vmem:[#allocation3 + $0x1b68] sm:$0xff] }
 0x32e   :  { %2067 = vmatprep.mubr.f32.mxu1 %v3624_v19  ;;  %v922_v40 = vld [vmem:[#allocation3 + $0x1b78] sm:$0xff] }
 0x333   :  { %3243 = vmatpush1.bf16.xpose.msra.mxu0 %v3242_v55  ;;  %v3262_v55 = vpack.c.bf16 %v837_v47, %v835_v46  ;;  %v855_v46 = vld [vmem:[#allocation3 + $0x1960] sm:$0xff]  ;;  %v857_v47 = vld [vmem:[#allocation3 + $0x1970] sm:$0xff] }
 0x334   :  { %3307 = vmatpush1.bf16.xpose.msra.mxu1 %v3306_v56  ;;  %3245 = vmatprep.subr.bf16.mxu0 %v3244_v57  ;;  %v3326_v56 = vpack.c.bf16 %v901_v49, %v899_v48  ;;  %v3264_v57 = vpack.c.bf16 %v842_v51, %v840_v50  ;;  %v919_v48 = vld [vmem:[#allocation3 + $0x1b60] sm:$0xff]  ;;  %v921_v50 = vld [vmem:[#allocation3 + $0x1b70] sm:$0xff]  ;;  %v860_v51 = vld [vmem:[#allocation3 + $0x1988] sm:$0xff] }
 0x335   :  { %3309 = vmatprep.subr.bf16.mxu1 %v3308_v58  ;;  %v3328_v58 = vpack.c.bf16 %v906_v53, %v904_v52  ;;  %v862_v52 = vld [vmem:[#allocation3 + $0x1998] sm:$0xff] }
 0x33b   :  { %3247 = vmatpush1.bf16.xpose.msra.mxu0 %v3246_v2  ;;  %v3266_v2 = vpack.c.bf16 %v841_v60, %v839_v59 }
 0x33c   :  { %3311 = vmatpush1.bf16.xpose.msra.mxu1 %v3310_v11  ;;  %3249 = vmatprep.subr.bf16.mxu0 %v3248_v9  ;;  %v3330_v11 = vpack.c.bf16 %v905_v62, %v903_v61  ;;  %v3268_v9 = vpack.c.bf16 %v846_v1, %v844_v63  ;;  %v3282_v62 = vpack.c.bf16 %v857_v47, %v855_v46  ;;  %v871_v47 = vld [vmem:[#allocation3 + $0x19e0] sm:$0xff] }
 0x33d   :  { %3313 = vmatprep.subr.bf16.mxu1 %v3312_v4  ;;  %v3332_v4 = vpack.c.bf16 %v910_v0, %v908_v3  ;;  %v3346_v1 = vpack.c.bf16 %v921_v50, %v919_v48  ;;  %v3284_v3 = vpack.c.bf16 %v862_v52, %v860_v51  ;;  %v873_v48 = vld [vmem:[#allocation3 + $0x19f0] sm:$0xff]  ;;  %v940_v51 = vld [vmem:[#allocation3 + $0x1c08] sm:$0xff]  ;;  %v942_v52 = vld [vmem:[#allocation3 + $0x1c18] sm:$0xff] }
 0x33e   :  { %v937_v50 = vld [vmem:[#allocation3 + $0x1bf0] sm:$0xff] }
 0x343   :  { %3251 = vmatpush1.bf16.xpose.msra.mxu0 %v3250_v15  ;;  %v3270_v15 = vpack.c.bf16 %v845_v6, %v843_v5  ;;  %v859_v5 = vld [vmem:[#allocation3 + $0x1980] sm:$0xff]  ;;  %v861_v6 = vld [vmem:[#allocation3 + $0x1990] sm:$0xff] }
 0x344   :  { %3315 = vmatpush1.bf16.xpose.msra.mxu1 %v3314_v16  ;;  %3253 = vmatprep.subr.bf16.mxu0 %v3252_v17  ;;  %v3334_v16 = vpack.c.bf16 %v909_v8, %v907_v7  ;;  %v3272_v17 = vpack.c.bf16 %v850_v12, %v848_v10  ;;  %v923_v7 = vld [vmem:[#allocation3 + $0x1b80] sm:$0xff]  ;;  %v925_v8 = vld [vmem:[#allocation3 + $0x1b90] sm:$0xff]  ;;  %v864_v10 = vld [vmem:[#allocation3 + $0x19a8] sm:$0xff] }
 0x345   :  { %3317 = vmatprep.subr.bf16.mxu1 %v3316_v18  ;;  %v3336_v18 = vpack.c.bf16 %v914_v14, %v912_v13  ;;  %v866_v12 = vld [vmem:[#allocation3 + $0x19b8] sm:$0xff]  ;;  %v928_v14 = vld [vmem:[#allocation3 + $0x1ba8] sm:$0xff] }
 0x34b   :  { %3255 = vmatpush1.bf16.xpose.msra.mxu0 %v3254_v29  ;;  %v3274_v29 = vpack.c.bf16 %v849_v22, %v847_v21  ;;  %v863_v22 = vld [vmem:[#allocation3 + $0x19a0] sm:$0xff] }
 0x34c   :  { %3319 = vmatpush1.bf16.xpose.msra.mxu1 %v3318_v30  ;;  %3257 = vmatprep.subr.bf16.mxu0 %v3256_v31  ;;  %v3338_v30 = vpack.c.bf16 %v913_v24, %v911_v23  ;;  %v3276_v31 = vpack.c.bf16 %v854_v26, %v852_v25  ;;  %v865_v23 = vld [vmem:[#allocation3 + $0x19b0] sm:$0xff]  ;;  %v927_v24 = vld [vmem:[#allocation3 + $0x1ba0] sm:$0xff]  ;;  %v868_v26 = vld [vmem:[#allocation3 + $0x19c8] sm:$0xff] }
 0x34d   :  { %3321 = vmatprep.subr.bf16.mxu1 %v3320_v32  ;;  %v3340_v32 = vpack.c.bf16 %v918_v28, %v916_v27  ;;  %v929_v25 = vld [vmem:[#allocation3 + $0x1bb0] sm:$0xff]  ;;  %v870_v27 = vld [vmem:[#allocation3 + $0x19d8] sm:$0xff]  ;;  %v932_v28 = vld [vmem:[#allocation3 + $0x1bc8] sm:$0xff] }
 0x353   :  { %3259 = vmatpush1.bf16.xpose.msra.mxu0 %v3258_v42  ;;  %v3278_v42 = vpack.c.bf16 %v853_v34, %v851_v33  ;;  %v867_v34 = vld [vmem:[#allocation3 + $0x19c0] sm:$0xff] }
 0x354   :  { %3323 = vmatpush1.bf16.xpose.msra.mxu1 %v3322_v43  ;;  %3261 = vmatprep.subr.bf16.mxu0 %v3260_v44  ;;  %v3342_v43 = vpack.c.bf16 %v917_v36, %v915_v35  ;;  %v3280_v44 = vpack.c.bf16 %v858_v38, %v856_v37  ;;  %v869_v35 = vld [vmem:[#allocation3 + $0x19d0] sm:$0xff]  ;;  %v931_v36 = vld [vmem:[#allocation3 + $0x1bc0] sm:$0xff]  ;;  %v872_v38 = vld [vmem:[#allocation3 + $0x19e8] sm:$0xff] }
 0x355   :  { %3325 = vmatprep.subr.bf16.mxu1 %v3324_v45  ;;  %v3344_v45 = vpack.c.bf16 %v922_v40, %v920_v39  ;;  %v933_v37 = vld [vmem:[#allocation3 + $0x1bd0] sm:$0xff]  ;;  %v874_v39 = vld [vmem:[#allocation3 + $0x19f8] sm:$0xff]  ;;  %v936_v40 = vld [vmem:[#allocation3 + $0x1be8] sm:$0xff] }
 0x35b   :  { %3263 = vmatpush1.bf16.xpose.msra.mxu0 %v3262_v55 }
 0x35c   :  { %3327 = vmatpush1.bf16.xpose.msra.mxu1 %v3326_v56  ;;  %3265 = vmatprep.subr.bf16.mxu0 %v3264_v57  ;;  %v924_v57 = vld [vmem:[#allocation3 + $0x1b88] sm:$0xff] }
 0x35d   :  { %3329 = vmatprep.subr.bf16.mxu1 %v3328_v58  ;;  %v926_v58 = vld [vmem:[#allocation3 + $0x1b98] sm:$0xff] }
 0x363   :  { %3267 = vmatpush1.bf16.xpose.msra.mxu0 %v3266_v2  ;;  %v3348_v2 = vpack.c.bf16 %v926_v58, %v924_v57  ;;  %v3364_v58 = vpack.c.bf16 %v942_v52, %v940_v51  ;;  %v1019_v51 = vld [vmem:[#allocation3 + $0x1e80] sm:$0xff]  ;;  %v1021_v52 = vld [vmem:[#allocation3 + $0x1e90] sm:$0xff] }
 0x364   :  { %3331 = vmatpush1.bf16.xpose.msra.mxu1 %v3330_v11  ;;  %3269 = vmatprep.subr.bf16.mxu0 %v3268_v9 }
 0x365   :  { %3333 = vmatprep.subr.bf16.mxu1 %v3332_v4 }
 0x36b   :  { %3271 = vmatpush1.bf16.xpose.msra.mxu0 %v3270_v15  ;;  %v930_v15 = vld [vmem:[#allocation3 + $0x1bb8] sm:$0xff] }
 0x36c   :  { %3335 = vmatpush1.bf16.xpose.msra.mxu1 %v3334_v16  ;;  %3273 = vmatprep.subr.bf16.mxu0 %v3272_v17  ;;  %v3286_v16 = vpack.c.bf16 %v861_v6, %v859_v5  ;;  %v3350_v17 = vpack.c.bf16 %v925_v8, %v923_v7  ;;  %v3352_v21 = vpack.c.bf16 %v930_v15, %v928_v14  ;;  %v943_v8 = vld [vmem:[#allocation3 + $0x1c20] sm:$0xff]  ;;  %v1009_v14 = vld [vmem:[#allocation3 + $0x1e30] sm:$0xff]  ;;  %v948_v15 = vld [vmem:[#allocation3 + $0x1c48] sm:$0xff] }
 0x36d   :  { %3337 = vmatprep.subr.bf16.mxu1 %v3336_v18  ;;  %v3288_v18 = vpack.c.bf16 %v866_v12, %v864_v10  ;;  %v945_v10 = vld [vmem:[#allocation3 + $0x1c30] sm:$0xff]  ;;  %v1007_v12 = vld [vmem:[#allocation3 + $0x1e20] sm:$0xff] }
 0x373   :  { %3275 = vmatpush1.bf16.xpose.msra.mxu0 %v3274_v29  ;;  %v934_v29 = vld [vmem:[#allocation3 + $0x1bd8] sm:$0xff] }
 0x374   :  { %3339 = vmatpush1.bf16.xpose.msra.mxu1 %v3338_v30  ;;  %3277 = vmatprep.subr.bf16.mxu0 %v3276_v31  ;;  %v3290_v30 = vpack.c.bf16 %v865_v23, %v863_v22  ;;  %v3354_v31 = vpack.c.bf16 %v929_v25, %v927_v24  ;;  %v3356_v33 = vpack.c.bf16 %v934_v29, %v932_v28  ;;  %v947_v25 = vld [vmem:[#allocation3 + $0x1c40] sm:$0xff]  ;;  %v1013_v28 = vld [vmem:[#allocation3 + $0x1e50] sm:$0xff]  ;;  %v952_v29 = vld [vmem:[#allocation3 + $0x1c68] sm:$0xff] }
 0x375   :  { %3341 = vmatprep.subr.bf16.mxu1 %v3340_v32  ;;  %v3292_v32 = vpack.c.bf16 %v870_v27, %v868_v26  ;;  %v3434_v22 = vpack.c.bf16 %v1009_v14, %v1007_v12  ;;  %v949_v26 = vld [vmem:[#allocation3 + $0x1c50] sm:$0xff]  ;;  %v1011_v27 = vld [vmem:[#allocation3 + $0x1e40] sm:$0xff] }
 0x376   :  { %v963_v12 = vld [vmem:[#allocation3 + $0x1cc0] sm:$0xff]  ;;  %v965_v14 = vld [vmem:[#allocation3 + $0x1cd0] sm:$0xff] }
 0x37b   :  { %3279 = vmatpush1.bf16.xpose.msra.mxu0 %v3278_v42  ;;  %v938_v42 = vld [vmem:[#allocation3 + $0x1bf8] sm:$0xff] }
 0x37c   :  { %3343 = vmatpush1.bf16.xpose.msra.mxu1 %v3342_v43  ;;  %3281 = vmatprep.subr.bf16.mxu0 %v3280_v44  ;;  %v3294_v43 = vpack.c.bf16 %v869_v35, %v867_v34  ;;  %v3358_v44 = vpack.c.bf16 %v933_v37, %v931_v36  ;;  %v3360_v46 = vpack.c.bf16 %v938_v42, %v936_v40  ;;  %v951_v36 = vld [vmem:[#allocation3 + $0x1c60] sm:$0xff]  ;;  %v953_v37 = vld [vmem:[#allocation3 + $0x1c70] sm:$0xff]  ;;  %v956_v40 = vld [vmem:[#allocation3 + $0x1c88] sm:$0xff] }
 0x37d   :  { %v1714_v49 = vpop.f32.mrb[8].mxu0  ;;  %3345 = vmatprep.subr.bf16.mxu1 %v3344_v45  ;;  %v3296_v45 = vpack.c.bf16 %v874_v39, %v872_v38  ;;  %v3438_v34 = vpack.c.bf16 %v1013_v28, %v1011_v27  ;;  %v1015_v38 = vld [vmem:[#allocation3 + $0x1e60] sm:$0xff]  ;;  %v1017_v39 = vld [vmem:[#allocation3 + $0x1e70] sm:$0xff]  ;;  %v958_v42 = vld [vmem:[#allocation3 + $0x1c98] sm:$0xff] }
 0x37e   :  { %v1715_v53 = vadd.f32 %v1714_v49, %v3641_v41  ;;  %v1785_v55 = vpop.f32.mrb[8].mxu1  ;;  %v1716_v56 = vpop.f32.mrb[9].mxu0  ;;  %v935_v49 = vld [vmem:[#allocation3 + $0x1be0] sm:$0xff]  ;;  %v969_v28 = vld [vmem:[#allocation3 + $0x1cf0] sm:$0xff] }
 0x37f   :  { %v1786_v59 = vadd.f32 %v1785_v55, %v3641_v41  ;;  %v1717_v60 = vadd.f32 %v1716_v56, %v3641_v41  ;;  %v1787_v61 = vpop.f32.mrb[9].mxu1  ;;  %v1006_v55 = vld [vmem:[#allocation3 + $0x1e18] sm:$0xff]  ;;  %v3298_v56 = vpack.c.bf16 %v873_v48, %v871_v47  ;;  %v3362_v57 = vpack.c.bf16 %v937_v50, %v935_v49  ;;  %v955_v49 = vld [vmem:[#allocation3 + $0x1c80] sm:$0xff]  ;;  %v957_v50 = vld [vmem:[#allocation3 + $0x1c90] sm:$0xff] }
 0x380   :  { %v1788_v63 = vadd.f32 %v1787_v61, %v3641_v41  ;;  %v941_v61 = vld [vmem:[#allocation3 + $0x1c10] sm:$0xff]  ;;  %v3380_v47 = vpack.c.bf16 %v958_v42, %v956_v40  ;;  %v967_v27 = vld [vmem:[#allocation3 + $0x1ce0] sm:$0xff] }
 0x381   :  { %v2346_v0 = vcombine.low %v1715_v53, %v1717_v60  ;;  %v1004_v53 = vld [vmem:[#allocation3 + $0x1e08] sm:$0xff]  ;;  %v939_v60 = vld [vmem:[#allocation3 + $0x1c00] sm:$0xff]  ;;  %v1037_v42 = vld [vmem:[#allocation3 + $0x1f10] sm:$0xff] }
 0x382   :  { %v2347_v11 = vcombine.low %v1786_v59, %v1788_v63  ;;  %v3428_v59 = vpack.c.bf16 %v1006_v55, %v1004_v53  ;;  %v1005_v63 = vld [vmem:[#allocation3 + $0x1e10] sm:$0xff]  ;;  %v960_v53 = vld [vmem:[#allocation3 + $0x1ca8] sm:$0xff]  ;;  %v962_v55 = vld [vmem:[#allocation3 + $0x1cb8] sm:$0xff] }
 0x383   :  { %v3713_v9 = vrot.slane %v2346_v0, %v3645_v54  ;;  %3283 = vmatpush1.bf16.xpose.msra.mxu0 %v3282_v62  ;;  %v1003_v62 = vld [vmem:[#allocation3 + $0x1e00] sm:$0xff]  ;;  %v1008_v0 = vld [vmem:[#allocation3 + $0x1e28] sm:$0xff] }
 0x384   :  { %v3716_v4 = vrot.slane %v2347_v11, %v3645_v54  ;;  %3347 = vmatpush1.bf16.xpose.msra.mxu1 %v3346_v1  ;;  %3285 = vmatprep.subr.bf16.mxu0 %v3284_v3  ;;  %v944_v1 = vld [vmem:[#allocation3 + $0x1c28] sm:$0xff]  ;;  %v946_v3 = vld [vmem:[#allocation3 + $0x1c38] sm:$0xff]  ;;  %v3366_v11 = vpack.c.bf16 %v941_v61, %v939_v60  ;;  %v3430_v5 = vpack.c.bf16 %v1005_v63, %v1003_v62  ;;  %v959_v62 = vld [vmem:[#allocation3 + $0x1ca0] sm:$0xff] }
 0x385   :  { %3349 = vmatprep.subr.bf16.mxu1 %v3348_v2  ;;  %v1010_v2 = vld [vmem:[#allocation3 + $0x1e38] sm:$0xff]  ;;  %v3368_v6 = vpack.c.bf16 %v946_v3, %v944_v1  ;;  %v3384_v60 = vpack.c.bf16 %v962_v55, %v960_v53  ;;  %v961_v63 = vld [vmem:[#allocation3 + $0x1cb0] sm:$0xff]  ;;  %v1023_v1 = vld [vmem:[#allocation3 + $0x1ea0] sm:$0xff] }
 0x386   :  { %v2378_v13 = vcombine.low %v3713_v9, %v3716_v4  ;;  %v3432_v7 = vpack.c.bf16 %v1010_v2, %v1008_v0  ;;  %v1025_v3 = vld [vmem:[#allocation3 + $0x1eb0] sm:$0xff]  ;;  %v964_v0 = vld [vmem:[#allocation3 + $0x1cc8] sm:$0xff]  ;;  %v966_v2 = vld [vmem:[#allocation3 + $0x1cd8] sm:$0xff] }
 0x387   :  { %v1035_v40 = vld [vmem:[#allocation3 + $0x1f00] sm:$0xff]  ;;  %v1041_v55 = vld [vmem:[#allocation3 + $0x1f30] sm:$0xff]  ;;  %v1062_v9 = vld [vmem:[#allocation3 + $0x1fd8] sm:$0xff] }
 0x388   :  { %v1039_v53 = vld [vmem:[#allocation3 + $0x1f20] sm:$0xff] }
 0x38b   :  { %3287 = vmatpush1.bf16.xpose.msra.mxu0 %v3286_v16  ;;  %v950_v16 = vld [vmem:[#allocation3 + $0x1c58] sm:$0xff] }
 0x38c   :  { %3351 = vmatpush1.bf16.xpose.msra.mxu1 %v3350_v17  ;;  %3289 = vmatprep.subr.bf16.mxu0 %v3288_v18  ;;  %v1012_v17 = vld [vmem:[#allocation3 + $0x1e48] sm:$0xff]  ;;  %v1014_v18 = vld [vmem:[#allocation3 + $0x1e58] sm:$0xff]  ;;  %v3372_v23 = vpack.c.bf16 %v950_v16, %v948_v15  ;;  %v1027_v15 = vld [vmem:[#allocation3 + $0x1ec0] sm:$0xff] }
 0x38d   :  { %3353 = vmatprep.subr.bf16.mxu1 %v3352_v21  ;;  %v3370_v21 = vpack.c.bf16 %v945_v10, %v943_v8  ;;  %v3436_v24 = vpack.c.bf16 %v1014_v18, %v1012_v17  ;;  %v3388_v8 = vpack.c.bf16 %v966_v2, %v964_v0  ;;  %v1029_v16 = vld [vmem:[#allocation3 + $0x1ed0] sm:$0xff]  ;;  %v968_v17 = vld [vmem:[#allocation3 + $0x1ce8] sm:$0xff]  ;;  %v970_v18 = vld [vmem:[#allocation3 + $0x1cf8] sm:$0xff] }
 0x38e   :  { %v1043_v0 = vld [vmem:[#allocation3 + $0x1f40] sm:$0xff]  ;;  %v1045_v2 = vld [vmem:[#allocation3 + $0x1f50] sm:$0xff] }
 0x393   :  { %3291 = vmatpush1.bf16.xpose.msra.mxu0 %v3290_v30  ;;  %v954_v30 = vld [vmem:[#allocation3 + $0x1c78] sm:$0xff] }
 0x394   :  { %3355 = vmatpush1.bf16.xpose.msra.mxu1 %v3354_v31  ;;  %3293 = vmatprep.subr.bf16.mxu0 %v3292_v32  ;;  %v1016_v31 = vld [vmem:[#allocation3 + $0x1e68] sm:$0xff]  ;;  %v1018_v32 = vld [vmem:[#allocation3 + $0x1e78] sm:$0xff]  ;;  %v3376_v35 = vpack.c.bf16 %v954_v30, %v952_v29  ;;  %v1031_v29 = vld [vmem:[#allocation3 + $0x1ee0] sm:$0xff] }
 0x395   :  { %3357 = vmatprep.subr.bf16.mxu1 %v3356_v33  ;;  %v3374_v33 = vpack.c.bf16 %v949_v26, %v947_v25  ;;  %v3392_v25 = vpack.c.bf16 %v970_v18, %v968_v17  ;;  %v1033_v30 = vld [vmem:[#allocation3 + $0x1ef0] sm:$0xff]  ;;  %v1047_v17 = vld [vmem:[#allocation3 + $0x1f60] sm:$0xff] }
 0x39b   :  { %3295 = vmatpush1.bf16.xpose.msra.mxu0 %v3294_v43  ;;  %v1020_v43 = vld [vmem:[#allocation3 + $0x1e88] sm:$0xff] }
 0x39c   :  { %3359 = vmatpush1.bf16.xpose.msra.mxu1 %v3358_v44  ;;  %3297 = vmatprep.subr.bf16.mxu0 %v3296_v45  ;;  %v1022_v44 = vld [vmem:[#allocation3 + $0x1e98] sm:$0xff]  ;;  %v3378_v45 = vpack.c.bf16 %v953_v37, %v951_v36 }
 0x39d   :  { %3361 = vmatprep.subr.bf16.mxu1 %v3360_v46  ;;  %v3442_v46 = vpack.c.bf16 %v1017_v39, %v1015_v38  ;;  %v3444_v48 = vpack.c.bf16 %v1022_v44, %v1020_v43  ;;  %v971_v38 = vld [vmem:[#allocation3 + $0x1d00] sm:$0xff]  ;;  %v973_v39 = vld [vmem:[#allocation3 + $0x1d10] sm:$0xff]  ;;  %v976_v43 = vld [vmem:[#allocation3 + $0x1d28] sm:$0xff] }
 0x39e   :  { %v978_v44 = vld [vmem:[#allocation3 + $0x1d38] sm:$0xff] }
 0x3a3   :  { %3299 = vmatpush1.bf16.xpose.msra.mxu0 %v3298_v56  ;;  %v1024_v56 = vld [vmem:[#allocation3 + $0x1ea8] sm:$0xff] }
 0x3a4   :  { %3363 = vmatpush1.bf16.xpose.msra.mxu1 %v3362_v57  ;;  %3365 = vmatprep.subr.bf16.mxu0 %v3364_v58  ;;  %v1026_v57 = vld [vmem:[#allocation3 + $0x1eb8] sm:$0xff]  ;;  %v3382_v58 = vpack.c.bf16 %v957_v50, %v955_v49  ;;  %v3400_v49 = vpack.c.bf16 %v978_v44, %v976_v43  ;;  %v1051_v43 = vld [vmem:[#allocation3 + $0x1f80] sm:$0xff]  ;;  %v1053_v44 = vld [vmem:[#allocation3 + $0x1f90] sm:$0xff] }
 0x3a5   :  { %3429 = vmatprep.subr.bf16.mxu1 %v3428_v59  ;;  %v3446_v59 = vpack.c.bf16 %v1021_v52, %v1019_v51  ;;  %v3448_v61 = vpack.c.bf16 %v1026_v57, %v1024_v56  ;;  %v975_v51 = vld [vmem:[#allocation3 + $0x1d20] sm:$0xff]  ;;  %v977_v52 = vld [vmem:[#allocation3 + $0x1d30] sm:$0xff]  ;;  %v980_v56 = vld [vmem:[#allocation3 + $0x1d48] sm:$0xff] }
 0x3a6   :  { %v982_v57 = vld [vmem:[#allocation3 + $0x1d58] sm:$0xff] }
 0x3aa   :  { %1997 = vmatmul.mubr.f32.vlgmr.msra.gmra.mrb[12].mxu0 %v3626_v20 }
 0x3ab   :  { %2068 = vmatmul.mubr.f32.vlgmr.msra.gmra.mrb[12].mxu1 %v3626_v20  ;;  %3367 = vmatpush1.bf16.xpose.msra.mxu0 %v3366_v11  ;;  %v1028_v11 = vld [vmem:[#allocation3 + $0x1ec8] sm:$0xff] }
 0x3ac   :  { %3431 = vmatpush1.bf16.xpose.msra.mxu1 %v3430_v5  ;;  %3369 = vmatprep.subr.bf16.mxu0 %v3368_v6  ;;  %v1030_v5 = vld [vmem:[#allocation3 + $0x1ed8] sm:$0xff]  ;;  %v3386_v6 = vpack.c.bf16 %v961_v63, %v959_v62  ;;  %v3404_v62 = vpack.c.bf16 %v982_v57, %v980_v56 }
 0x3ad   :  { %3433 = vmatprep.subr.bf16.mxu1 %v3432_v7  ;;  %2138 = vmatprep.mubr.f32.mxu0 %v3624_v19  ;;  %v3450_v7 = vpack.c.bf16 %v1025_v3, %v1023_v1  ;;  %v3452_v10 = vpack.c.bf16 %v1030_v5, %v1028_v11  ;;  %v979_v1 = vld [vmem:[#allocation3 + $0x1d40] sm:$0xff]  ;;  %v981_v3 = vld [vmem:[#allocation3 + $0x1d50] sm:$0xff]  ;;  %v984_v11 = vld [vmem:[#allocation3 + $0x1d68] sm:$0xff] }
 0x3ae   :  { %2209 = vmatprep.mubr.f32.mxu1 %v3624_v19  ;;  %v3440_v19 = vpack.c.bf16 %v1018_v32, %v1016_v31  ;;  %v972_v31 = vld [vmem:[#allocation3 + $0x1d08] sm:$0xff]  ;;  %v974_v32 = vld [vmem:[#allocation3 + $0x1d18] sm:$0xff] }
 0x3af   :  { %v3396_v36 = vpack.c.bf16 %v974_v32, %v972_v31  ;;  %v986_v5 = vld [vmem:[#allocation3 + $0x1d78] sm:$0xff] }
 0x3b3   :  { %3371 = vmatpush1.bf16.xpose.msra.mxu0 %v3370_v21  ;;  %v1032_v21 = vld [vmem:[#allocation3 + $0x1ee8] sm:$0xff] }
 0x3b4   :  { %3435 = vmatpush1.bf16.xpose.msra.mxu1 %v3434_v22  ;;  %3373 = vmatprep.subr.bf16.mxu0 %v3372_v23  ;;  %v1034_v22 = vld [vmem:[#allocation3 + $0x1ef8] sm:$0xff]  ;;  %v3390_v23 = vpack.c.bf16 %v965_v14, %v963_v12  ;;  %v3408_v12 = vpack.c.bf16 %v986_v5, %v984_v11  ;;  %v997_v11 = vld [vmem:[#allocation3 + $0x1dd0] sm:$0xff]  ;;  %v1059_v5 = vld [vmem:[#allocation3 + $0x1fc0] sm:$0xff] }
 0x3b5   :  { %3437 = vmatprep.subr.bf16.mxu1 %v3436_v24  ;;  %v3454_v24 = vpack.c.bf16 %v1029_v16, %v1027_v15  ;;  %v3456_v26 = vpack.c.bf16 %v1034_v22, %v1032_v21  ;;  %v983_v15 = vld [vmem:[#allocation3 + $0x1d60] sm:$0xff]  ;;  %v985_v16 = vld [vmem:[#allocation3 + $0x1d70] sm:$0xff]  ;;  %v988_v22 = vld [vmem:[#allocation3 + $0x1d88] sm:$0xff] }
 0x3b6   :  { %v1049_v21 = vld [vmem:[#allocation3 + $0x1f70] sm:$0xff]  ;;  %v3410_v32 = vpack.c.bf16 %v985_v16, %v983_v15 }
 0x3bb   :  { %3375 = vmatpush1.bf16.xpose.msra.mxu0 %v3374_v33  ;;  %v1036_v33 = vld [vmem:[#allocation3 + $0x1f08] sm:$0xff] }
 0x3bc   :  { %3439 = vmatpush1.bf16.xpose.msra.mxu1 %v3438_v34  ;;  %3377 = vmatprep.subr.bf16.mxu0 %v3376_v35  ;;  %v1038_v34 = vld [vmem:[#allocation3 + $0x1f18] sm:$0xff]  ;;  %v3394_v35 = vpack.c.bf16 %v969_v28, %v967_v27  ;;  %v1052_v27 = vld [vmem:[#allocation3 + $0x1f88] sm:$0xff] }
 0x3bd   :  { %3441 = vmatprep.subr.bf16.mxu1 %v3440_v19  ;;  %v3458_v19 = vpack.c.bf16 %v1033_v30, %v1031_v29  ;;  %v3460_v37 = vpack.c.bf16 %v1038_v34, %v1036_v33  ;;  %v1054_v28 = vld [vmem:[#allocation3 + $0x1f98] sm:$0xff]  ;;  %v3474_v34 = vpack.c.bf16 %v1049_v21, %v1047_v17  ;;  %v1001_v21 = vld [vmem:[#allocation3 + $0x1df0] sm:$0xff] }
 0x3c3   :  { %3379 = vmatpush1.bf16.xpose.msra.mxu0 %v3378_v45  ;;  %v1040_v45 = vld [vmem:[#allocation3 + $0x1f28] sm:$0xff] }
 0x3c4   :  { %3443 = vmatpush1.bf16.xpose.msra.mxu1 %v3442_v46  ;;  %3381 = vmatprep.subr.bf16.mxu0 %v3380_v47  ;;  %v1042_v46 = vld [vmem:[#allocation3 + $0x1f38] sm:$0xff]  ;;  %v3398_v47 = vpack.c.bf16 %v973_v39, %v971_v38 }
 0x3c5   :  { %3445 = vmatprep.subr.bf16.mxu1 %v3444_v48  ;;  %v3462_v48 = vpack.c.bf16 %v1037_v42, %v1035_v40  ;;  %v3464_v50 = vpack.c.bf16 %v1042_v46, %v1040_v45  ;;  %v987_v40 = vld [vmem:[#allocation3 + $0x1d80] sm:$0xff]  ;;  %v989_v42 = vld [vmem:[#allocation3 + $0x1d90] sm:$0xff]  ;;  %v992_v45 = vld [vmem:[#allocation3 + $0x1da8] sm:$0xff] }
 0x3c6   :  { %v994_v46 = vld [vmem:[#allocation3 + $0x1db8] sm:$0xff] }
 0x3cb   :  { %3383 = vmatpush1.bf16.xpose.msra.mxu0 %v3382_v58  ;;  %v1044_v58 = vld [vmem:[#allocation3 + $0x1f48] sm:$0xff] }
 0x3cc   :  { %3447 = vmatpush1.bf16.xpose.msra.mxu1 %v3446_v59  ;;  %3385 = vmatprep.subr.bf16.mxu0 %v3384_v60  ;;  %v1046_v59 = vld [vmem:[#allocation3 + $0x1f58] sm:$0xff]  ;;  %v3402_v60 = vpack.c.bf16 %v977_v52, %v975_v51  ;;  %v2386_v51 = vrot.slane %v2378_v13, %v3645_v54 }
 0x3cd   :  { %3449 = vmatprep.subr.bf16.mxu1 %v3448_v61  ;;  %v3466_v61 = vpack.c.bf16 %v1041_v55, %v1039_v53  ;;  %v3468_v63 = vpack.c.bf16 %v1046_v59, %v1044_v58  ;;  %v3478_v53 = vpack.c.bf16 %v1053_v44, %v1051_v43  ;;  %v3416_v55 = vpack.c.bf16 %v994_v46, %v992_v45  ;;  %v991_v58 = vld [vmem:[#allocation3 + $0x1da0] sm:$0xff]  ;;  %v993_v59 = vld [vmem:[#allocation3 + $0x1db0] sm:$0xff] }
 0x3ce   :  { %v3418_v4 = vpack.c.bf16 %v993_v59, %v991_v58 }
 0x3d3   :  { %3387 = vmatpush1.bf16.xpose.msra.mxu0 %v3386_v6  ;;  %v1048_v6 = vld [vmem:[#allocation3 + $0x1f68] sm:$0xff] }
 0x3d4   :  { %3451 = vmatpush1.bf16.xpose.msra.mxu1 %v3450_v7  ;;  %3389 = vmatprep.subr.bf16.mxu0 %v3388_v8  ;;  %v1050_v7 = vld [vmem:[#allocation3 + $0x1f78] sm:$0xff]  ;;  %v3406_v8 = vpack.c.bf16 %v981_v3, %v979_v1  ;;  %v1060_v1 = vld [vmem:[#allocation3 + $0x1fc8] sm:$0xff] }
 0x3d5   :  { %3453 = vmatprep.subr.bf16.mxu1 %v3452_v10  ;;  %v3470_v10 = vpack.c.bf16 %v1045_v2, %v1043_v0  ;;  %v3472_v14 = vpack.c.bf16 %v1050_v7, %v1048_v6  ;;  %v3484_v0 = vpack.c.bf16 %v1062_v9, %v1060_v1  ;;  %v995_v2 = vld [vmem:[#allocation3 + $0x1dc0] sm:$0xff]  ;;  %v1061_v6 = vld [vmem:[#allocation3 + $0x1fd0] sm:$0xff]  ;;  %v1000_v7 = vld [vmem:[#allocation3 + $0x1de8] sm:$0xff] }
 0x3d6   :  { %v3486_v15 = vpack.c.bf16 %v1061_v6, %v1059_v5 }
 0x3db   :  { %3391 = vmatpush1.bf16.xpose.msra.mxu0 %v3390_v23  ;;  %v990_v23 = vld [vmem:[#allocation3 + $0x1d98] sm:$0xff] }
 0x3dc   :  { %3455 = vmatpush1.bf16.xpose.msra.mxu1 %v3454_v24  ;;  %3393 = vmatprep.subr.bf16.mxu0 %v3392_v25 }
 0x3dd   :  { %3457 = vmatprep.subr.bf16.mxu1 %v3456_v26 }
 0x3e3   :  { %3395 = vmatpush1.bf16.xpose.msra.mxu0 %v3394_v35  ;;  %v3412_v35 = vpack.c.bf16 %v990_v23, %v988_v22  ;;  %v1063_v22 = vld [vmem:[#allocation3 + $0x1fe0] sm:$0xff]  ;;  %v1065_v23 = vld [vmem:[#allocation3 + $0x1ff0] sm:$0xff] }
 0x3e4   :  { %3459 = vmatpush1.bf16.xpose.msra.mxu1 %v3458_v19  ;;  %3397 = vmatprep.subr.bf16.mxu0 %v3396_v36  ;;  %v3476_v36 = vpack.c.bf16 %v1054_v28, %v1052_v27 }
 0x3e5   :  { %3461 = vmatprep.subr.bf16.mxu1 %v3460_v37 }
 0x3eb   :  { %3399 = vmatpush1.bf16.xpose.msra.mxu0 %v3398_v47 }
 0x3ec   :  { %3463 = vmatpush1.bf16.xpose.msra.mxu1 %v3462_v48  ;;  %3401 = vmatprep.subr.bf16.mxu0 %v3400_v49  ;;  %v1056_v48 = vld [vmem:[#allocation3 + $0x1fa8] sm:$0xff]  ;;  %v1058_v49 = vld [vmem:[#allocation3 + $0x1fb8] sm:$0xff] }
 0x3ed   :  { %3465 = vmatprep.subr.bf16.mxu1 %v3464_v50  ;;  %v3414_v50 = vpack.c.bf16 %v989_v42, %v987_v40  ;;  %v3480_v56 = vpack.c.bf16 %v1058_v49, %v1056_v48 }
 0x3f3   :  { %3403 = vmatpush1.bf16.xpose.msra.mxu0 %v3402_v60  ;;  %v1055_v60 = vld [vmem:[#allocation3 + $0x1fa0] sm:$0xff] }
 0x3f4   :  { %3467 = vmatpush1.bf16.xpose.msra.mxu1 %v3466_v61  ;;  %3405 = vmatprep.subr.bf16.mxu0 %v3404_v62  ;;  %v1057_v61 = vld [vmem:[#allocation3 + $0x1fb0] sm:$0xff]  ;;  %v996_v62 = vld [vmem:[#allocation3 + $0x1dc8] sm:$0xff] }
 0x3f5   :  { %3469 = vmatprep.subr.bf16.mxu1 %v3468_v63  ;;  %v998_v63 = vld [vmem:[#allocation3 + $0x1dd8] sm:$0xff]  ;;  %v3482_v13 = vpack.c.bf16 %v1057_v61, %v1055_v60 }
 0x3f6   :  { %v3420_v3 = vpack.c.bf16 %v998_v63, %v996_v62 }
 0x3fb   :  { %3407 = vmatpush1.bf16.xpose.msra.mxu0 %v3406_v8  ;;  %v1002_v8 = vld [vmem:[#allocation3 + $0x1df8] sm:$0xff] }
 0x3fc   :  { %3471 = vmatpush1.bf16.xpose.msra.mxu1 %v3470_v10  ;;  %3409 = vmatprep.subr.bf16.mxu0 %v3408_v12  ;;  %v1064_v10 = vld [vmem:[#allocation3 + $0x1fe8] sm:$0xff]  ;;  %v1066_v12 = vld [vmem:[#allocation3 + $0x1ff8] sm:$0xff]  ;;  %v3424_v16 = vpack.c.bf16 %v1002_v8, %v1000_v7 }
 0x3fd   :  { %v1856_v18 = vpop.f32.mrb[10].mxu0  ;;  %3473 = vmatprep.subr.bf16.mxu1 %v3472_v14  ;;  %v3422_v14 = vpack.c.bf16 %v997_v11, %v995_v2  ;;  %v3488_v17 = vpack.c.bf16 %v1066_v12, %v1064_v10 }
 0x3fe   :  { %v1857_v24 = vadd.f32 %v1856_v18, %v3641_v41  ;;  %v1927_v25 = vpop.f32.mrb[10].mxu1  ;;  %v1858_v26 = vpop.f32.mrb[11].mxu0  ;;  %v999_v18 = vld [vmem:[#allocation3 + $0x1de0] sm:$0xff] }
 0x3ff   :  { %v1928_v29 = vadd.f32 %v1927_v25, %v3641_v41  ;;  %v1859_v30 = vadd.f32 %v1858_v26, %v3641_v41  ;;  %v1929_v31 = vpop.f32.mrb[11].mxu1  ;;  %v3490_v25 = vpack.c.bf16 %v1065_v23, %v1063_v22 }
 0x400   :  { %v1930_v33 = vadd.f32 %v1929_v31, %v3641_v41 }
 0x401   :  { %v2348_v19 = vcombine.low %v1857_v24, %v1859_v30  ;;  %v3426_v24 = vpack.c.bf16 %v1001_v21, %v999_v18 }
 0x402   :  { %v2349_v37 = vcombine.low %v1928_v29, %v1930_v33 }
 0x403   :  { %v2370_v38 = vrot.slane %v2348_v19, %v3645_v54  ;;  %3411 = vmatpush1.bf16.xpose.msra.mxu0 %v3410_v32 }
 0x404   :  { %v2377_v39 = vrot.slane %v2349_v37, %v3645_v54  ;;  %3475 = vmatpush1.bf16.xpose.msra.mxu1 %v3474_v34  ;;  %3413 = vmatprep.subr.bf16.mxu0 %v3412_v35 }
 0x405   :  { %3477 = vmatprep.subr.bf16.mxu1 %v3476_v36 }
 0x406   :  { %v2379_v47 = vcombine.low %v2370_v38, %v2377_v39 }
 0x408   :  { %v2393_v52 = vrot.slane %v2379_v47, %v3645_v54 }
 0x40a   :  { %v2394_v57 = vcombine.low %v2386_v51, %v2393_v52 }
 0x40b   :  { %3415 = vmatpush1.bf16.xpose.msra.mxu0 %v3414_v50 }
 0x40c   :  { %3479 = vmatpush1.bf16.xpose.msra.mxu1 %v3478_v53  ;;  %3417 = vmatprep.subr.bf16.mxu0 %v3416_v55  ;;  %2450 = vst [vmem:[#allocation8 + $0x10] sm:$0xff] %v2394_v57 }
 0x40d   :  { %3481 = vmatprep.subr.bf16.mxu1 %v3480_v56 }
 0x413   :  { %3419 = vmatpush1.bf16.xpose.msra.mxu0 %v3418_v4 }
 0x414   :  { %3483 = vmatpush1.bf16.xpose.msra.mxu1 %v3482_v13  ;;  %3421 = vmatprep.subr.bf16.mxu0 %v3420_v3 }
 0x415   :  { %3485 = vmatprep.subr.bf16.mxu1 %v3484_v0 }
 0x41b   :  { %3423 = vmatpush1.bf16.xpose.msra.mxu0 %v3422_v14 }
 0x41c   :  { %3487 = vmatpush1.bf16.xpose.msra.mxu1 %v3486_v15  ;;  %3425 = vmatprep.subr.bf16.mxu0 %v3424_v16 }
 0x41d   :  { %3489 = vmatprep.subr.bf16.mxu1 %v3488_v17 }
 0x423   :  { %3427 = vmatpush1.bf16.xpose.msra.mxu0 %v3426_v24 }
 0x424   :  { %3491 = vmatpush1.bf16.xpose.msra.mxu1 %v3490_v25 }
 0x42a   :  { %2139 = vmatmul.mubr.f32.vlgmr.msra.gmra.mrb[14].mxu0 %v3626_v20 }
 0x42b   :  { %2210 = vmatmul.mubr.f32.vlgmr.msra.gmra.mrb[14].mxu1 %v3626_v20 }
 0x47d   :  { %v1998_v26 = vpop.f32.mrb[12].mxu0 }
 0x47e   :  { %v1999_v27 = vadd.f32 %v1998_v26, %v3641_v41  ;;  %v2069_v28 = vpop.f32.mrb[12].mxu1  ;;  %v2000_v29 = vpop.f32.mrb[13].mxu0 }
 0x47f   :  { %v2070_v30 = vadd.f32 %v2069_v28, %v3641_v41  ;;  %v2001_v31 = vadd.f32 %v2000_v29, %v3641_v41  ;;  %v2071_v32 = vpop.f32.mrb[13].mxu1 }
 0x480   :  { %v2072_v33 = vadd.f32 %v2071_v32, %v3641_v41 }
 0x481   :  { %v2395_v34 = vcombine.low %v1999_v27, %v2001_v31 }
 0x482   :  { %v2396_v35 = vcombine.low %v2070_v30, %v2072_v33 }
 0x483   :  { %v2405_v19 = vrot.slane %v2395_v34, %v3645_v54 }
 0x484   :  { %v2412_v36 = vrot.slane %v2396_v35, %v3645_v54 }
 0x486   :  { %v2427_v37 = vcombine.low %v2405_v19, %v2412_v36 }
 0x488   :  { %v2435_v51 = vrot.slane %v2427_v37, %v3645_v54 }
 0x4fd   :  { %v2140_v20 = vpop.f32.mrb[14].mxu0 }
 0x4fe   :  { %v2141_v38 = vadd.f32 %v2140_v20, %v3641_v41  ;;  %v2211_v39 = vpop.f32.mrb[14].mxu1  ;;  %v2142_v40 = vpop.f32.mrb[15].mxu0 }
 0x4ff   :  { %v2212_v42 = vadd.f32 %v2211_v39, %v3641_v41  ;;  %v2143_v43 = vadd.f32 %v2142_v40, %v3641_v41  ;;  %v2213_v44 = vpop.f32.mrb[15].mxu1 }
 0x500   :  { %v2214_v45 = vadd.f32 %v2213_v44, %v3641_v41 }
 0x501   :  { %v2397_v46 = vcombine.low %v2141_v38, %v2143_v43 }
 0x502   :  { %v2398_v47 = vcombine.low %v2212_v42, %v2214_v45 }
 0x503   :  { %v2419_v48 = vrot.slane %v2397_v46, %v3645_v54 }
 0x504   :  { %v2426_v49 = vrot.slane %v2398_v47, %v3645_v54 }
 0x506   :  { %v2428_v50 = vcombine.low %v2419_v48, %v2426_v49 }
 0x508   :  { %v2442_v52 = vrot.slane %v2428_v50, %v3645_v54 }
 0x50a   :  { %v2443_v53 = vcombine.low %v2435_v51, %v2442_v52 }
 0x50c   :  { %2451 = vst [vmem:[#allocation8 + $0x18] sm:$0xff] %v2443_v53 }
 0x50d   :  { %3553 = shalt.err (!%p3550_p6)
}
 0x50e   :  { %s3554_s15 = scalar_lea.hbm %s3766_s3, 512 }
 0x50f   :  { %p3555_p7 = scmp.ne.s32.totalorder %s3766_s3, %s3554_s15  ;;  %p3558_p8 = scmp.lt.u32.totalorder %s3554_s15, %s3766_s3 }
 0x511   :  { %p3560_p9 = pnand %p3558_p8, %p3555_p7 }
 0x513   :  { %3563 = shalt.err (!%p3560_p9)
}
 0x514   :  { %2461 = dma.vmem_to_hbm [thread:$0]  %s2459_s11, 512, %s3766_s3, [#allocation5]  }
 0x515   :  { %3568 = dma.done.wait [#allocation5], 512  }
 0x516   :  { %3569 = vsyncadd [#allocation5], 4294966784 }
 0x517   :  { %2465 = vsyncpa [#allocation4], 1 }
 0x518   :  { %2466 = vsyncpa [#allocation7], 1 }
 0x519   :  { %2467 = vsyncpa [#allocation5], 1 }

</bundles_post_ra>
